<compile_context>
chip_gen: v6e
topology: v6e:2x2x1
jax: 0.10.0
libtpu: 0.0.40
codegen_flags: <defaults>
</compile_context>

<pallas_src>
import numpy as np
import jax
import jax.numpy as jnp
from jax.experimental import pallas as pl
from jax.experimental.pallas import tpu as pltpu

LRELU_SLOPE = 0.2
IN_EPS = 1e-5            # nn.InstanceNorm2d default eps
NHIDDEN = 128            # SPADE nhidden (fixed in the PyTorch module)
LANE = 128
# Worst per-step VMEM at demo shapes is ~5 MiB (double-buffered blocks + the 3-slab
# scratch); 32 MiB leaves plenty of headroom and is safe on v5e/v6e (128 MiB) and
# v7x (64 MiB physical per TC).
VMEM_LIMIT = 32 * 1024 * 1024


def _rup(c):
    return ((c + LANE - 1) // LANE) * LANE


def _chunk_rows(h, w, cout):
    """Rows per accumulator chunk: keep the f32 accumulator <= ~128 KiB."""
    max_rows = max(1, 32768 // max(cout, 1))
    best = 1
    for cand in range(1, h + 1):
        if h % cand == 0 and cand * w <= max_rows:
            best = cand
    return best


# --------------------------------------------------------------------------
# Fused [SPADE modulate ->] [act ->] 3x3 conv [-> bias -> +residual -> act] kernel
# --------------------------------------------------------------------------
def _make_conv3x3_kernel(*, H, W, Cin, Cout, rh, modulate, in_act, out_act,
                         has_res, emit_moments):
    """One grid step = one full (H, W) image of one batch element."""
    n_chunks = H // rh

    def kernel(*refs):
        it = iter(refs)
        x_ref = next(it)
        gb_ref = next(it) if modulate else None
        st_ref = next(it) if modulate else None
        w_ref = next(it)
        b_ref = next(it)
        res_ref = next(it) if has_res else None
        o_ref = next(it)
        mom_ref = next(it) if emit_moments else None
        ubuf = next(it)                      # (3, H+2, W, Cin) bf16 scratch

        if modulate:
            st = st_ref[...]                                    # (2, Cin): mean, E[x^2]
            mean = st[0:1, :].reshape(1, 1, Cin)
            msq = st[1:2, :].reshape(1, 1, Cin)
            inv = jax.lax.rsqrt(jnp.maximum(msq - mean * mean, 0.0) + IN_EPS)

        # ---- prologue: modulate + activate + pack into 3 dx-shifted slabs --------
        # slab[dx][r, x, :] == zero-padded-input[r, x + dx, :]  (padded coords), so
        # every tap (dy, dx) reads slab[dx] at a contiguous leading-dim offset.
        zc = jnp.zeros((rh, 1, Cin), jnp.bfloat16)
        for c in range(n_chunks):
            r0 = c * rh
            xv = x_ref[r0:r0 + rh, :, :].astype(jnp.float32)    # (rh, W, Cin)
            if modulate:
                gam = gb_ref[r0:r0 + rh, :, 0:Cin].astype(jnp.float32)
                bet = gb_ref[r0:r0 + rh, :, Cin:2 * Cin].astype(jnp.float32)
                xv = (xv - mean) * inv * (1.0 + gam) + bet
            if in_act == "lrelu":
                xv = jnp.where(xv >= 0.0, xv, LRELU_SLOPE * xv)
            elif in_act == "relu":
                xv = jnp.maximum(xv, 0.0)
            xm = xv.astype(jnp.bfloat16)
            ubuf[0, 1 + r0:1 + r0 + rh, :, :] = jnp.concatenate(
                [zc, xm[:, :W - 1, :]], axis=1)
            ubuf[1, 1 + r0:1 + r0 + rh, :, :] = xm
            ubuf[2, 1 + r0:1 + r0 + rh, :, :] = jnp.concatenate(
                [xm[:, 1:, :], zc], axis=1)
        # Zero only the top/bottom halo rows (conv zero padding); side columns are
        # already zeroed by the concatenates above.
        zrow = jnp.zeros((1, W, Cin), jnp.bfloat16)
        for dx in range(3):
            ubuf[dx, 0:1, :, :] = zrow
            ubuf[dx, H + 1:H + 2, :, :] = zrow

        bias = b_ref[...]                                       # (1, Cout) f32
        if emit_moments:
            s1 = jnp.zeros((1, Cout), jnp.float32)
            s2 = jnp.zeros((1, Cout), jnp.float32)

        # ---- main: 9 taps as MXU matmuls per row-chunk, fused epilogue ----------
        for c in range(n_chunks):
            r0 = c * rh
            acc = jnp.zeros((rh * W, Cout), jnp.float32)
            for dy in range(3):
                for dx in range(3):
                    lhs = ubuf[dx, r0 + dy:r0 + dy + rh, :, :]  # contiguous slice
                    acc = acc + jnp.dot(lhs.reshape(rh * W, Cin),
                                        w_ref[dy * 3 + dx, :, :],
                                        preferred_element_type=jnp.float32)
            acc = acc + bias
            if has_res:
                # Residual is added before out_act; no caller uses both together.
                acc = acc + res_ref[r0:r0 + rh, :, :].reshape(rh * W, Cout).astype(
                    jnp.float32)
            if out_act == "relu":
                acc = jnp.maximum(acc, 0.0)
            elif out_act == "sigmoid":
                acc = jax.nn.sigmoid(acc)
            if emit_moments:
                # Moments from the f32 accumulator (pre-bf16-cast) for better accuracy.
                s1 = s1 + jnp.sum(acc, axis=0, keepdims=True)
                s2 = s2 + jnp.sum(acc * acc, axis=0, keepdims=True)
            o_ref[r0:r0 + rh, :, :] = acc.astype(jnp.bfloat16).reshape(rh, W, Cout)

        if emit_moments:
            inv_hw = 1.0 / float(H * W)
            mom_ref[0:1, :] = s1 * inv_hw
            mom_ref[1:2, :] = s2 * inv_hw

    return kernel


def conv3x3_fused(x, w, b, *, gb=None, stats=None, in_act="none", out_act="none",
                  residual=None, emit_moments=False):
    """3x3 conv (padding=1) on NHWC bf16 with fused SPADE modulation, input/output
    activations, bias, residual add and optional per-image moment emission."""
    N, H, W, Cin = x.shape
    Cout = w.shape[2]
    assert W % 8 == 0 and Cin % LANE == 0 and Cout % LANE == 0
    rh = _chunk_rows(H, W, Cout)
    modulate = gb is not None

    kernel = _make_conv3x3_kernel(H=H, W=W, Cin=Cin, Cout=Cout, rh=rh,
                                  modulate=modulate, in_act=in_act, out_act=out_act,
                                  has_res=residual is not None,
                                  emit_moments=emit_moments)

    inputs = [x]
    in_specs = [pl.BlockSpec((None, H, W, Cin), lambda n: (n, 0, 0, 0))]
    if modulate:
        inputs += [gb, stats]
        in_specs += [pl.BlockSpec((None, H, W, 2 * Cin), lambda n: (n, 0, 0, 0)),
                     pl.BlockSpec((None, 2, Cin), lambda n: (n, 0, 0))]
    inputs += [w, b]
    in_specs += [pl.BlockSpec((9, Cin, Cout), lambda n: (0, 0, 0)),
                 pl.BlockSpec((1, Cout), lambda n: (0, 0))]
    if residual is not None:
        inputs.append(residual)
        in_specs.append(pl.BlockSpec((None, H, W, Cout), lambda n: (n, 0, 0, 0)))

    out_spec_main = pl.BlockSpec((None, H, W, Cout), lambda n: (n, 0, 0, 0))
    if emit_moments:
        out_shape = (jax.ShapeDtypeStruct((N, H, W, Cout), jnp.bfloat16),
                     jax.ShapeDtypeStruct((N, 2, Cout), jnp.float32))
        out_specs = (out_spec_main,
                     pl.BlockSpec((None, 2, Cout), lambda n: (n, 0, 0)))
    else:
        out_shape = jax.ShapeDtypeStruct((N, H, W, Cout), jnp.bfloat16)
        out_specs = out_spec_main

    return pl.pallas_call(
        kernel,
        out_shape=out_shape,
        grid=(N,),
        in_specs=in_specs,
        out_specs=out_specs,
        scratch_shapes=[pltpu.VMEM((3, H + 2, W, Cin), jnp.bfloat16)],
        compiler_params=pltpu.CompilerParams(
            dimension_semantics=("parallel",),
            vmem_limit_bytes=VMEM_LIMIT),
    )(*inputs)


# --------------------------------------------------------------------------
# Learned shortcut: SPADE norm_s + bias-free 1x1 conv_s, fused
# --------------------------------------------------------------------------
def _make_shortcut1x1_kernel(*, H, W, Cin, Cout, rh):
    n_chunks = H // rh

    def kernel(x_ref, gb_ref, st_ref, w_ref, o_ref):
        st = st_ref[...]
        mean = st[0:1, :].reshape(1, 1, Cin)
        msq = st[1:2, :].reshape(1, 1, Cin)
        inv = jax.lax.rsqrt(jnp.maximum(msq - mean * mean, 0.0) + IN_EPS)
        w = w_ref[...]                                        # (Cin, Cout) bf16
        for c in range(n_chunks):
            r0 = c * rh
            xv = x_ref[r0:r0 + rh, :, :].astype(jnp.float32)
            gam = gb_ref[r0:r0 + rh, :, 0:Cin].astype(jnp.float32)
            bet = gb_ref[r0:r0 + rh, :, Cin:2 * Cin].astype(jnp.float32)
            u = (xv - mean) * inv * (1.0 + gam) + bet
            acc = jnp.dot(u.astype(jnp.bfloat16).reshape(rh * W, Cin), w,
                          preferred_element_type=jnp.float32)
            o_ref[r0:r0 + rh, :, :] = acc.astype(jnp.bfloat16).reshape(rh, W, Cout)

    return kernel


def shortcut_conv1x1(x, gb, stats, w):
    N, H, W, Cin = x.shape
    Cout = w.shape[1]
    rh = _chunk_rows(H, W, Cout)
    return pl.pallas_call(
        _make_shortcut1x1_kernel(H=H, W=W, Cin=Cin, Cout=Cout, rh=rh),
        out_shape=jax.ShapeDtypeStruct((N, H, W, Cout), jnp.bfloat16),
        grid=(N,),
        in_specs=[pl.BlockSpec((None, H, W, Cin), lambda n: (n, 0, 0, 0)),
                  pl.BlockSpec((None, H, W, 2 * Cin), lambda n: (n, 0, 0, 0)),
                  pl.BlockSpec((None, 2, Cin), lambda n: (n, 0, 0)),
                  pl.BlockSpec((Cin, Cout), lambda n: (0, 0))],
        out_specs=pl.BlockSpec((None, H, W, Cout), lambda n: (n, 0, 0, 0)),
        compiler_params=pltpu.CompilerParams(
            dimension_semantics=("parallel",),
            vmem_limit_bytes=VMEM_LIMIT),
    )(x, gb, stats, w)


# --------------------------------------------------------------------------
# SPADE / SPADEResnetBlock / SPADEDecoder forward (JAX glue)
# --------------------------------------------------------------------------
def _upsample2_nearest(t):
    # TODO(synk): fuse the nearest-2x upsample into the consumer kernels' input read
    # (duplicate rows/cols of a half-size VMEM block in-kernel) instead of
    # materializing the 4x larger x / seg tensors in HBM.
    return jnp.repeat(jnp.repeat(t, 2, axis=1), 2, axis=2)


def spade_gamma_beta(seg, pn):
    """SPADE mlp_shared (+ReLU) followed by the fused gamma|beta conv."""
    actv = conv3x3_fused(seg, pn["shared_w"], pn["shared_b"], out_act="relu")
    return conv3x3_fused(actv, pn["gb_w"], pn["gb_b"])


def spade_resblock(x, xmom, seg, p):
    if "conv_s_w" in p:                                    # learned shortcut (fin != fout)
        gb_s = spade_gamma_beta(seg, p["norm_s"])
        x_s = shortcut_conv1x1(x, gb_s, xmom, p["conv_s_w"])
    else:
        x_s = x
    gb0 = spade_gamma_beta(seg, p["norm_0"])
    dx, dmom = conv3x3_fused(x, p["conv_0_w"], p["conv_0_b"], gb=gb0, stats=xmom,
                             in_act="lrelu", emit_moments=True)
    gb1 = spade_gamma_beta(seg, p["norm_1"])
    out, omom = conv3x3_fused(dx, p["conv_1_w"], p["conv_1_b"], gb=gb1, stats=dmom,
                              in_act="lrelu", residual=x_s, emit_moments=True)
    return out, omom


def spade_decoder_forward(feature_nchw, params):
    x_nhwc = jnp.transpose(feature_nchw, (0, 2, 3, 1)).astype(jnp.float32)
    N, H, W, Cf = x_nhwc.shape
    seg = jnp.pad(x_nhwc, ((0, 0), (0, 0), (0, 0),
                           (0, _rup(Cf) - Cf))).astype(jnp.bfloat16)

    x, xmom = conv3x3_fused(seg, params["fc_w"], params["fc_b"], emit_moments=True)

    # The 6 identical G_middle blocks run under one scan -> one trace / Mosaic compile.
    gm_params = [params["G_middle_%d" % i] for i in range(6)]
    gm_stacked = jax.tree_util.tree_map(lambda *a: jnp.stack(a, axis=0), *gm_params)

    def gm_body(carry, bp):
        cx, cmom = carry
        cx, cmom = spade_resblock(cx, cmom, seg, bp)
        return (cx, cmom), None

    (x, xmom), _ = jax.lax.scan(gm_body, (x, xmom), gm_stacked)

    # Per-channel (mean, E[x^2]) are invariant under exact nearest-2x upsampling,
    # so xmom is reused as-is after each upsample.
    x = _upsample2_nearest(x)
    seg = _upsample2_nearest(seg)
    x, xmom = spade_resblock(x, xmom, seg, params["up_0"])

    x = _upsample2_nearest(x)
    seg = _upsample2_nearest(seg)
    x, xmom = spade_resblock(x, xmom, seg, params["up_1"])

    out = conv3x3_fused(x, params["conv_img_w"], params["conv_img_b"],
                        in_act="lrelu", out_act="sigmoid")
    out = out[..., :3].astype(jnp.float32)                 # drop channel padding
    return jnp.transpose(out, (0, 3, 1, 2))                # NHWC -> NCHW


# --------------------------------------------------------------------------
# Deterministic synthetic parameters (pre-padded / fused weight layout)
# --------------------------------------------------------------------------
def _init_conv3x3(key, cin, cout):
    kw, kb = jax.random.split(key)
    w = jax.random.normal(kw, (3, 3, cin, cout), jnp.float32) / np.sqrt(9 * cin)
    b = 0.01 * jax.random.normal(kb, (cout,), jnp.float32)
    return w, b


def _pack_w3(w, cinp, coutp):
    # w must be (kh, kw, cin, cout).  Real PyTorch Conv2d weights are
    # (cout, cin, kh, kw); convert with w.permute(2, 3, 1, 0) before packing.
    assert w.ndim == 4 and w.shape[0] == 3 and w.shape[1] == 3, \
        "expected (3, 3, cin, cout) weights"
    _, _, cin, cout = w.shape
    out = jnp.zeros((9, cinp, coutp), jnp.float32)
    out = out.at[:, :cin, :cout].set(w.reshape(9, cin, cout))
    return out.astype(jnp.bfloat16)


def _pack_b(b, coutp):
    return jnp.zeros((1, coutp), jnp.float32).at[0, :b.shape[0]].set(b)


def _init_spade(key, norm_nc, label_nc):
    k1, k2, k3 = jax.random.split(key, 3)
    ncp, lcp, hp = _rup(norm_nc), _rup(label_nc), _rup(NHIDDEN)
    sw, sb = _init_conv3x3(k1, label_nc, NHIDDEN)
    gw, gbias = _init_conv3x3(k2, NHIDDEN, norm_nc)
    bw, bbias = _init_conv3x3(k3, NHIDDEN, norm_nc)
    # Fused gamma|beta conv: first ncp lanes = gamma, last ncp lanes = beta.
    gb_w = jnp.zeros((9, hp, 2 * ncp), jnp.float32)
    gb_w = gb_w.at[:, :NHIDDEN, :norm_nc].set(gw.reshape(9, NHIDDEN, norm_nc))
    gb_w = gb_w.at[:, :NHIDDEN, ncp:ncp + norm_nc].set(bw.reshape(9, NHIDDEN, norm_nc))
    gb_b = jnp.zeros((1, 2 * ncp), jnp.float32)
    gb_b = gb_b.at[0, :norm_nc].set(gbias).at[0, ncp:ncp + norm_nc].set(bbias)
    return {"shared_w": _pack_w3(sw, lcp, hp), "shared_b": _pack_b(sb, hp),
            "gb_w": gb_w.astype(jnp.bfloat16), "gb_b": gb_b}


def _init_resblock(key, fin, fout, label_nc):
    # TODO(synk): spectral_norm is only a load-time rescaling of the conv weights; the
    # synthetic weights here are treated as already spectrally normalized.
    fmid = min(fin, fout)
    keys = jax.random.split(key, 6)
    p = {}
    w0, b0 = _init_conv3x3(keys[0], fin, fmid)
    w1, b1 = _init_conv3x3(keys[1], fmid, fout)
    p["conv_0_w"] = _pack_w3(w0, _rup(fin), _rup(fmid))
    p["conv_0_b"] = _pack_b(b0, _rup(fmid))
    p["conv_1_w"] = _pack_w3(w1, _rup(fmid), _rup(fout))
    p["conv_1_b"] = _pack_b(b1, _rup(fout))
    p["norm_0"] = _init_spade(keys[2], fin, label_nc)
    p["norm_1"] = _init_spade(keys[3], fmid, label_nc)
    if fin != fout:
        ws = jax.random.normal(keys[4], (fin, fout), jnp.float32) / np.sqrt(fin)
        p["conv_s_w"] = (jnp.zeros((_rup(fin), _rup(fout)), jnp.float32)
                         .at[:fin, :fout].set(ws).astype(jnp.bfloat16))
        p["norm_s"] = _init_spade(keys[5], fin, label_nc)
    return p


def init_decoder_params(key, input_channels, out_channels, upscale=1):
    # TODO(synk): PixelShuffle branch (upscale > 1) of conv_img is not implemented.
    assert upscale is None or upscale <= 1
    C = input_channels
    keys = jax.random.split(key, 10)
    params = {}
    wf, bf = _init_conv3x3(keys[0], C, 2 * C)
    params["fc_w"] = _pack_w3(wf, _rup(C), _rup(2 * C))
    params["fc_b"] = _pack_b(bf, _rup(2 * C))
    for i in range(6):
        params["G_middle_%d" % i] = _init_resblock(keys[1 + i], 2 * C, 2 * C, C)
    params["up_0"] = _init_resblock(keys[7], 2 * C, C, C)
    params["up_1"] = _init_resblock(keys[8], C, out_channels, C)
    wi, bi = _init_conv3x3(keys[9], out_channels, 3)
    params["conv_img_w"] = _pack_w3(wi, _rup(out_channels), _rup(3))
    params["conv_img_b"] = _pack_b(bi, _rup(3))
    return params


# --------------------------------------------------------------------------
if __name__ == "__main__":
    # SPADEDecoder(block_expansion=8, max_features=16, num_down_blocks=2):
    #   input_channels = min(16, 8 * 2**2) = 16, out_channels = 8, upscale = 1
    input_channels = 16
    out_channels = 8
    N, H, W = 2, 8, 8

    key = jax.random.PRNGKey(0)
    pkey, xkey, ckey = jax.random.split(key, 3)

    # Sanity-check the fused 3x3 conv (exercises slab packing, borders and chunking).
    cw, cb = _init_conv3x3(jax.random.fold_in(ckey, 0), 128, 128)
    xchk = jax.random.normal(jax.random.fold_in(ckey, 1), (1, 32, 16, 128),
                             jnp.float32).astype(jnp.bfloat16)
    got = conv3x3_fused(xchk, _pack_w3(cw, 128, 128),
                        _pack_b(cb, 128)).astype(jnp.float32)
    ref = jax.lax.conv_general_dilated(
        xchk.astype(jnp.float32), cw, (1, 1), "SAME",
        dimension_numbers=("NHWC", "HWIO", "NHWC"),
        precision=jax.lax.Precision.HIGHEST) + cb.reshape(1, 1, 1, 128)
    assert float(jnp.max(jnp.abs(got - ref))) < 0.1, "conv3x3 kernel mismatch"

    params = init_decoder_params(pkey, input_channels, out_channels)
    feature = jax.random.normal(xkey, (N, input_channels, H, W), jnp.float32)

    fwd = jax.jit(spade_decoder_forward)
    out = fwd(feature, params)
    jax.block_until_ready(out)
    assert out.shape == (N, 3, 4 * H, 4 * W), out.shape
    assert bool(jnp.all(jnp.isfinite(out)))
    print("KERNEL_OK")
</pallas_src>

<mosaic_0001>
module attributes {stable_mosaic.version = 11 : i64} {
  func.func @kernel(%arg0: i32, %arg1: memref<1x32x16x128xbf16, #tpu.memory_space<vmem>>, %arg2: memref<9x128x128xbf16, #tpu.memory_space<vmem>>, %arg3: memref<1x128xf32, #tpu.memory_space<vmem>>, %arg4: memref<1x32x16x128xbf16, #tpu.memory_space<vmem>>, %arg5: memref<3x34x16x128xbf16, #tpu.memory_space<vmem>>) attributes {dimension_semantics = [#tpu.dimension_semantics<parallel>], iteration_bounds = array<i64: 1>, scalar_prefetch = 0 : i64, scratch_operands = 1 : i64, tpu.core_type = #tpu.core_type<tc>, window_params = [{transform_indices = @transform_0, window_bounds = array<i64: 1, 32, 16, 128>}, {pipeline_mode = #tpu.pipeline_mode<synchronous>, transform_indices = @transform_1, window_bounds = array<i64: 9, 128, 128>}, {pipeline_mode = #tpu.pipeline_mode<synchronous>, transform_indices = @transform_2, window_bounds = array<i64: 1, 128>}, {transform_indices = @transform_3, window_bounds = array<i64: 1, 32, 16, 128>}]} {
    %cst = arith.constant 0.000000e+00 : bf16
    %0 = vector.broadcast %cst : bf16 to vector<16x1x128xbf16>
    %c0 = arith.constant 0 : index
    %c0_0 = arith.constant 0 : index
    %c0_1 = arith.constant 0 : index
    %c0_2 = arith.constant 0 : index
    %1 = vector.load %arg1[%c0, %c0_0, %c0_1, %c0_2] : memref<1x32x16x128xbf16, #tpu.memory_space<vmem>>, vector<1x16x16x128xbf16>
    %2 = vector.shape_cast %1 : vector<1x16x16x128xbf16> to vector<16x16x128xbf16>
    %3 = arith.extf %2 : vector<16x16x128xbf16> to vector<16x16x128xf32>
    %4 = arith.truncf %3 : vector<16x16x128xf32> to vector<16x16x128xbf16>
    %5 = vector.extract_strided_slice %4 {offsets = [0, 0, 0], sizes = [16, 15, 128], strides = [1, 1, 1]} : vector<16x16x128xbf16> to vector<16x15x128xbf16>
    %6 = tpu.concatenate %0, %5 in 1 : vector<16x1x128xbf16>, vector<16x15x128xbf16> -> vector<16x16x128xbf16>
    %c0_3 = arith.constant 0 : index
    %c1 = arith.constant 1 : index
    %c0_4 = arith.constant 0 : index
    %c0_5 = arith.constant 0 : index
    %7 = vector.load %arg5[%c0_3, %c1, %c0_4, %c0_5] : memref<3x34x16x128xbf16, #tpu.memory_space<vmem>>, vector<1x16x16x128xbf16>
    %8 = vector.shape_cast %7 : vector<1x16x16x128xbf16> to vector<16x16x128xbf16>
    %9 = vector.shape_cast %6 : vector<16x16x128xbf16> to vector<1x16x16x128xbf16>
    tpu.vector_store %arg5[%c0_3, %c1, %c0_4, %c0_5], %9 {strides = array<i32>} : memref<3x34x16x128xbf16, #tpu.memory_space<vmem>>, vector<1x16x16x128xbf16>,
    %c1_6 = arith.constant 1 : index
    %c1_7 = arith.constant 1 : index
    %c0_8 = arith.constant 0 : index
    %c0_9 = arith.constant 0 : index
    %10 = vector.load %arg5[%c1_6, %c1_7, %c0_8, %c0_9] : memref<3x34x16x128xbf16, #tpu.memory_space<vmem>>, vector<1x16x16x128xbf16>
    %11 = vector.shape_cast %10 : vector<1x16x16x128xbf16> to vector<16x16x128xbf16>
    %12 = vector.shape_cast %4 : vector<16x16x128xbf16> to vector<1x16x16x128xbf16>
    tpu.vector_store %arg5[%c1_6, %c1_7, %c0_8, %c0_9], %12 {strides = array<i32>} : memref<3x34x16x128xbf16, #tpu.memory_space<vmem>>, vector<1x16x16x128xbf16>,
    %13 = vector.extract_strided_slice %4 {offsets = [0, 1, 0], sizes = [16, 15, 128], strides = [1, 1, 1]} : vector<16x16x128xbf16> to vector<16x15x128xbf16>
    %14 = tpu.concatenate %13, %0 in 1 : vector<16x15x128xbf16>, vector<16x1x128xbf16> -> vector<16x16x128xbf16>
    %c2 = arith.constant 2 : index
    %c1_10 = arith.constant 1 : index
    %c0_11 = arith.constant 0 : index
    %c0_12 = arith.constant 0 : index
    %15 = vector.load %arg5[%c2, %c1_10, %c0_11, %c0_12] : memref<3x34x16x128xbf16, #tpu.memory_space<vmem>>, vector<1x16x16x128xbf16>
    %16 = vector.shape_cast %15 : vector<1x16x16x128xbf16> to vector<16x16x128xbf16>
    %17 = vector.shape_cast %14 : vector<16x16x128xbf16> to vector<1x16x16x128xbf16>
    tpu.vector_store %arg5[%c2, %c1_10, %c0_11, %c0_12], %17 {strides = array<i32>} : memref<3x34x16x128xbf16, #tpu.memory_space<vmem>>, vector<1x16x16x128xbf16>,
    %c0_13 = arith.constant 0 : index
    %c16 = arith.constant 16 : index
    %c0_14 = arith.constant 0 : index
    %c0_15 = arith.constant 0 : index
    %18 = vector.load %arg1[%c0_13, %c16, %c0_14, %c0_15] : memref<1x32x16x128xbf16, #tpu.memory_space<vmem>>, vector<1x16x16x128xbf16>
    %19 = vector.shape_cast %18 : vector<1x16x16x128xbf16> to vector<16x16x128xbf16>
    %20 = arith.extf %19 : vector<16x16x128xbf16> to vector<16x16x128xf32>
    %21 = arith.truncf %20 : vector<16x16x128xf32> to vector<16x16x128xbf16>
    %22 = vector.extract_strided_slice %21 {offsets = [0, 0, 0], sizes = [16, 15, 128], strides = [1, 1, 1]} : vector<16x16x128xbf16> to vector<16x15x128xbf16>
    %23 = tpu.concatenate %0, %22 in 1 : vector<16x1x128xbf16>, vector<16x15x128xbf16> -> vector<16x16x128xbf16>
    %c0_16 = arith.constant 0 : index
    %c17 = arith.constant 17 : index
    %c0_17 = arith.constant 0 : index
    %c0_18 = arith.constant 0 : index
    %24 = vector.load %arg5[%c0_16, %c17, %c0_17, %c0_18] : memref<3x34x16x128xbf16, #tpu.memory_space<vmem>>, vector<1x16x16x128xbf16>
    %25 = vector.shape_cast %24 : vector<1x16x16x128xbf16> to vector<16x16x128xbf16>
    %26 = vector.shape_cast %23 : vector<16x16x128xbf16> to vector<1x16x16x128xbf16>
    tpu.vector_store %arg5[%c0_16, %c17, %c0_17, %c0_18], %26 {strides = array<i32>} : memref<3x34x16x128xbf16, #tpu.memory_space<vmem>>, vector<1x16x16x128xbf16>,
    %c1_19 = arith.constant 1 : index
    %c17_20 = arith.constant 17 : index
    %c0_21 = arith.constant 0 : index
    %c0_22 = arith.constant 0 : index
    %27 = vector.load %arg5[%c1_19, %c17_20, %c0_21, %c0_22] : memref<3x34x16x128xbf16, #tpu.memory_space<vmem>>, vector<1x16x16x128xbf16>
    %28 = vector.shape_cast %27 : vector<1x16x16x128xbf16> to vector<16x16x128xbf16>
    %29 = vector.shape_cast %21 : vector<16x16x128xbf16> to vector<1x16x16x128xbf16>
    tpu.vector_store %arg5[%c1_19, %c17_20, %c0_21, %c0_22], %29 {strides = array<i32>} : memref<3x34x16x128xbf16, #tpu.memory_space<vmem>>, vector<1x16x16x128xbf16>,
    %30 = vector.extract_strided_slice %21 {offsets = [0, 1, 0], sizes = [16, 15, 128], strides = [1, 1, 1]} : vector<16x16x128xbf16> to vector<16x15x128xbf16>
    %31 = tpu.concatenate %30, %0 in 1 : vector<16x15x128xbf16>, vector<16x1x128xbf16> -> vector<16x16x128xbf16>
    %c2_23 = arith.constant 2 : index
    %c17_24 = arith.constant 17 : index
    %c0_25 = arith.constant 0 : index
    %c0_26 = arith.constant 0 : index
    %32 = vector.load %arg5[%c2_23, %c17_24, %c0_25, %c0_26] : memref<3x34x16x128xbf16, #tpu.memory_space<vmem>>, vector<1x16x16x128xbf16>
    %33 = vector.shape_cast %32 : vector<1x16x16x128xbf16> to vector<16x16x128xbf16>
    %34 = vector.shape_cast %31 : vector<16x16x128xbf16> to vector<1x16x16x128xbf16>
    tpu.vector_store %arg5[%c2_23, %c17_24, %c0_25, %c0_26], %34 {strides = array<i32>} : memref<3x34x16x128xbf16, #tpu.memory_space<vmem>>, vector<1x16x16x128xbf16>,
    %cst_27 = arith.constant 0.000000e+00 : bf16
    %35 = vector.broadcast %cst_27 : bf16 to vector<1x16x128xbf16>
    %c0_28 = arith.constant 0 : index
    %c0_29 = arith.constant 0 : index
    %c0_30 = arith.constant 0 : index
    %c0_31 = arith.constant 0 : index
    %36 = vector.load %arg5[%c0_28, %c0_29, %c0_30, %c0_31] : memref<3x34x16x128xbf16, #tpu.memory_space<vmem>>, vector<1x1x16x128xbf16>
    %37 = vector.shape_cast %36 : vector<1x1x16x128xbf16> to vector<1x16x128xbf16>
    %38 = vector.shape_cast %35 : vector<1x16x128xbf16> to vector<1x1x16x128xbf16>
    tpu.vector_store %arg5[%c0_28, %c0_29, %c0_30, %c0_31], %38 {strides = array<i32>} : memref<3x34x16x128xbf16, #tpu.memory_space<vmem>>, vector<1x1x16x128xbf16>,
    %c0_32 = arith.constant 0 : index
    %c33 = arith.constant 33 : index
    %c0_33 = arith.constant 0 : index
    %c0_34 = arith.constant 0 : index
    %39 = vector.load %arg5[%c0_32, %c33, %c0_33, %c0_34] : memref<3x34x16x128xbf16, #tpu.memory_space<vmem>>, vector<1x1x16x128xbf16>
    %40 = vector.shape_cast %39 : vector<1x1x16x128xbf16> to vector<1x16x128xbf16>
    %41 = vector.shape_cast %35 : vector<1x16x128xbf16> to vector<1x1x16x128xbf16>
    tpu.vector_store %arg5[%c0_32, %c33, %c0_33, %c0_34], %41 {strides = array<i32>} : memref<3x34x16x128xbf16, #tpu.memory_space<vmem>>, vector<1x1x16x128xbf16>,
    %c1_35 = arith.constant 1 : index
    %c0_36 = arith.constant 0 : index
    %c0_37 = arith.constant 0 : index
    %c0_38 = arith.constant 0 : index
    %42 = vector.load %arg5[%c1_35, %c0_36, %c0_37, %c0_38] : memref<3x34x16x128xbf16, #tpu.memory_space<vmem>>, vector<1x1x16x128xbf16>
    %43 = vector.shape_cast %42 : vector<1x1x16x128xbf16> to vector<1x16x128xbf16>
    %44 = vector.shape_cast %35 : vector<1x16x128xbf16> to vector<1x1x16x128xbf16>
    tpu.vector_store %arg5[%c1_35, %c0_36, %c0_37, %c0_38], %44 {strides = array<i32>} : memref<3x34x16x128xbf16, #tpu.memory_space<vmem>>, vector<1x1x16x128xbf16>,
    %c1_39 = arith.constant 1 : index
    %c33_40 = arith.constant 33 : index
    %c0_41 = arith.constant 0 : index
    %c0_42 = arith.constant 0 : index
    %45 = vector.load %arg5[%c1_39, %c33_40, %c0_41, %c0_42] : memref<3x34x16x128xbf16, #tpu.memory_space<vmem>>, vector<1x1x16x128xbf16>
    %46 = vector.shape_cast %45 : vector<1x1x16x128xbf16> to vector<1x16x128xbf16>
    %47 = vector.shape_cast %35 : vector<1x16x128xbf16> to vector<1x1x16x128xbf16>
    tpu.vector_store %arg5[%c1_39, %c33_40, %c0_41, %c0_42], %47 {strides = array<i32>} : memref<3x34x16x128xbf16, #tpu.memory_space<vmem>>, vector<1x1x16x128xbf16>,
    %c2_43 = arith.constant 2 : index
    %c0_44 = arith.constant 0 : index
    %c0_45 = arith.constant 0 : index
    %c0_46 = arith.constant 0 : index
    %48 = vector.load %arg5[%c2_43, %c0_44, %c0_45, %c0_46] : memref<3x34x16x128xbf16, #tpu.memory_space<vmem>>, vector<1x1x16x128xbf16>
    %49 = vector.shape_cast %48 : vector<1x1x16x128xbf16> to vector<1x16x128xbf16>
    %50 = vector.shape_cast %35 : vector<1x16x128xbf16> to vector<1x1x16x128xbf16>
    tpu.vector_store %arg5[%c2_43, %c0_44, %c0_45, %c0_46], %50 {strides = array<i32>} : memref<3x34x16x128xbf16, #tpu.memory_space<vmem>>, vector<1x1x16x128xbf16>,
    %c2_47 = arith.constant 2 : index
    %c33_48 = arith.constant 33 : index
    %c0_49 = arith.constant 0 : index
    %c0_50 = arith.constant 0 : index
    %51 = vector.load %arg5[%c2_47, %c33_48, %c0_49, %c0_50] : memref<3x34x16x128xbf16, #tpu.memory_space<vmem>>, vector<1x1x16x128xbf16>
    %52 = vector.shape_cast %51 : vector<1x1x16x128xbf16> to vector<1x16x128xbf16>
    %53 = vector.shape_cast %35 : vector<1x16x128xbf16> to vector<1x1x16x128xbf16>
    tpu.vector_store %arg5[%c2_47, %c33_48, %c0_49, %c0_50], %53 {strides = array<i32>} : memref<3x34x16x128xbf16, #tpu.memory_space<vmem>>, vector<1x1x16x128xbf16>,
    %c0_51 = arith.constant 0 : index
    %c0_52 = arith.constant 0 : index
    %54 = vector.load %arg3[%c0_51, %c0_52] : memref<1x128xf32, #tpu.memory_space<vmem>>, vector<1x128xf32>
    %cst_53 = arith.constant 0.000000e+00 : f32
    %55 = vector.broadcast %cst_53 : f32 to vector<256x128xf32>
    %c0_54 = arith.constant 0 : index
    %c0_55 = arith.constant 0 : index
    %c0_56 = arith.constant 0 : index
    %c0_57 = arith.constant 0 : index
    %56 = vector.load %arg5[%c0_54, %c0_55, %c0_56, %c0_57] : memref<3x34x16x128xbf16, #tpu.memory_space<vmem>>, vector<1x16x16x128xbf16>
    %57 = vector.shape_cast %56 : vector<1x16x16x128xbf16> to vector<16x16x128xbf16>
    %58 = vector.shape_cast %57 : vector<16x16x128xbf16> to vector<256x128xbf16>
    %c0_58 = arith.constant 0 : index
    %c0_59 = arith.constant 0 : index
    %c0_60 = arith.constant 0 : index
    %59 = vector.load %arg2[%c0_58, %c0_59, %c0_60] : memref<9x128x128xbf16, #tpu.memory_space<vmem>>, vector<1x128x128xbf16>
    %60 = vector.shape_cast %59 : vector<1x128x128xbf16> to vector<128x128xbf16>
    %cst_61 = arith.constant dense<0.000000e+00> : vector<256x128xf32>
    %61 = tpu.matmul %58, %60, %cst_61 {dimension_numbers = #tpu.dot_dimension_numbers<[1], [0], [0], [1], [0, 0, 1, 1], [], []>} : vector<256x128xbf16>, vector<128x128xbf16>, vector<256x128xf32> -> vector<256x128xf32>
    %62 = arith.addf %55, %61 : vector<256x128xf32>
    %c1_62 = arith.constant 1 : index
    %c0_63 = arith.constant 0 : index
    %c0_64 = arith.constant 0 : index
    %c0_65 = arith.constant 0 : index
    %63 = vector.load %arg5[%c1_62, %c0_63, %c0_64, %c0_65] : memref<3x34x16x128xbf16, #tpu.memory_space<vmem>>, vector<1x16x16x128xbf16>
    %64 = vector.shape_cast %63 : vector<1x16x16x128xbf16> to vector<16x16x128xbf16>
    %65 = vector.shape_cast %64 : vector<16x16x128xbf16> to vector<256x128xbf16>
    %c1_66 = arith.constant 1 : index
    %c0_67 = arith.constant 0 : index
    %c0_68 = arith.constant 0 : index
    %66 = vector.load %arg2[%c1_66, %c0_67, %c0_68] : memref<9x128x128xbf16, #tpu.memory_space<vmem>>, vector<1x128x128xbf16>
    %67 = vector.shape_cast %66 : vector<1x128x128xbf16> to vector<128x128xbf16>
    %cst_69 = arith.constant dense<0.000000e+00> : vector<256x128xf32>
    %68 = tpu.matmul %65, %67, %cst_69 {dimension_numbers = #tpu.dot_dimension_numbers<[1], [0], [0], [1], [0, 0, 1, 1], [], []>} : vector<256x128xbf16>, vector<128x128xbf16>, vector<256x128xf32> -> vector<256x128xf32>
    %69 = arith.addf %62, %68 : vector<256x128xf32>
    %c2_70 = arith.constant 2 : index
    %c0_71 = arith.constant 0 : index
    %c0_72 = arith.constant 0 : index
    %c0_73 = arith.constant 0 : index
    %70 = vector.load %arg5[%c2_70, %c0_71, %c0_72, %c0_73] : memref<3x34x16x128xbf16, #tpu.memory_space<vmem>>, vector<1x16x16x128xbf16>
    %71 = vector.shape_cast %70 : vector<1x16x16x128xbf16> to vector<16x16x128xbf16>
    %72 = vector.shape_cast %71 : vector<16x16x128xbf16> to vector<256x128xbf16>
    %c2_74 = arith.constant 2 : index
    %c0_75 = arith.constant 0 : index
    %c0_76 = arith.constant 0 : index
    %73 = vector.load %arg2[%c2_74, %c0_75, %c0_76] : memref<9x128x128xbf16, #tpu.memory_space<vmem>>, vector<1x128x128xbf16>
    %74 = vector.shape_cast %73 : vector<1x128x128xbf16> to vector<128x128xbf16>
    %cst_77 = arith.constant dense<0.000000e+00> : vector<256x128xf32>
    %75 = tpu.matmul %72, %74, %cst_77 {dimension_numbers = #tpu.dot_dimension_numbers<[1], [0], [0], [1], [0, 0, 1, 1], [], []>} : vector<256x128xbf16>, vector<128x128xbf16>, vector<256x128xf32> -> vector<256x128xf32>
    %76 = arith.addf %69, %75 : vector<256x128xf32>
    %c0_78 = arith.constant 0 : index
    %c1_79 = arith.constant 1 : index
    %c0_80 = arith.constant 0 : index
    %c0_81 = arith.constant 0 : index
    %77 = vector.load %arg5[%c0_78, %c1_79, %c0_80, %c0_81] : memref<3x34x16x128xbf16, #tpu.memory_space<vmem>>, vector<1x16x16x128xbf16>
    %78 = vector.shape_cast %77 : vector<1x16x16x128xbf16> to vector<16x16x128xbf16>
    %79 = vector.shape_cast %78 : vector<16x16x128xbf16> to vector<256x128xbf16>
    %c3 = arith.constant 3 : index
    %c0_82 = arith.constant 0 : index
    %c0_83 = arith.constant 0 : index
    %80 = vector.load %arg2[%c3, %c0_82, %c0_83] : memref<9x128x128xbf16, #tpu.memory_space<vmem>>, vector<1x128x128xbf16>
    %81 = vector.shape_cast %80 : vector<1x128x128xbf16> to vector<128x128xbf16>
    %cst_84 = arith.constant dense<0.000000e+00> : vector<256x128xf32>
    %82 = tpu.matmul %79, %81, %cst_84 {dimension_numbers = #tpu.dot_dimension_numbers<[1], [0], [0], [1], [0, 0, 1, 1], [], []>} : vector<256x128xbf16>, vector<128x128xbf16>, vector<256x128xf32> -> vector<256x128xf32>
    %83 = arith.addf %76, %82 : vector<256x128xf32>
    %c1_85 = arith.constant 1 : index
    %c1_86 = arith.constant 1 : index
    %c0_87 = arith.constant 0 : index
    %c0_88 = arith.constant 0 : index
    %84 = vector.load %arg5[%c1_85, %c1_86, %c0_87, %c0_88] : memref<3x34x16x128xbf16, #tpu.memory_space<vmem>>, vector<1x16x16x128xbf16>
    %85 = vector.shape_cast %84 : vector<1x16x16x128xbf16> to vector<16x16x128xbf16>
    %86 = vector.shape_cast %85 : vector<16x16x128xbf16> to vector<256x128xbf16>
    %c4 = arith.constant 4 : index
    %c0_89 = arith.constant 0 : index
    %c0_90 = arith.constant 0 : index
    %87 = vector.load %arg2[%c4, %c0_89, %c0_90] : memref<9x128x128xbf16, #tpu.memory_space<vmem>>, vector<1x128x128xbf16>
    %88 = vector.shape_cast %87 : vector<1x128x128xbf16> to vector<128x128xbf16>
    %cst_91 = arith.constant dense<0.000000e+00> : vector<256x128xf32>
    %89 = tpu.matmul %86, %88, %cst_91 {dimension_numbers = #tpu.dot_dimension_numbers<[1], [0], [0], [1], [0, 0, 1, 1], [], []>} : vector<256x128xbf16>, vector<128x128xbf16>, vector<256x128xf32> -> vector<256x128xf32>
    %90 = arith.addf %83, %89 : vector<256x128xf32>
    %c2_92 = arith.constant 2 : index
    %c1_93 = arith.constant 1 : index
    %c0_94 = arith.constant 0 : index
    %c0_95 = arith.constant 0 : index
    %91 = vector.load %arg5[%c2_92, %c1_93, %c0_94, %c0_95] : memref<3x34x16x128xbf16, #tpu.memory_space<vmem>>, vector<1x16x16x128xbf16>
    %92 = vector.shape_cast %91 : vector<1x16x16x128xbf16> to vector<16x16x128xbf16>
    %93 = vector.shape_cast %92 : vector<16x16x128xbf16> to vector<256x128xbf16>
    %c5 = arith.constant 5 : index
    %c0_96 = arith.constant 0 : index
    %c0_97 = arith.constant 0 : index
    %94 = vector.load %arg2[%c5, %c0_96, %c0_97] : memref<9x128x128xbf16, #tpu.memory_space<vmem>>, vector<1x128x128xbf16>
    %95 = vector.shape_cast %94 : vector<1x128x128xbf16> to vector<128x128xbf16>
    %cst_98 = arith.constant dense<0.000000e+00> : vector<256x128xf32>
    %96 = tpu.matmul %93, %95, %cst_98 {dimension_numbers = #tpu.dot_dimension_numbers<[1], [0], [0], [1], [0, 0, 1, 1], [], []>} : vector<256x128xbf16>, vector<128x128xbf16>, vector<256x128xf32> -> vector<256x128xf32>
    %97 = arith.addf %90, %96 : vector<256x128xf32>
    %c0_99 = arith.constant 0 : index
    %c2_100 = arith.constant 2 : index
    %c0_101 = arith.constant 0 : index
    %c0_102 = arith.constant 0 : index
    %98 = vector.load %arg5[%c0_99, %c2_100, %c0_101, %c0_102] : memref<3x34x16x128xbf16, #tpu.memory_space<vmem>>, vector<1x16x16x128xbf16>
    %99 = vector.shape_cast %98 : vector<1x16x16x128xbf16> to vector<16x16x128xbf16>
    %100 = vector.shape_cast %99 : vector<16x16x128xbf16> to vector<256x128xbf16>
    %c6 = arith.constant 6 : index
    %c0_103 = arith.constant 0 : index
    %c0_104 = arith.constant 0 : index
    %101 = vector.load %arg2[%c6, %c0_103, %c0_104] : memref<9x128x128xbf16, #tpu.memory_space<vmem>>, vector<1x128x128xbf16>
    %102 = vector.shape_cast %101 : vector<1x128x128xbf16> to vector<128x128xbf16>
    %cst_105 = arith.constant dense<0.000000e+00> : vector<256x128xf32>
    %103 = tpu.matmul %100, %102, %cst_105 {dimension_numbers = #tpu.dot_dimension_numbers<[1], [0], [0], [1], [0, 0, 1, 1], [], []>} : vector<256x128xbf16>, vector<128x128xbf16>, vector<256x128xf32> -> vector<256x128xf32>
    %104 = arith.addf %97, %103 : vector<256x128xf32>
    %c1_106 = arith.constant 1 : index
    %c2_107 = arith.constant 2 : index
    %c0_108 = arith.constant 0 : index
    %c0_109 = arith.constant 0 : index
    %105 = vector.load %arg5[%c1_106, %c2_107, %c0_108, %c0_109] : memref<3x34x16x128xbf16, #tpu.memory_space<vmem>>, vector<1x16x16x128xbf16>
    %106 = vector.shape_cast %105 : vector<1x16x16x128xbf16> to vector<16x16x128xbf16>
    %107 = vector.shape_cast %106 : vector<16x16x128xbf16> to vector<256x128xbf16>
    %c7 = arith.constant 7 : index
    %c0_110 = arith.constant 0 : index
    %c0_111 = arith.constant 0 : index
    %108 = vector.load %arg2[%c7, %c0_110, %c0_111] : memref<9x128x128xbf16, #tpu.memory_space<vmem>>, vector<1x128x128xbf16>
    %109 = vector.shape_cast %108 : vector<1x128x128xbf16> to vector<128x128xbf16>
    %cst_112 = arith.constant dense<0.000000e+00> : vector<256x128xf32>
    %110 = tpu.matmul %107, %109, %cst_112 {dimension_numbers = #tpu.dot_dimension_numbers<[1], [0], [0], [1], [0, 0, 1, 1], [], []>} : vector<256x128xbf16>, vector<128x128xbf16>, vector<256x128xf32> -> vector<256x128xf32>
    %111 = arith.addf %104, %110 : vector<256x128xf32>
    %c2_113 = arith.constant 2 : index
    %c2_114 = arith.constant 2 : index
    %c0_115 = arith.constant 0 : index
    %c0_116 = arith.constant 0 : index
    %112 = vector.load %arg5[%c2_113, %c2_114, %c0_115, %c0_116] : memref<3x34x16x128xbf16, #tpu.memory_space<vmem>>, vector<1x16x16x128xbf16>
    %113 = vector.shape_cast %112 : vector<1x16x16x128xbf16> to vector<16x16x128xbf16>
    %114 = vector.shape_cast %113 : vector<16x16x128xbf16> to vector<256x128xbf16>
    %c8 = arith.constant 8 : index
    %c0_117 = arith.constant 0 : index
    %c0_118 = arith.constant 0 : index
    %115 = vector.load %arg2[%c8, %c0_117, %c0_118] : memref<9x128x128xbf16, #tpu.memory_space<vmem>>, vector<1x128x128xbf16>
    %116 = vector.shape_cast %115 : vector<1x128x128xbf16> to vector<128x128xbf16>
    %cst_119 = arith.constant dense<0.000000e+00> : vector<256x128xf32>
    %117 = tpu.matmul %114, %116, %cst_119 {dimension_numbers = #tpu.dot_dimension_numbers<[1], [0], [0], [1], [0, 0, 1, 1], [], []>} : vector<256x128xbf16>, vector<128x128xbf16>, vector<256x128xf32> -> vector<256x128xf32>
    %118 = arith.addf %111, %117 : vector<256x128xf32>
    %119 = vector.broadcast %54 : vector<1x128xf32> to vector<256x128xf32>
    %120 = arith.addf %118, %119 : vector<256x128xf32>
    %121 = arith.truncf %120 : vector<256x128xf32> to vector<256x128xbf16>
    %122 = vector.shape_cast %121 : vector<256x128xbf16> to vector<16x16x128xbf16>
    %c0_120 = arith.constant 0 : index
    %c0_121 = arith.constant 0 : index
    %c0_122 = arith.constant 0 : index
    %c0_123 = arith.constant 0 : index
    %123 = vector.load %arg4[%c0_120, %c0_121, %c0_122, %c0_123] : memref<1x32x16x128xbf16, #tpu.memory_space<vmem>>, vector<1x16x16x128xbf16>
    %124 = vector.shape_cast %123 : vector<1x16x16x128xbf16> to vector<16x16x128xbf16>
    %125 = vector.shape_cast %122 : vector<16x16x128xbf16> to vector<1x16x16x128xbf16>
    tpu.vector_store %arg4[%c0_120, %c0_121, %c0_122, %c0_123], %125 {strides = array<i32>} : memref<1x32x16x128xbf16, #tpu.memory_space<vmem>>, vector<1x16x16x128xbf16>,
    %cst_124 = arith.constant 0.000000e+00 : f32
    %126 = vector.broadcast %cst_124 : f32 to vector<256x128xf32>
    %c0_125 = arith.constant 0 : index
    %c16_126 = arith.constant 16 : index
    %c0_127 = arith.constant 0 : index
    %c0_128 = arith.constant 0 : index
    %127 = vector.load %arg5[%c0_125, %c16_126, %c0_127, %c0_128] : memref<3x34x16x128xbf16, #tpu.memory_space<vmem>>, vector<1x16x16x128xbf16>
    %128 = vector.shape_cast %127 : vector<1x16x16x128xbf16> to vector<16x16x128xbf16>
    %129 = vector.shape_cast %128 : vector<16x16x128xbf16> to vector<256x128xbf16>
    %c0_129 = arith.constant 0 : index
    %c0_130 = arith.constant 0 : index
    %c0_131 = arith.constant 0 : index
    %130 = vector.load %arg2[%c0_129, %c0_130, %c0_131] : memref<9x128x128xbf16, #tpu.memory_space<vmem>>, vector<1x128x128xbf16>
    %131 = vector.shape_cast %130 : vector<1x128x128xbf16> to vector<128x128xbf16>
    %cst_132 = arith.constant dense<0.000000e+00> : vector<256x128xf32>
    %132 = tpu.matmul %129, %131, %cst_132 {dimension_numbers = #tpu.dot_dimension_numbers<[1], [0], [0], [1], [0, 0, 1, 1], [], []>} : vector<256x128xbf16>, vector<128x128xbf16>, vector<256x128xf32> -> vector<256x128xf32>
    %133 = arith.addf %126, %132 : vector<256x128xf32>
    %c1_133 = arith.constant 1 : index
    %c16_134 = arith.constant 16 : index
    %c0_135 = arith.constant 0 : index
    %c0_136 = arith.constant 0 : index
    %134 = vector.load %arg5[%c1_133, %c16_134, %c0_135, %c0_136] : memref<3x34x16x128xbf16, #tpu.memory_space<vmem>>, vector<1x16x16x128xbf16>
    %135 = vector.shape_cast %134 : vector<1x16x16x128xbf16> to vector<16x16x128xbf16>
    %136 = vector.shape_cast %135 : vector<16x16x128xbf16> to vector<256x128xbf16>
    %c1_137 = arith.constant 1 : index
    %c0_138 = arith.constant 0 : index
    %c0_139 = arith.constant 0 : index
    %137 = vector.load %arg2[%c1_137, %c0_138, %c0_139] : memref<9x128x128xbf16, #tpu.memory_space<vmem>>, vector<1x128x128xbf16>
    %138 = vector.shape_cast %137 : vector<1x128x128xbf16> to vector<128x128xbf16>
    %cst_140 = arith.constant dense<0.000000e+00> : vector<256x128xf32>
    %139 = tpu.matmul %136, %138, %cst_140 {dimension_numbers = #tpu.dot_dimension_numbers<[1], [0], [0], [1], [0, 0, 1, 1], [], []>} : vector<256x128xbf16>, vector<128x128xbf16>, vector<256x128xf32> -> vector<256x128xf32>
    %140 = arith.addf %133, %139 : vector<256x128xf32>
    %c2_141 = arith.constant 2 : index
    %c16_142 = arith.constant 16 : index
    %c0_143 = arith.constant 0 : index
    %c0_144 = arith.constant 0 : index
    %141 = vector.load %arg5[%c2_141, %c16_142, %c0_143, %c0_144] : memref<3x34x16x128xbf16, #tpu.memory_space<vmem>>, vector<1x16x16x128xbf16>
    %142 = vector.shape_cast %141 : vector<1x16x16x128xbf16> to vector<16x16x128xbf16>
    %143 = vector.shape_cast %142 : vector<16x16x128xbf16> to vector<256x128xbf16>
    %c2_145 = arith.constant 2 : index
    %c0_146 = arith.constant 0 : index
    %c0_147 = arith.constant 0 : index
    %144 = vector.load %arg2[%c2_145, %c0_146, %c0_147] : memref<9x128x128xbf16, #tpu.memory_space<vmem>>, vector<1x128x128xbf16>
    %145 = vector.shape_cast %144 : vector<1x128x128xbf16> to vector<128x128xbf16>
    %cst_148 = arith.constant dense<0.000000e+00> : vector<256x128xf32>
    %146 = tpu.matmul %143, %145, %cst_148 {dimension_numbers = #tpu.dot_dimension_numbers<[1], [0], [0], [1], [0, 0, 1, 1], [], []>} : vector<256x128xbf16>, vector<128x128xbf16>, vector<256x128xf32> -> vector<256x128xf32>
    %147 = arith.addf %140, %146 : vector<256x128xf32>
    %c0_149 = arith.constant 0 : index
    %c17_150 = arith.constant 17 : index
    %c0_151 = arith.constant 0 : index
    %c0_152 = arith.constant 0 : index
    %148 = vector.load %arg5[%c0_149, %c17_150, %c0_151, %c0_152] : memref<3x34x16x128xbf16, #tpu.memory_space<vmem>>, vector<1x16x16x128xbf16>
    %149 = vector.shape_cast %148 : vector<1x16x16x128xbf16> to vector<16x16x128xbf16>
    %150 = vector.shape_cast %149 : vector<16x16x128xbf16> to vector<256x128xbf16>
    %c3_153 = arith.constant 3 : index
    %c0_154 = arith.constant 0 : index
    %c0_155 = arith.constant 0 : index
    %151 = vector.load %arg2[%c3_153, %c0_154, %c0_155] : memref<9x128x128xbf16, #tpu.memory_space<vmem>>, vector<1x128x128xbf16>
    %152 = vector.shape_cast %151 : vector<1x128x128xbf16> to vector<128x128xbf16>
    %cst_156 = arith.constant dense<0.000000e+00> : vector<256x128xf32>
    %153 = tpu.matmul %150, %152, %cst_156 {dimension_numbers = #tpu.dot_dimension_numbers<[1], [0], [0], [1], [0, 0, 1, 1], [], []>} : vector<256x128xbf16>, vector<128x128xbf16>, vector<256x128xf32> -> vector<256x128xf32>
    %154 = arith.addf %147, %153 : vector<256x128xf32>
    %c1_157 = arith.constant 1 : index
    %c17_158 = arith.constant 17 : index
    %c0_159 = arith.constant 0 : index
    %c0_160 = arith.constant 0 : index
    %155 = vector.load %arg5[%c1_157, %c17_158, %c0_159, %c0_160] : memref<3x34x16x128xbf16, #tpu.memory_space<vmem>>, vector<1x16x16x128xbf16>
    %156 = vector.shape_cast %155 : vector<1x16x16x128xbf16> to vector<16x16x128xbf16>
    %157 = vector.shape_cast %156 : vector<16x16x128xbf16> to vector<256x128xbf16>
    %c4_161 = arith.constant 4 : index
    %c0_162 = arith.constant 0 : index
    %c0_163 = arith.constant 0 : index
    %158 = vector.load %arg2[%c4_161, %c0_162, %c0_163] : memref<9x128x128xbf16, #tpu.memory_space<vmem>>, vector<1x128x128xbf16>
    %159 = vector.shape_cast %158 : vector<1x128x128xbf16> to vector<128x128xbf16>
    %cst_164 = arith.constant dense<0.000000e+00> : vector<256x128xf32>
    %160 = tpu.matmul %157, %159, %cst_164 {dimension_numbers = #tpu.dot_dimension_numbers<[1], [0], [0], [1], [0, 0, 1, 1], [], []>} : vector<256x128xbf16>, vector<128x128xbf16>, vector<256x128xf32> -> vector<256x128xf32>
    %161 = arith.addf %154, %160 : vector<256x128xf32>
    %c2_165 = arith.constant 2 : index
    %c17_166 = arith.constant 17 : index
    %c0_167 = arith.constant 0 : index
    %c0_168 = arith.constant 0 : index
    %162 = vector.load %arg5[%c2_165, %c17_166, %c0_167, %c0_168] : memref<3x34x16x128xbf16, #tpu.memory_space<vmem>>, vector<1x16x16x128xbf16>
    %163 = vector.shape_cast %162 : vector<1x16x16x128xbf16> to vector<16x16x128xbf16>
    %164 = vector.shape_cast %163 : vector<16x16x128xbf16> to vector<256x128xbf16>
    %c5_169 = arith.constant 5 : index
    %c0_170 = arith.constant 0 : index
    %c0_171 = arith.constant 0 : index
    %165 = vector.load %arg2[%c5_169, %c0_170, %c0_171] : memref<9x128x128xbf16, #tpu.memory_space<vmem>>, vector<1x128x128xbf16>
    %166 = vector.shape_cast %165 : vector<1x128x128xbf16> to vector<128x128xbf16>
    %cst_172 = arith.constant dense<0.000000e+00> : vector<256x128xf32>
    %167 = tpu.matmul %164, %166, %cst_172 {dimension_numbers = #tpu.dot_dimension_numbers<[1], [0], [0], [1], [0, 0, 1, 1], [], []>} : vector<256x128xbf16>, vector<128x128xbf16>, vector<256x128xf32> -> vector<256x128xf32>
    %168 = arith.addf %161, %167 : vector<256x128xf32>
    %c0_173 = arith.constant 0 : index
    %c18 = arith.constant 18 : index
    %c0_174 = arith.constant 0 : index
    %c0_175 = arith.constant 0 : index
    %169 = vector.load %arg5[%c0_173, %c18, %c0_174, %c0_175] : memref<3x34x16x128xbf16, #tpu.memory_space<vmem>>, vector<1x16x16x128xbf16>
    %170 = vector.shape_cast %169 : vector<1x16x16x128xbf16> to vector<16x16x128xbf16>
    %171 = vector.shape_cast %170 : vector<16x16x128xbf16> to vector<256x128xbf16>
    %c6_176 = arith.constant 6 : index
    %c0_177 = arith.constant 0 : index
    %c0_178 = arith.constant 0 : index
    %172 = vector.load %arg2[%c6_176, %c0_177, %c0_178] : memref<9x128x128xbf16, #tpu.memory_space<vmem>>, vector<1x128x128xbf16>
    %173 = vector.shape_cast %172 : vector<1x128x128xbf16> to vector<128x128xbf16>
    %cst_179 = arith.constant dense<0.000000e+00> : vector<256x128xf32>
    %174 = tpu.matmul %171, %173, %cst_179 {dimension_numbers = #tpu.dot_dimension_numbers<[1], [0], [0], [1], [0, 0, 1, 1], [], []>} : vector<256x128xbf16>, vector<128x128xbf16>, vector<256x128xf32> -> vector<256x128xf32>
    %175 = arith.addf %168, %174 : vector<256x128xf32>
    %c1_180 = arith.constant 1 : index
    %c18_181 = arith.constant 18 : index
    %c0_182 = arith.constant 0 : index
    %c0_183 = arith.constant 0 : index
    %176 = vector.load %arg5[%c1_180, %c18_181, %c0_182, %c0_183] : memref<3x34x16x128xbf16, #tpu.memory_space<vmem>>, vector<1x16x16x128xbf16>
    %177 = vector.shape_cast %176 : vector<1x16x16x128xbf16> to vector<16x16x128xbf16>
    %178 = vector.shape_cast %177 : vector<16x16x128xbf16> to vector<256x128xbf16>
    %c7_184 = arith.constant 7 : index
    %c0_185 = arith.constant 0 : index
    %c0_186 = arith.constant 0 : index
    %179 = vector.load %arg2[%c7_184, %c0_185, %c0_186] : memref<9x128x128xbf16, #tpu.memory_space<vmem>>, vector<1x128x128xbf16>
    %180 = vector.shape_cast %179 : vector<1x128x128xbf16> to vector<128x128xbf16>
    %cst_187 = arith.constant dense<0.000000e+00> : vector<256x128xf32>
    %181 = tpu.matmul %178, %180, %cst_187 {dimension_numbers = #tpu.dot_dimension_numbers<[1], [0], [0], [1], [0, 0, 1, 1], [], []>} : vector<256x128xbf16>, vector<128x128xbf16>, vector<256x128xf32> -> vector<256x128xf32>
    %182 = arith.addf %175, %181 : vector<256x128xf32>
    %c2_188 = arith.constant 2 : index
    %c18_189 = arith.constant 18 : index
    %c0_190 = arith.constant 0 : index
    %c0_191 = arith.constant 0 : index
    %183 = vector.load %arg5[%c2_188, %c18_189, %c0_190, %c0_191] : memref<3x34x16x128xbf16, #tpu.memory_space<vmem>>, vector<1x16x16x128xbf16>
    %184 = vector.shape_cast %183 : vector<1x16x16x128xbf16> to vector<16x16x128xbf16>
    %185 = vector.shape_cast %184 : vector<16x16x128xbf16> to vector<256x128xbf16>
    %c8_192 = arith.constant 8 : index
    %c0_193 = arith.constant 0 : index
    %c0_194 = arith.constant 0 : index
    %186 = vector.load %arg2[%c8_192, %c0_193, %c0_194] : memref<9x128x128xbf16, #tpu.memory_space<vmem>>, vector<1x128x128xbf16>
    %187 = vector.shape_cast %186 : vector<1x128x128xbf16> to vector<128x128xbf16>
    %cst_195 = arith.constant dense<0.000000e+00> : vector<256x128xf32>
    %188 = tpu.matmul %185, %187, %cst_195 {dimension_numbers = #tpu.dot_dimension_numbers<[1], [0], [0], [1], [0, 0, 1, 1], [], []>} : vector<256x128xbf16>, vector<128x128xbf16>, vector<256x128xf32> -> vector<256x128xf32>
    %189 = arith.addf %182, %188 : vector<256x128xf32>
    %190 = vector.broadcast %54 : vector<1x128xf32> to vector<256x128xf32>
    %191 = arith.addf %189, %190 : vector<256x128xf32>
    %192 = arith.truncf %191 : vector<256x128xf32> to vector<256x128xbf16>
    %193 = vector.shape_cast %192 : vector<256x128xbf16> to vector<16x16x128xbf16>
    %c0_196 = arith.constant 0 : index
    %c16_197 = arith.constant 16 : index
    %c0_198 = arith.constant 0 : index
    %c0_199 = arith.constant 0 : index
    %194 = vector.load %arg4[%c0_196, %c16_197, %c0_198, %c0_199] : memref<1x32x16x128xbf16, #tpu.memory_space<vmem>>, vector<1x16x16x128xbf16>
    %195 = vector.shape_cast %194 : vector<1x16x16x128xbf16> to vector<16x16x128xbf16>
    %196 = vector.shape_cast %193 : vector<16x16x128xbf16> to vector<1x16x16x128xbf16>
    tpu.vector_store %arg4[%c0_196, %c16_197, %c0_198, %c0_199], %196 {strides = array<i32>} : memref<1x32x16x128xbf16, #tpu.memory_space<vmem>>, vector<1x16x16x128xbf16>,
    return
  }
  func.func @transform_0(%arg0: i32) -> (i32, i32, i32, i32) {
    %c0_i32 = arith.constant 0 : i32
    %c0_i32_0 = arith.constant 0 : i32
    %c0_i32_1 = arith.constant 0 : i32
    %c0_i32_2 = arith.constant 0 : i32
    return %arg0, %c0_i32, %c0_i32_0, %c0_i32_1 : i32, i32, i32, i32
  }
  func.func @transform_1(%arg0: i32) -> (i32, i32, i32) {
    %c0_i32 = arith.constant 0 : i32
    %c0_i32_0 = arith.constant 0 : i32
    %c0_i32_1 = arith.constant 0 : i32
    %c0_i32_2 = arith.constant 0 : i32
    return %c0_i32, %c0_i32_0, %c0_i32_1 : i32, i32, i32
  }
  func.func @transform_2(%arg0: i32) -> (i32, i32) {
    %c0_i32 = arith.constant 0 : i32
    %c0_i32_0 = arith.constant 0 : i32
    %c0_i32_1 = arith.constant 0 : i32
    return %c0_i32, %c0_i32_0 : i32, i32
  }
  func.func @transform_3(%arg0: i32) -> (i32, i32, i32, i32) {
    %c0_i32 = arith.constant 0 : i32
    %c0_i32_0 = arith.constant 0 : i32
    %c0_i32_1 = arith.constant 0 : i32
    %c0_i32_2 = arith.constant 0 : i32
    return %arg0, %c0_i32, %c0_i32_0, %c0_i32_1 : i32, i32, i32, i32
  }
}

</mosaic_0001>

<bundles_post_ra>
// kernel: tpu_custom_call.1
= control target key start
LH: loop header
LB: loop body
LE: loop exit
PB: predicated region body
PF: predicated region fallthrough
CT: control target
= control target key end

     0   :  { %8 = vsyncpa [#allocation4], 0  ;;  %s13041_s0 = inlined_call_operand.hbm [shape: bf16[1,32,16,128], index: 0, kind: input, shape index: {}]   ;;  %s13042_s1 = inlined_call_operand.hbm [shape: bf16[9,128,128], index: 1, kind: input, shape index: {}]   ;;  %s13043_s2 = inlined_call_operand.vmem [shape: f32[1,128], index: 2, kind: input, shape index: {}]   ;;  %s13044_s3 = inlined_call_operand.hbm [shape: bf16[1,32,16,128], index: 3, kind: output, shape index: {}]  }
   0x1   :  { %9 = vsyncpa [#allocation7], 0 }
   0x2   :  { %10 = vsyncpa [#allocation5], 0  ;;  %s11327_s12 = smov [#allocation3]  }
   0x3   :  { %s16_s13 = sshll.u32 %s11327_s12, 4  ;;  %s17_s13 = int_to_ptr.vmem [resolvable:$true] %s16_s13 }
   0x4   :  { %s11269_s14 = scalar_lea.vmem %s17_s13, 4096  ;;  %p11274_p1 = scmp.lt.s32.totalorder %s17_s13, %s17_s13 }
   0x5   :  { %p11270_p0 = scmp.ne.s32.totalorder %s17_s13, %s11269_s14  ;;  %p11275_p2 = scmp.lt.s32.totalorder %s11269_s14, %s11269_s14 }
   0x7   :  { %p11276_p3 = por %p11275_p2, %p11274_p1 }
   0x9   :  { %p11277_p4 = pnand %p11276_p3, %p11270_p0 }
   0xb   :  { %11280 = shalt.err (!%p11277_p4)
}
   0xc   :  { %s11328_s15 = smov 64   ;;  %s11329_s16 = smov 4  }
   0xd   :  { %22 = dma.hbm_to_vmem [thread:$0]  %s13041_s0, 4096, %s17_s13, [#allocation4], %s11328_s15, %s11328_s15, %s11329_s16  }
   0xe   :  { %s11330_s19 = smov [#allocation6]  }
   0xf   :  { %s28_s20 = sshll.u32 %s11330_s19, 4  ;;  %s29_s20 = int_to_ptr.vmem [resolvable:$true] %s28_s20 }
  0x10   :  { %s11289_s21 = scalar_lea.vmem %s29_s20, 9216  ;;  %p11294_p6 = scmp.lt.s32.totalorder %s29_s20, %s29_s20 }
  0x11   :  { %p11290_p5 = scmp.ne.s32.totalorder %s29_s20, %s11289_s21  ;;  %p11295_p7 = scmp.lt.s32.totalorder %s11289_s21, %s11289_s21 }
  0x13   :  { %p11296_p8 = por %p11295_p7, %p11294_p6 }
  0x15   :  { %p11297_p9 = pnand %p11296_p8, %p11290_p5 }
  0x17   :  { %11300 = shalt.err (!%p11297_p9)
}
  0x18   :  { %34 = dma.hbm_to_vmem [thread:$0]  %s13042_s1, 9216, %s29_s20, [#allocation7], %s11328_s15, %s11328_s15, %s11329_s16  }
  0x19   :  { %11321 = dma.done.wait [#allocation4], 4096  }
  0x1a   :  { %11322 = vsyncadd [#allocation4], 4294963200 }
  0x1b   :  { %11323 = dma.done.wait [#allocation7], 9216  }
  0x1c   :  { %11324 = vsyncadd [#allocation7], 4294958080  ;;  %v11331_v0 = vmov 0   ;;  %v10796_v1 = vld [vmem:[#allocation6 + $0x78] sm:$0xff]   ;;  %v10798_v3 = vld [vmem:[#allocation6 + $0x70] sm:$0xff]   ;;  %vm529_vm2 = vcmask 1047552  }
  0x1d   :  { %1343 = vst [vmem:[#allocation2 + $0x110] sm:$0xf] %v11331_v0  ;;  %1344 = vst [vmem:[#allocation2 + $0x114] sm:$0xf] %v11331_v0  ;;  %v10797_v2 = vld [vmem:[#allocation6 + $0x38] sm:$0xff]   ;;  %9926 = vmatprep.subr.bf16.mxu0 %v10796_v1  ;;  %v10799_v4 = vld [vmem:[#allocation6 + $0x30] sm:$0xff]  }
  0x1e   :  { %1337 = vst [vmem:[#allocation2] sm:$0xf] %v11331_v0  ;;  %1338 = vst [vmem:[#allocation2 + $0x4] sm:$0xf] %v11331_v0  ;;  %9974 = vmatprep.subr.bf16.mxu1 %v10797_v2  ;;  %9927 = vmatpush3.bf16.msra.mxu0 %v10796_v1  ;;  %v10800_v5 = vld [vmem:[#allocation6 + $0x68] sm:$0xff]   ;;  %v10802_v7 = vld [vmem:[#allocation6 + $0x60] sm:$0xff]  }
  0x1f   :  { %1340 = vst [vmem:[#allocation2 + $0x108] sm:$0xf] %v11331_v0  ;;  %1341 = vst [vmem:[#allocation2 + $0x10c] sm:$0xf] %v11331_v0  ;;  %9975 = vmatpush3.bf16.msra.mxu1 %v10797_v2  ;;  %9928 = vmatprep.subr.bf16.mxu0 %v10798_v3  ;;  %v10801_v6 = vld [vmem:[#allocation6 + $0x28] sm:$0xff]   ;;  %v10803_v8 = vld [vmem:[#allocation6 + $0x20] sm:$0xff]  }
  0x20   :  { %1346 = vst [vmem:[#allocation2 + $0x218] sm:$0xf] %v11331_v0  ;;  %1347 = vst [vmem:[#allocation2 + $0x21c] sm:$0xf] %v11331_v0  ;;  %9976 = vmatprep.subr.bf16.mxu1 %v10799_v4  ;;  %vm530_vm0 = vsmask.f32 7424 }
  0x21   :  { %1349 = vst [vmem:[#allocation2 + $0x220] sm:$0xf] %v11331_v0  ;;  %1350 = vst [vmem:[#allocation2 + $0x224] sm:$0xf] %v11331_v0  ;;  %v10804_v9 = vld [vmem:[#allocation6 + $0x58] sm:$0xff]   ;;  %v10806_v11 = vld [vmem:[#allocation6 + $0x50] sm:$0xff]  }
  0x22   :  { %1352 = vst [vmem:[#allocation2 + $0x328] sm:$0xf] %v11331_v0  ;;  %1353 = vst [vmem:[#allocation2 + $0x32c] sm:$0xf] %v11331_v0  ;;  %9929 = vmatpush3.bf16.msra.mxu0 %v10798_v3  ;;  %v10805_v10 = vld [vmem:[#allocation6 + $0x18] sm:$0xff]   ;;  %v10807_v12 = vld [vmem:[#allocation6 + $0x10] sm:$0xff]  }
  0x23   :  { %9977 = vmatpush3.bf16.msra.mxu1 %v10799_v4  ;;  %9930 = vmatprep.subr.bf16.mxu0 %v10800_v5  ;;  %vm285_vm1 = vsmask.f32 256  ;;  %v44_v15 = vld [vmem:[#allocation3] sm:$0xf]  ;;  %v45_v16 = vld [vmem:[#allocation3 + $0x4] sm:$0xf]  ;;  %vm11367_vm4 = vmand %vm529_vm2, %vm530_vm0 }
  0x24   :  { %9978 = vmatprep.subr.bf16.mxu1 %v10801_v6  ;;  %v10812_v13 = vld [vmem:[#allocation2 + $0x110] sm:$0xff]   ;;  %v10808_v17 = vld [vmem:[#allocation6 + $0x48] sm:$0xff]   ;;  %v8583_v18 = vcombine.low %v44_v15, %v45_v16  ;;  %449 = vst [vmem:[#allocation2 + $0x118] sm:$0xf] %v44_v15  ;;  %450 = vst [vmem:[#allocation2 + $0x11c] sm:$0xf] %v45_v16 }
  0x25   :  { %v10813_v14 = vld [vmem:[#allocation2] sm:$0xff]   ;;  %9942 = vmatprep.mubr.bf16.mxu0 %v10812_v13  ;;  %v10809_v19 = vld [vmem:[#allocation6 + $0x8] sm:$0xff]   ;;  %vm284_vm3 = vcmask 1040384   ;;  %v10810_v28 = vld [vmem:[#allocation6 + $0x40] sm:$0xff]  }
  0x26   :  { %9931 = vmatpush3.bf16.msra.mxu0 %v10800_v5  ;;  %9990 = vmatprep.mubr.bf16.mxu1 %v10813_v14  ;;  %v46_v20 = vld [vmem:[#allocation3 + $0x8] sm:$0xf]  ;;  %v157_v21 = vshrl.u32 %v8583_v18, 16  ;;  %v160_v22 = vshll.u32 %v8583_v18, 16  ;;  %v47_v24 = vld [vmem:[#allocation3 + $0xc] sm:$0xf]  ;;  %vm11377_vm5 = vmand %vm284_vm3, %vm285_vm1 }
  0x27   :  { %9979 = vmatpush3.bf16.msra.mxu1 %v10801_v6  ;;  %9932 = vmatprep.subr.bf16.mxu0 %v10802_v7  ;;  %451 = vst [vmem:[#allocation2 + $0x120] sm:$0xf] %v46_v20  ;;  %v48_v25 = vld [vmem:[#allocation3 + $0x10] sm:$0xf]  ;;  %v11371_v26 = vcombine.low %v46_v20, %v47_v24  ;;  %452 = vst [vmem:[#allocation2 + $0x124] sm:$0xf] %v47_v24 }
  0x28   :  { %9980 = vmatprep.subr.bf16.mxu1 %v10803_v8  ;;  %v49_v27 = vld [vmem:[#allocation3 + $0x14] sm:$0xf]  ;;  %453 = vst [vmem:[#allocation2 + $0x128] sm:$0xf] %v48_v25  ;;  %v10811_v29 = vld [vmem:[#allocation6] sm:$0xff]   ;;  %v159_v30 = vrot.slane %v157_v21, 7 }
  0x29   :  { %v481_v31 = vrot.slane %v160_v22, 1  ;;  %v11373_v32 = vcombine.low %v48_v25, %v49_v27  ;;  %454 = vst [vmem:[#allocation2 + $0x12c] sm:$0xf] %v49_v27  ;;  %v164_v34 = vshrl.u32 %v11371_v26, 16  ;;  %v167_v35 = vshll.u32 %v11371_v26, 16  ;;  %v10817_v47 = vld [vmem:[#allocation6 + $0xb8] sm:$0xff]  }
  0x2a   :  { %9933 = vmatpush3.bf16.msra.mxu0 %v10802_v7  ;;  %v50_v36 = vld [vmem:[#allocation3 + $0x18] sm:$0xf]  ;;  %v162_v38 = vor.u32 %v160_v22, %v159_v30  ;;  %v51_v41 = vld [vmem:[#allocation3 + $0x1c] sm:$0xf]  ;;  %v52_v42 = vld [vmem:[#allocation3 + $0x20] sm:$0xf] }
  0x2b   :  { %9981 = vmatpush3.bf16.msra.mxu1 %v10803_v8  ;;  %9934 = vmatprep.subr.bf16.mxu0 %v10804_v9  ;;  %v482_v37 = vor.u32 %v481_v31, %v157_v21  ;;  %v171_v39 = vshrl.u32 %v11373_v32, 16  ;;  %v174_v40 = vshll.u32 %v11373_v32, 16  ;;  %455 = vst [vmem:[#allocation2 + $0x130] sm:$0xf] %v50_v36  ;;  %v166_v43 = vrot.slane %v164_v34, 7  ;;  %v11395_v53 = vld [vmem:[#allocation6 + $0xf8] sm:$0xff]  }
  0x2c   :  { %9982 = vmatprep.subr.bf16.mxu1 %v10805_v10  ;;  %v11387_v44 = vcombine.low %v50_v36, %v51_v41  ;;  %456 = vst [vmem:[#allocation2 + $0x134] sm:$0xf] %v51_v41  ;;  %457 = vst [vmem:[#allocation2 + $0x138] sm:$0xf] %v52_v42  ;;  %v287_v46 = vsel %vm11377_vm5, 0, %v162_v38  ;;  %v10815_v54 = vld [vmem:[#allocation2 + $0x118] sm:$0xff]  }
  0x2d   :  { %v532_v45 = vsel %vm11367_vm4, %v482_v37, 0  ;;  %v173_v48 = vrot.slane %v171_v39, 7  ;;  %v53_v49 = vld [vmem:[#allocation3 + $0x24] sm:$0xf]  ;;  %v8599_v52 = vcombine.low %v287_v46, %v287_v46  ;;  %v8600_v55 = vcombine.high %v287_v46, %v287_v46  ;;  %v10825_v5 = vld [vmem:[#allocation6 + $0xb0] sm:$0xff]   ;;  %v10833_v15 = vld [vmem:[#allocation6 + $0xa8] sm:$0xff]  }
  0x2e   :  { %9935 = vmatpush3.bf16.msra.mxu0 %v10804_v9  ;;  %v8631_v50 = vcombine.low %v532_v45, %v532_v45  ;;  %v8632_v51 = vcombine.high %v532_v45, %v532_v45  ;;  %458 = vst [vmem:[#allocation2 + $0x13c] sm:$0xf] %v53_v49  ;;  %v169_v56 = vor.u32 %v167_v35, %v166_v43  ;;  %v178_v58 = vshrl.u32 %v11387_v44, 16  ;;  %v10820_v62 = vld [vmem:[#allocation2 + $0x120] sm:$0xff]   ;;  %v10841_v41 = vld [vmem:[#allocation6 + $0xa0] sm:$0xff]  }
  0x2f   :  { %9983 = vmatpush3.bf16.msra.mxu1 %v10805_v10  ;;  %9936 = vmatprep.subr.bf16.mxu0 %v10806_v11  ;;  %v176_v57 = vor.u32 %v174_v40, %v173_v48  ;;  %416 = vst [vmem:[#allocation2 + $0x8] sm:$0xf] %v8599_v52  ;;  %v483_v59 = vrot.slane %v167_v35, 1  ;;  %v181_v60 = vshll.u32 %v11387_v44, 16  ;;  %v11401_v61 = vcombine.low %v52_v42, %v53_v49  ;;  %v54_v10 = vld [vmem:[#allocation3 + $0x28] sm:$0xf] }
  0x30   :  { %9984 = vmatprep.subr.bf16.mxu1 %v10807_v12  ;;  %661 = vst [vmem:[#allocation2 + $0x228] sm:$0xf] %v8631_v50  ;;  %662 = vst [vmem:[#allocation2 + $0x22c] sm:$0xf] %v8632_v51  ;;  %v288_v63 = vsel %vm11377_vm5, 0, %v169_v56  ;;  %v180_v1 = vrot.slane %v178_v58, 7 }
  0x31   :  { %417 = vst [vmem:[#allocation2 + $0xc] sm:$0xf] %v8600_v55  ;;  %v289_v0 = vsel %vm11377_vm5, 0, %v176_v57  ;;  %v8601_v2 = vcombine.low %v288_v63, %v288_v63  ;;  %v8602_v3 = vcombine.high %v288_v63, %v288_v63  ;;  %v185_v8 = vshrl.u32 %v11401_v61, 16  ;;  %459 = vst [vmem:[#allocation2 + $0x140] sm:$0xf] %v54_v10 }
  0x32   :  { %9937 = vmatpush3.bf16.msra.mxu0 %v10806_v11  ;;  %v8603_v4 = vcombine.low %v289_v0, %v289_v0  ;;  %v8604_v6 = vcombine.high %v289_v0, %v289_v0  ;;  %v183_v7 = vor.u32 %v181_v60, %v180_v1  ;;  %v188_v9 = vshll.u32 %v11401_v61, 16  ;;  %v55_v11 = vld [vmem:[#allocation3 + $0x2c] sm:$0xf]  ;;  %v10826_v18 = vld [vmem:[#allocation6 + $0xf0] sm:$0xff]   ;;  %v58_v42 = vld [vmem:[#allocation3 + $0x38] sm:$0xf] }
  0x33   :  { %9985 = vmatpush3.bf16.msra.mxu1 %v10807_v12  ;;  %9938 = vmatprep.subr.bf16.mxu0 %v10808_v17  ;;  %418 = vst [vmem:[#allocation2 + $0x10] sm:$0xf] %v8601_v2  ;;  %419 = vst [vmem:[#allocation2 + $0x14] sm:$0xf] %v8602_v3  ;;  %v484_v12 = vor.u32 %v483_v59, %v164_v34  ;;  %v187_v14 = vrot.slane %v185_v8, 7  ;;  %v11420_v16 = vcombine.low %v54_v10, %v55_v11  ;;  %v10828_v30 = vld [vmem:[#allocation2 + $0x130] sm:$0xff]  }
  0x34   :  { %9986 = vmatprep.subr.bf16.mxu1 %v10809_v19  ;;  %420 = vst [vmem:[#allocation2 + $0x18] sm:$0xf] %v8603_v4  ;;  %421 = vst [vmem:[#allocation2 + $0x1c] sm:$0xf] %v8604_v6  ;;  %v290_v13 = vsel %vm11377_vm5, 0, %v183_v7  ;;  %v10834_v51 = vld [vmem:[#allocation6 + $0xe8] sm:$0xff]  }
  0x35   :  { %460 = vst [vmem:[#allocation2 + $0x144] sm:$0xf] %v55_v11  ;;  %v8606_v20 = vcombine.high %v290_v13, %v290_v13  ;;  %v56_v21 = vld [vmem:[#allocation3 + $0x30] sm:$0xf]  ;;  %v57_v22 = vld [vmem:[#allocation3 + $0x34] sm:$0xf]  ;;  %v190_v24 = vor.u32 %v188_v9, %v187_v14 }
  0x36   :  { %9939 = vmatpush3.bf16.msra.mxu0 %v10808_v17  ;;  %v10823_v17 = vld [vmem:[#allocation2 + $0x128] sm:$0xff]   ;;  %v192_v25 = vshrl.u32 %v11420_v16, 16  ;;  %v195_v26 = vshll.u32 %v11420_v16, 16  ;;  %v11426_v27 = vcombine.low %v56_v21, %v57_v22  ;;  %461 = vst [vmem:[#allocation2 + $0x148] sm:$0xf] %v56_v21  ;;  %v485_v52 = vrot.slane %v174_v40, 1 }
  0x37   :  { %9987 = vmatpush3.bf16.msra.mxu1 %v10809_v19  ;;  %9940 = vmatprep.subr.bf16.mxu0 %v10810_v28  ;;  %v8605_v19 = vcombine.low %v290_v13, %v290_v13  ;;  %462 = vst [vmem:[#allocation2 + $0x14c] sm:$0xf] %v57_v22  ;;  %423 = vst [vmem:[#allocation2 + $0x24] sm:$0xf] %v8606_v20  ;;  %v291_v31 = vsel %vm11377_vm5, 0, %v190_v24  ;;  %v10831_v56 = vld [vmem:[#allocation2 + $0x138] sm:$0xff]  }
  0x38   :  { %9988 = vmatprep.subr.bf16.mxu1 %v10811_v29  ;;  %v194_v34 = vrot.slane %v192_v25, 7  ;;  %v199_v35 = vshrl.u32 %v11426_v27, 16  ;;  %v8607_v36 = vcombine.low %v291_v31, %v291_v31  ;;  %v8608_v37 = vcombine.high %v291_v31, %v291_v31  ;;  %v59_v43 = vld [vmem:[#allocation3 + $0x3c] sm:$0xf]  ;;  %463 = vst [vmem:[#allocation2 + $0x150] sm:$0xf] %v58_v42 }
  0x39   :  { %422 = vst [vmem:[#allocation2 + $0x20] sm:$0xf] %v8605_v19  ;;  %v202_v38 = vshll.u32 %v11426_v27, 16  ;;  %v11441_v49 = vcombine.low %v58_v42, %v59_v43  ;;  %464 = vst [vmem:[#allocation2 + $0x154] sm:$0xf] %v59_v43  ;;  %v10849_v2 = vld [vmem:[#allocation6 + $0x98] sm:$0xff]   ;;  %v486_v14 = vor.u32 %v485_v52, %v171_v39 }
  0x3a   :  { %9941 = vmatpush3.bf16.msra.mxu0 %v10810_v28  ;;  %v10816_v28 = vld [vmem:[#allocation2 + $0x8] sm:$0xff]   ;;  %v10821_v46 = vld [vmem:[#allocation2 + $0x10] sm:$0xff]   ;;  %v201_v48 = vrot.slane %v199_v35, 7  ;;  %424 = vst [vmem:[#allocation2 + $0x28] sm:$0xf] %v8607_v36  ;;  %v10857_v19 = vld [vmem:[#allocation6 + $0x90] sm:$0xff]  }
  0x3b   :  { %9989 = vmatpush3.bf16.msra.mxu1 %v10811_v29  ;;  %10022 = vmatprep.subr.bf16.mxu0 %v10817_v47  ;;  %v533_v29 = vsel %vm11367_vm4, %v484_v12, 0  ;;  %425 = vst [vmem:[#allocation2 + $0x2c] sm:$0xf] %v8608_v37  ;;  %v10824_v55 = vld [vmem:[#allocation2 + $0x18] sm:$0xff]   ;;  %v206_v63 = vshrl.u32 %v11441_v49, 16  ;;  %v209_v6 = vshll.u32 %v11441_v49, 16 }
  0x3c   :  { %10070 = vmatprep.subr.bf16.mxu1 %v11395_v53  ;;  %v8633_v45 = vcombine.low %v533_v29, %v533_v29  ;;  %v8634_v50 = vcombine.high %v533_v29, %v533_v29  ;;  %v10836_v1 = vld [vmem:[#allocation2 + $0x140] sm:$0xff]   ;;  %v60_v7 = vld [vmem:[#allocation3 + $0x40] sm:$0xf]  ;;  %v61_v10 = vld [vmem:[#allocation3 + $0x44] sm:$0xf]  ;;  %v534_v42 = vsel %vm11367_vm4, %v486_v14, 0 }
  0x3d   :  { %9943 = vmatmul.mubr.bf16.vlgmr.msra.gmra.mxu0 %v10815_v54  ;;  %v204_v54 = vor.u32 %v202_v38, %v201_v48  ;;  %v11455_v11 = vcombine.low %v60_v7, %v61_v10  ;;  %465 = vst [vmem:[#allocation2 + $0x158] sm:$0xf] %v60_v7  ;;  %466 = vst [vmem:[#allocation2 + $0x15c] sm:$0xf] %v61_v10  ;;  %v62_v24 = vld [vmem:[#allocation3 + $0x48] sm:$0xf] }
  0x3e   :  { %10023 = vmatpush3.bf16.msra.mxu0 %v10817_v47  ;;  %9946 = vmatprep.mubr.bf16.mxu0 %v10820_v62  ;;  %v197_v47 = vor.u32 %v195_v26, %v194_v34  ;;  %663 = vst [vmem:[#allocation2 + $0x230] sm:$0xf] %v8633_v45  ;;  %664 = vst [vmem:[#allocation2 + $0x234] sm:$0xf] %v8634_v50  ;;  %v10842_v62 = vld [vmem:[#allocation6 + $0xe0] sm:$0xff]   ;;  %v10839_v39 = vld [vmem:[#allocation2 + $0x148] sm:$0xff]  }
  0x3f   :  { %10024 = vmatprep.subr.bf16.mxu0 %v10825_v5  ;;  %9991 = vmatmul.mubr.bf16.vlgmr.msra.gmra.mxu1 %v10816_v28  ;;  %v293_v40 = vsel %vm11377_vm5, 0, %v204_v54  ;;  %v213_v13 = vshrl.u32 %v11455_v11, 16  ;;  %v63_v28 = vld [vmem:[#allocation3 + $0x4c] sm:$0xf]  ;;  %467 = vst [vmem:[#allocation2 + $0x160] sm:$0xf] %v62_v24 }
  0x40   :  { %10071 = vmatpush3.bf16.msra.mxu1 %v11395_v53  ;;  %9994 = vmatprep.mubr.bf16.mxu1 %v10821_v46  ;;  %v292_v53 = vsel %vm11377_vm5, 0, %v197_v47  ;;  %v10829_v0 = vld [vmem:[#allocation2 + $0x20] sm:$0xff]   ;;  %v8611_v3 = vcombine.low %v293_v40, %v293_v40  ;;  %v8612_v4 = vcombine.high %v293_v40, %v293_v40  ;;  %v11467_v29 = vcombine.low %v62_v24, %v63_v28  ;;  %v10844_v36 = vld [vmem:[#allocation2 + $0x150] sm:$0xff]   ;;  %v10865_v50 = vld [vmem:[#allocation6 + $0x88] sm:$0xff]  }
  0x41   :  { %10072 = vmatprep.subr.bf16.mxu1 %v10826_v18  ;;  %v8609_v57 = vcombine.low %v292_v53, %v292_v53  ;;  %v8610_v59 = vcombine.high %v292_v53, %v292_v53  ;;  %v215_v22 = vrot.slane %v213_v13, 7  ;;  %468 = vst [vmem:[#allocation2 + $0x164] sm:$0xf] %v63_v28  ;;  %v65_v31 = vld [vmem:[#allocation3 + $0x54] sm:$0xf]  ;;  %v8635_v46 = vcombine.low %v534_v42, %v534_v42  ;;  %v10873_v24 = vld [vmem:[#allocation6 + $0x80] sm:$0xff]  }
  0x42   :  { %10025 = vmatpush3.bf16.msra.mxu0 %v10825_v5  ;;  %v208_v5 = vrot.slane %v206_v63, 7  ;;  %428 = vst [vmem:[#allocation2 + $0x38] sm:$0xf] %v8611_v3  ;;  %429 = vst [vmem:[#allocation2 + $0x3c] sm:$0xf] %v8612_v4  ;;  %v10832_v32 = vld [vmem:[#allocation2 + $0x28] sm:$0xff]   ;;  %v8636_v47 = vcombine.high %v534_v42, %v534_v42 }
  0x43   :  { %10026 = vmatprep.subr.bf16.mxu0 %v10833_v15  ;;  %426 = vst [vmem:[#allocation2 + $0x30] sm:$0xf] %v8609_v57  ;;  %427 = vst [vmem:[#allocation2 + $0x34] sm:$0xf] %v8610_v59  ;;  %v220_v43 = vshrl.u32 %v11467_v29, 16  ;;  %v10858_v45 = vld [vmem:[#allocation6 + $0xd0] sm:$0xff]  }
  0x44   :  { %10073 = vmatpush3.bf16.msra.mxu1 %v10826_v18  ;;  %v211_v12 = vor.u32 %v209_v6, %v208_v5  ;;  %v10850_v18 = vld [vmem:[#allocation6 + $0xd8] sm:$0xff]   ;;  %470 = vst [vmem:[#allocation2 + $0x16c] sm:$0xf] %v65_v31  ;;  %v223_v54 = vshll.u32 %v11467_v29, 16  ;;  %665 = vst [vmem:[#allocation2 + $0x238] sm:$0xf] %v8635_v46 }
  0x45   :  { %9947 = vmatmul.mubr.bf16.gmra.mxu0 %v10823_v17  ;;  %10074 = vmatprep.subr.bf16.mxu1 %v10834_v51  ;;  %v216_v17 = vshll.u32 %v11455_v11, 16  ;;  %v222_v53 = vrot.slane %v220_v43, 7  ;;  %666 = vst [vmem:[#allocation2 + $0x23c] sm:$0xf] %v8636_v47  ;;  %v11485_v57 = vrot.slane %v181_v60, 1  ;;  %v11491_v40 = vrot.slane %v188_v9, 1 }
  0x46   :  { %9950 = vmatprep.mubr.bf16.mxu0 %v10828_v30  ;;  %10027 = vmatpush3.bf16.msra.mxu0 %v10833_v15  ;;  %v294_v15 = vsel %vm11377_vm5, 0, %v211_v12  ;;  %v64_v30 = vld [vmem:[#allocation3 + $0x50] sm:$0xf]  ;;  %v10847_v4 = vld [vmem:[#allocation2 + $0x158] sm:$0xff]   ;;  %v11501_v7 = vrot.slane %v195_v26, 1  ;;  %v11513_v28 = vrot.slane %v202_v38, 1 }
  0x47   :  { %10028 = vmatprep.subr.bf16.mxu0 %v10841_v41  ;;  %9995 = vmatmul.mubr.bf16.gmra.mxu1 %v10824_v55  ;;  %v8613_v20 = vcombine.low %v294_v15, %v294_v15  ;;  %v8614_v21 = vcombine.high %v294_v15, %v294_v15  ;;  %v218_v37 = vor.u32 %v216_v17, %v215_v22  ;;  %v70_v42 = vld [vmem:[#allocation3 + $0x68] sm:$0xf]  ;;  %v10874_v46 = vld [vmem:[#allocation6 + $0xc0] sm:$0xff]  }
  0x48   :  { %9998 = vmatprep.mubr.bf16.mxu1 %v10829_v0  ;;  %10075 = vmatpush3.bf16.msra.mxu1 %v10834_v51  ;;  %469 = vst [vmem:[#allocation2 + $0x168] sm:$0xf] %v64_v30  ;;  %v225_v59 = vor.u32 %v223_v54, %v222_v53  ;;  %v67_v0 = vld [vmem:[#allocation3 + $0x5c] sm:$0xf]  ;;  %v10852_v10 = vld [vmem:[#allocation2 + $0x160] sm:$0xff]   ;;  %v492_v61 = vor.u32 %v11501_v7, %v192_v25 }
  0x49   :  { %10076 = vmatprep.subr.bf16.mxu1 %v10842_v62  ;;  %430 = vst [vmem:[#allocation2 + $0x40] sm:$0xf] %v8613_v20  ;;  %431 = vst [vmem:[#allocation2 + $0x44] sm:$0xf] %v8614_v21  ;;  %v295_v48 = vsel %vm11377_vm5, 0, %v218_v37  ;;  %v10840_v3 = vld [vmem:[#allocation2 + $0x38] sm:$0xff]  }
  0x4a   :  { %10029 = vmatpush3.bf16.msra.mxu0 %v10841_v41  ;;  %v10837_v34 = vld [vmem:[#allocation2 + $0x30] sm:$0xff]   ;;  %v11471_v41 = vcombine.low %v64_v30, %v65_v31  ;;  %v8615_v51 = vcombine.low %v295_v48, %v295_v48  ;;  %v8616_v52 = vcombine.high %v295_v48, %v295_v48  ;;  %472 = vst [vmem:[#allocation2 + $0x174] sm:$0xf] %v67_v0  ;;  %v296_v5 = vsel %vm11377_vm5, 0, %v225_v59 }
  0x4b   :  { %10030 = vmatprep.subr.bf16.mxu0 %v10849_v2  ;;  %v8617_v12 = vcombine.low %v296_v5, %v296_v5  ;;  %v8618_v14 = vcombine.high %v296_v5, %v296_v5  ;;  %v68_v20 = vld [vmem:[#allocation3 + $0x60] sm:$0xf]  ;;  %v69_v21 = vld [vmem:[#allocation3 + $0x64] sm:$0xf]  ;;  %v11519_v31 = vrot.slane %v209_v6, 1  ;;  %v537_v29 = vsel %vm11367_vm4, %v492_v61, 0 }
  0x4c   :  { %10077 = vmatpush3.bf16.msra.mxu1 %v10842_v62  ;;  %v227_v55 = vshrl.u32 %v11471_v41, 16  ;;  %432 = vst [vmem:[#allocation2 + $0x48] sm:$0xf] %v8615_v51  ;;  %433 = vst [vmem:[#allocation2 + $0x4c] sm:$0xf] %v8616_v52  ;;  %v11509_v22 = vcombine.low %v68_v20, %v69_v21 }
  0x4d   :  { %9951 = vmatmul.mubr.bf16.gmra.mxu0 %v10831_v56  ;;  %10078 = vmatprep.subr.bf16.mxu1 %v10850_v18  ;;  %v230_v56 = vshll.u32 %v11471_v41, 16  ;;  %v66_v62 = vld [vmem:[#allocation3 + $0x58] sm:$0xf]  ;;  %434 = vst [vmem:[#allocation2 + $0x50] sm:$0xf] %v8617_v12 }
  0x4e   :  { %9954 = vmatprep.mubr.bf16.mxu0 %v10836_v1  ;;  %10031 = vmatpush3.bf16.msra.mxu0 %v10849_v2  ;;  %v10866_v1 = vld [vmem:[#allocation6 + $0xc8] sm:$0xff]   ;;  %v229_v2 = vrot.slane %v227_v55, 7  ;;  %v11495_v60 = vcombine.low %v66_v62, %v67_v0  ;;  %471 = vst [vmem:[#allocation2 + $0x170] sm:$0xf] %v66_v62  ;;  %435 = vst [vmem:[#allocation2 + $0x54] sm:$0xf] %v8618_v14 }
  0x4f   :  { %10032 = vmatprep.subr.bf16.mxu0 %v10857_v19  ;;  %9999 = vmatmul.mubr.bf16.gmra.mxu1 %v10832_v32  ;;  %473 = vst [vmem:[#allocation2 + $0x178] sm:$0xf] %v68_v20  ;;  %474 = vst [vmem:[#allocation2 + $0x17c] sm:$0xf] %v69_v21  ;;  %v244_v37 = vshll.u32 %v11509_v22, 16  ;;  %v10855_v48 = vld [vmem:[#allocation2 + $0x168] sm:$0xff]   ;;  %v488_v20 = vor.u32 %v11485_v57, %v178_v58  ;;  %v490_v21 = vor.u32 %v11491_v40, %v185_v8 }
  0x50   :  { %10002 = vmatprep.mubr.bf16.mxu1 %v10837_v34  ;;  %10079 = vmatpush3.bf16.msra.mxu1 %v10850_v18  ;;  %v10845_v9 = vld [vmem:[#allocation2 + $0x40] sm:$0xff]   ;;  %v232_v15 = vor.u32 %v230_v56, %v229_v2  ;;  %v234_v18 = vshrl.u32 %v11495_v60, 16  ;;  %v241_v34 = vshrl.u32 %v11509_v22, 16  ;;  %475 = vst [vmem:[#allocation2 + $0x180] sm:$0xf] %v70_v42  ;;  %v499_v14 = vrot.slane %v223_v54, 1 }
  0x51   :  { %10080 = vmatprep.subr.bf16.mxu1 %v10858_v45  ;;  %v72_v51 = vld [vmem:[#allocation3 + $0x70] sm:$0xf]  ;;  %v73_v52 = vld [vmem:[#allocation3 + $0x74] sm:$0xf]  ;;  %v505_v44 = vrot.slane %v244_v37, 1  ;;  %v494_v57 = vor.u32 %v11513_v28, %v199_v35  ;;  %v496_v40 = vor.u32 %v11519_v31, %v206_v63  ;;  %v535_v25 = vsel %vm11367_vm4, %v488_v20, 0 }
  0x52   :  { %10033 = vmatpush3.bf16.msra.mxu0 %v10857_v19  ;;  %v237_v19 = vshll.u32 %v11495_v60, 16  ;;  %v297_v26 = vsel %vm11377_vm5, 0, %v232_v15  ;;  %v236_v30 = vrot.slane %v234_v18, 7  ;;  %v243_v6 = vrot.slane %v241_v34, 7  ;;  %477 = vst [vmem:[#allocation2 + $0x188] sm:$0xf] %v72_v51 }
  0x53   :  { %10034 = vmatprep.subr.bf16.mxu0 %v10865_v50  ;;  %v8619_v32 = vcombine.low %v297_v26, %v297_v26  ;;  %v10848_v47 = vld [vmem:[#allocation2 + $0x48] sm:$0xff]   ;;  %v11533_v0 = vcombine.low %v72_v51, %v73_v52  ;;  %478 = vst [vmem:[#allocation2 + $0x18c] sm:$0xf] %v73_v52  ;;  %v536_v27 = vsel %vm11367_vm4, %v490_v21, 0  ;;  %v500_v35 = vor.u32 %v499_v14, %v220_v43 }
  0x54   :  { %10081 = vmatpush3.bf16.msra.mxu1 %v10858_v45  ;;  %v239_v38 = vor.u32 %v237_v19, %v236_v30  ;;  %v71_v45 = vld [vmem:[#allocation3 + $0x6c] sm:$0xf]  ;;  %v246_v62 = vor.u32 %v244_v37, %v243_v6  ;;  %v8637_v37 = vcombine.low %v535_v25, %v535_v25  ;;  %v8638_v6 = vcombine.high %v535_v25, %v535_v25  ;;  %v11584_v41 = vld [vmem:[#allocation6 + $0x138] sm:$0xff]  }
  0x55   :  { %9955 = vmatmul.mubr.bf16.gmra.mxu0 %v10839_v39  ;;  %10082 = vmatprep.subr.bf16.mxu1 %v10866_v1  ;;  %v8620_v39 = vcombine.high %v297_v26, %v297_v26  ;;  %436 = vst [vmem:[#allocation2 + $0x58] sm:$0xf] %v8619_v32  ;;  %476 = vst [vmem:[#allocation2 + $0x184] sm:$0xf] %v71_v45  ;;  %v255_v15 = vshrl.u32 %v11533_v0, 16  ;;  %v501_v26 = vrot.slane %v230_v56, 1 }
  0x56   :  { %9958 = vmatprep.mubr.bf16.mxu0 %v10844_v36  ;;  %10035 = vmatpush3.bf16.msra.mxu0 %v10865_v50  ;;  %v497_v36 = vrot.slane %v216_v17, 1  ;;  %v298_v17 = vsel %vm11377_vm5, 0, %v239_v38  ;;  %v11531_v50 = vcombine.low %v70_v42, %v71_v45  ;;  %v258_v32 = vshll.u32 %v11533_v0, 16  ;;  %667 = vst [vmem:[#allocation2 + $0x240] sm:$0xf] %v8637_v37  ;;  %v11590_v52 = vld [vmem:[#allocation6 + $0x178] sm:$0xff]  }
  0x57   :  { %10003 = vmatmul.mubr.bf16.gmra.mxu1 %v10840_v3  ;;  %437 = vst [vmem:[#allocation2 + $0x5c] sm:$0xf] %v8620_v39  ;;  %10036 = vmatprep.subr.bf16.mxu0 %v10873_v24  ;;  %v8621_v53 = vcombine.low %v298_v17, %v298_v17  ;;  %v8622_v59 = vcombine.high %v298_v17, %v298_v17  ;;  %v10860_v3 = vld [vmem:[#allocation2 + $0x170] sm:$0xff]   ;;  %v257_v58 = vrot.slane %v255_v15, 7  ;;  %v10863_v39 = vld [vmem:[#allocation2 + $0x178] sm:$0xff]   ;;  %v539_v17 = vsel %vm11367_vm4, %v496_v40, 0 }
  0x58   :  { %10006 = vmatprep.mubr.bf16.mxu1 %v10845_v9  ;;  %10083 = vmatpush3.bf16.msra.mxu1 %v10866_v1  ;;  %v10853_v1 = vld [vmem:[#allocation2 + $0x50] sm:$0xff]   ;;  %v248_v2 = vshrl.u32 %v11531_v50, 16  ;;  %v251_v12 = vshll.u32 %v11531_v50, 16  ;;  %v8639_v11 = vcombine.low %v536_v27, %v536_v27  ;;  %v502_v28 = vor.u32 %v501_v26, %v227_v55  ;;  %668 = vst [vmem:[#allocation2 + $0x244] sm:$0xf] %v8638_v6  ;;  %v10876_v40 = vld [vmem:[#allocation2 + $0x8] sm:$0xff]  }
  0x59   :  { %10084 = vmatprep.subr.bf16.mxu1 %v10874_v46  ;;  %438 = vst [vmem:[#allocation2 + $0x60] sm:$0xf] %v8621_v53  ;;  %439 = vst [vmem:[#allocation2 + $0x64] sm:$0xf] %v8622_v59  ;;  %v260_v38 = vor.u32 %v258_v32, %v257_v58  ;;  %v509_v43 = vrot.slane %v258_v32, 1  ;;  %v8641_v45 = vcombine.low %v537_v29, %v537_v29  ;;  %v10891_v25 = vld [vmem:[#allocation6 + $0x128] sm:$0xff]  }
  0x5a   :  { %10037 = vmatpush3.bf16.msra.mxu0 %v10873_v24  ;;  %v503_v24 = vrot.slane %v237_v19, 1  ;;  %v498_v19 = vor.u32 %v497_v36, %v213_v13  ;;  %v8640_v13 = vcombine.high %v536_v27, %v536_v27  ;;  %v507_v31 = vrot.slane %v251_v12, 1  ;;  %669 = vst [vmem:[#allocation2 + $0x248] sm:$0xf] %v8639_v11  ;;  %v10886_v37 = vld [vmem:[#allocation6 + $0x170] sm:$0xff]   ;;  %v10897_v27 = vld [vmem:[#allocation6 + $0x120] sm:$0xff]  }
  0x5b   :  { %v301_v63 = vsel %vm11377_vm5, 0, %v260_v38  ;;  %671 = vst [vmem:[#allocation2 + $0x250] sm:$0xf] %v8641_v45  ;;  %v8645_v53 = vcombine.low %v539_v17, %v539_v17  ;;  %v8646_v59 = vcombine.high %v539_v17, %v539_v17  ;;  %10118 = vmatprep.subr.bf16.mxu0 %v11584_v41  ;;  %v10882_v38 = vld [vmem:[#allocation2 + $0x18] sm:$0xff]   ;;  %v10903_v11 = vld [vmem:[#allocation6 + $0x118] sm:$0xff]  }
  0x5c   :  { %10085 = vmatpush3.bf16.msra.mxu1 %v10874_v46  ;;  %v10868_v49 = vld [vmem:[#allocation2 + $0x180] sm:$0xff]   ;;  %v8627_v36 = vcombine.low %v301_v63, %v301_v63  ;;  %v8628_v42 = vcombine.high %v301_v63, %v301_v63  ;;  %670 = vst [vmem:[#allocation2 + $0x24c] sm:$0xf] %v8640_v13  ;;  %v8642_v46 = vcombine.high %v537_v29, %v537_v29  ;;  %v10888_v63 = vld [vmem:[#allocation2 + $0x28] sm:$0xff]   ;;  %v10890_v29 = vld [vmem:[#allocation2 + $0x30] sm:$0xff]  }
  0x5d   :  { %9959 = vmatmul.mubr.bf16.gmra.mxu0 %v10847_v4  ;;  %v299_v4 = vsel %vm11377_vm5, 0, %v246_v62  ;;  %v504_v51 = vor.u32 %v503_v24, %v234_v18  ;;  %v540_v62 = vsel %vm11367_vm4, %v498_v19, 0  ;;  %10166 = vmatprep.subr.bf16.mxu1 %v11590_v52  ;;  %675 = vst [vmem:[#allocation2 + $0x260] sm:$0xf] %v8645_v53  ;;  %676 = vst [vmem:[#allocation2 + $0x264] sm:$0xf] %v8646_v59 }
  0x5e   :  { %9962 = vmatprep.mubr.bf16.mxu0 %v10852_v10  ;;  %v8623_v5 = vcombine.low %v299_v4, %v299_v4  ;;  %v8624_v9 = vcombine.high %v299_v4, %v299_v4  ;;  %v250_v10 = vrot.slane %v248_v2, 7  ;;  %v10856_v8 = vld [vmem:[#allocation2 + $0x58] sm:$0xff]   ;;  %444 = vst [vmem:[#allocation2 + $0x78] sm:$0xf] %v8627_v36  ;;  %445 = vst [vmem:[#allocation2 + $0x7c] sm:$0xf] %v8628_v42 }
  0x5f   :  { %10007 = vmatmul.mubr.bf16.gmra.mxu1 %v10848_v47  ;;  %v538_v47 = vsel %vm11367_vm4, %v494_v57, 0  ;;  %672 = vst [vmem:[#allocation2 + $0x254] sm:$0xf] %v8642_v46  ;;  %v8647_v60 = vcombine.low %v540_v62, %v540_v62  ;;  %v8648_v18 = vcombine.high %v540_v62, %v540_v62  ;;  %v541_v4 = vsel %vm11367_vm4, %v500_v35, 0  ;;  %v10877_v19 = vld [vmem:[#allocation2 + $0x228] sm:$0xff]   ;;  %v10887_v6 = vld [vmem:[#allocation2 + $0x240] sm:$0xff]  }
  0x60   :  { %10010 = vmatprep.mubr.bf16.mxu1 %v10853_v1  ;;  %440 = vst [vmem:[#allocation2 + $0x68] sm:$0xf] %v8623_v5  ;;  %441 = vst [vmem:[#allocation2 + $0x6c] sm:$0xf] %v8624_v9  ;;  %v253_v54 = vor.u32 %v251_v12, %v250_v10  ;;  %v10861_v7 = vld [vmem:[#allocation2 + $0x60] sm:$0xff]   ;;  %v8643_v55 = vcombine.low %v538_v47, %v538_v47  ;;  %v506_v1 = vor.u32 %v505_v44, %v241_v34  ;;  %v10871_v9 = vld [vmem:[#allocation2 + $0x188] sm:$0xff]  }
  0x61   :  { %v508_v5 = vor.u32 %v507_v31, %v248_v2  ;;  %v8649_v22 = vcombine.low %v541_v4, %v541_v4  ;;  %v8650_v34 = vcombine.high %v541_v4, %v541_v4  ;;  %v542_v10 = vsel %vm11367_vm4, %v502_v28, 0  ;;  %677 = vst [vmem:[#allocation2 + $0x268] sm:$0xf] %v8647_v60  ;;  %678 = vst [vmem:[#allocation2 + $0x26c] sm:$0xf] %v8648_v18  ;;  %v10875_v2 = vld [vmem:[#allocation2 + $0x220] sm:$0xff]  }
  0x62   :  { %v300_v56 = vsel %vm11377_vm5, 0, %v253_v54  ;;  %673 = vst [vmem:[#allocation2 + $0x258] sm:$0xf] %v8643_v55  ;;  %v510_v12 = vor.u32 %v509_v43, %v255_v15  ;;  %v8651_v20 = vcombine.low %v542_v10, %v542_v10  ;;  %v8652_v21 = vcombine.high %v542_v10, %v542_v10  ;;  %v10884_v35 = vld [vmem:[#allocation2 + $0x20] sm:$0xff]   ;;  %v10898_v28 = vld [vmem:[#allocation6 + $0x160] sm:$0xff]   ;;  %v10904_v36 = vld [vmem:[#allocation6 + $0x158] sm:$0xff]  }
  0x63   :  { %v8625_v30 = vcombine.low %v300_v56, %v300_v56  ;;  %v8626_v16 = vcombine.high %v300_v56, %v300_v56  ;;  %v543_v50 = vsel %vm11367_vm4, %v504_v51, 0  ;;  %679 = vst [vmem:[#allocation2 + $0x270] sm:$0xf] %v8649_v22  ;;  %680 = vst [vmem:[#allocation2 + $0x274] sm:$0xf] %v8650_v34  ;;  %v544_v54 = vsel %vm11367_vm4, %v506_v1, 0 }
  0x64   :  { %v8653_v26 = vcombine.low %v543_v50, %v543_v50  ;;  %v8654_v24 = vcombine.high %v543_v50, %v543_v50  ;;  %681 = vst [vmem:[#allocation2 + $0x278] sm:$0xf] %v8651_v20  ;;  %682 = vst [vmem:[#allocation2 + $0x27c] sm:$0xf] %v8652_v21  ;;  %v8655_v0 = vcombine.low %v544_v54, %v544_v54  ;;  %v545_v32 = vsel %vm11367_vm4, %v508_v5, 0  ;;  %v10889_v13 = vld [vmem:[#allocation2 + $0x248] sm:$0xff]  }
  0x65   :  { %9963 = vmatmul.mubr.bf16.gmra.mxu0 %v10855_v48  ;;  %442 = vst [vmem:[#allocation2 + $0x70] sm:$0xf] %v8625_v30  ;;  %443 = vst [vmem:[#allocation2 + $0x74] sm:$0xf] %v8626_v16  ;;  %v8644_v48 = vcombine.high %v538_v47, %v538_v47  ;;  %v8656_v15 = vcombine.high %v544_v54, %v544_v54  ;;  %v8657_v44 = vcombine.low %v545_v32, %v545_v32  ;;  %v10872_v57 = vld [vmem:[#allocation2 + $0x78] sm:$0xff]   ;;  %v10885_v30 = vld [vmem:[#allocation6 + $0x130] sm:$0xff]  }
  0x66   :  { %9966 = vmatprep.mubr.bf16.mxu0 %v10860_v3  ;;  %683 = vst [vmem:[#allocation2 + $0x280] sm:$0xf] %v8653_v26  ;;  %684 = vst [vmem:[#allocation2 + $0x284] sm:$0xf] %v8654_v24  ;;  %v8658_v58 = vcombine.high %v545_v32, %v545_v32  ;;  %v546_v61 = vsel %vm11367_vm4, %v510_v12, 0  ;;  %v10878_v16 = vld [vmem:[#allocation2 + $0x10] sm:$0xff]  }
  0x67   :  { %10011 = vmatmul.mubr.bf16.gmra.mxu1 %v10856_v8  ;;  %v10864_v3 = vld [vmem:[#allocation2 + $0x68] sm:$0xff]   ;;  %674 = vst [vmem:[#allocation2 + $0x25c] sm:$0xf] %v8644_v48  ;;  %685 = vst [vmem:[#allocation2 + $0x288] sm:$0xf] %v8655_v0  ;;  %v8659_v8 = vcombine.low %v546_v61, %v546_v61  ;;  %v8660_v56 = vcombine.high %v546_v61, %v546_v61  ;;  %v10893_v31 = vld [vmem:[#allocation2 + $0x250] sm:$0xff]  }
  0x68   :  { %10014 = vmatprep.mubr.bf16.mxu1 %v10861_v7  ;;  %686 = vst [vmem:[#allocation2 + $0x28c] sm:$0xf] %v8656_v15  ;;  %687 = vst [vmem:[#allocation2 + $0x290] sm:$0xf] %v8657_v44  ;;  %v10883_v7 = vld [vmem:[#allocation2 + $0x238] sm:$0xff]   ;;  %v10909_v42 = vld [vmem:[#allocation6 + $0x110] sm:$0xff]  }
  0x69   :  { %688 = vst [vmem:[#allocation2 + $0x294] sm:$0xf] %v8658_v58  ;;  %689 = vst [vmem:[#allocation2 + $0x298] sm:$0xf] %v8659_v8  ;;  %v10894_v43 = vld [vmem:[#allocation2 + $0x38] sm:$0xff]   ;;  %v10910_v46 = vld [vmem:[#allocation6 + $0x150] sm:$0xff]  }
  0x6a   :  { %690 = vst [vmem:[#allocation2 + $0x29c] sm:$0xf] %v8660_v56  ;;  %v10899_v47 = vld [vmem:[#allocation2 + $0x260] sm:$0xff]   ;;  %v10916_v48 = vld [vmem:[#allocation6 + $0x148] sm:$0xff]   ;;  %v10900_v17 = vld [vmem:[#allocation2 + $0x48] sm:$0xff]  }
  0x6b   :  { %v10896_v55 = vld [vmem:[#allocation2 + $0x40] sm:$0xff]   ;;  %v10901_v51 = vld [vmem:[#allocation2 + $0x268] sm:$0xff]   ;;  %v10922_v1 = vld [vmem:[#allocation6 + $0x100] sm:$0xff]  }
  0x6c   :  { %v10869_v14 = vld [vmem:[#allocation2 + $0x70] sm:$0xff]   ;;  %v74_v53 = vld [vmem:[#allocation3 + $0x78] sm:$0xf]  ;;  %v75_v59 = vld [vmem:[#allocation3 + $0x7c] sm:$0xf] }
  0x6d   :  { %9967 = vmatmul.mubr.bf16.gmra.mxu0 %v10863_v39  ;;  %v10881_v39 = vld [vmem:[#allocation2 + $0x230] sm:$0xff]   ;;  %v8598_v62 = vcombine.low %v74_v53, %v75_v59  ;;  %479 = vst [vmem:[#allocation2 + $0x190] sm:$0xf] %v74_v53  ;;  %480 = vst [vmem:[#allocation2 + $0x194] sm:$0xf] %v75_v59  ;;  %v10928_v10 = vld [vmem:[#allocation6 + $0x1b8] sm:$0xff]  }
  0x6e   :  { %9970 = vmatprep.mubr.bf16.mxu0 %v10868_v49  ;;  %v10892_v49 = vld [vmem:[#allocation6 + $0x168] sm:$0xff]   ;;  %v10902_v4 = vld [vmem:[#allocation2 + $0x50] sm:$0xff]   ;;  %v10929_v12 = vld [vmem:[#allocation6 + $0x1f8] sm:$0xff]  }
  0x6f   :  { %10015 = vmatmul.mubr.bf16.gmra.mxu1 %v10864_v3  ;;  %v10895_v45 = vld [vmem:[#allocation2 + $0x258] sm:$0xff]   ;;  %v10923_v3 = vld [vmem:[#allocation6 + $0x140] sm:$0xff]   ;;  %v262_v60 = vshrl.u32 %v8598_v62, 16  ;;  %v265_v18 = vshll.u32 %v8598_v62, 16  ;;  %v10911_v50 = vld [vmem:[#allocation2 + $0x280] sm:$0xff]  }
  0x70   :  { %10018 = vmatprep.mubr.bf16.mxu1 %v10869_v14  ;;  %v10907_v20 = vld [vmem:[#allocation2 + $0x278] sm:$0xff]   ;;  %v10908_v15 = vld [vmem:[#allocation2 + $0x60] sm:$0xff]   ;;  %v10912_v32 = vld [vmem:[#allocation2 + $0x68] sm:$0xff]  }
  0x71   :  { %v264_v5 = vrot.slane %v262_v60, 7  ;;  %v511_v22 = vrot.slane %v265_v18, 1  ;;  %v10913_v44 = vld [vmem:[#allocation2 + $0x288] sm:$0xff]   ;;  %v10917_v58 = vld [vmem:[#allocation2 + $0x290] sm:$0xff]   ;;  %v10918_v8 = vld [vmem:[#allocation2 + $0x78] sm:$0xff]  }
  0x72   :  { %v10914_v61 = vld [vmem:[#allocation2 + $0x70] sm:$0xff]   ;;  %v10919_v56 = vld [vmem:[#allocation2 + $0x298] sm:$0xff]   ;;  %v10976_v53 = vld [vmem:[#allocation6 + $0x238] sm:$0xff]  }
  0x73   :  { %v267_v34 = vor.u32 %v265_v18, %v264_v5  ;;  %v512_v14 = vor.u32 %v511_v22, %v262_v60  ;;  %v10950_v59 = vld [vmem:[#allocation2 + $0x160] sm:$0xff]   ;;  %v10971_v62 = vld [vmem:[#allocation6 + $0x1c0] sm:$0xff]   ;;  %v10955_v18 = vld [vmem:[#allocation2 + $0x278] sm:$0xff]  }
  0x74   :  { %v10951_v60 = vld [vmem:[#allocation2 + $0x270] sm:$0xff]   ;;  %v10960_v5 = vld [vmem:[#allocation2 + $0x178] sm:$0xff]   ;;  %v10961_v22 = vld [vmem:[#allocation2 + $0x288] sm:$0xff]  }
  0x75   :  { %9971 = vmatmul.mubr.bf16.gmra.mxu0 %v10871_v9  ;;  %v10906_v9 = vld [vmem:[#allocation2 + $0x58] sm:$0xff]   ;;  %v302_v21 = vsel %vm11377_vm5, 0, %v267_v34  ;;  %v547_v24 = vsel %vm11367_vm4, %v512_v14, 0  ;;  %v10962_v34 = vld [vmem:[#allocation2 + $0x180] sm:$0xff]  }
  0x76   :  { %10038 = vmatprep.mubr.bf16.mxu0 %v10875_v2  ;;  %v8629_v2 = vcombine.low %v302_v21, %v302_v21  ;;  %v8630_v26 = vcombine.high %v302_v21, %v302_v21  ;;  %v8661_v54 = vcombine.low %v547_v24, %v547_v24  ;;  %v8662_v0 = vcombine.high %v547_v24, %v547_v24  ;;  %v10967_v14 = vld [vmem:[#allocation2 + $0x298] sm:$0xff]   ;;  %v10972_v21 = vld [vmem:[#allocation2 + $0x10] sm:$0xff]  }
  0x77   :  { %10019 = vmatmul.mubr.bf16.gmra.mxu1 %v10872_v57  ;;  %v10924_v57 = vld [vmem:[#allocation2 + $0x118] sm:$0xff]   ;;  %v695_v24 = vld [vmem:[#allocation3 + $0x84] sm:$0xf] }
  0x78   :  { %10086 = vmatprep.mubr.bf16.mxu1 %v10876_v40  ;;  %446 = vst [vmem:[#allocation2 + $0x80] sm:$0xf] %v8629_v2  ;;  %447 = vst [vmem:[#allocation2 + $0x84] sm:$0xf] %v8630_v26  ;;  %v10973_v2 = vld [vmem:[#allocation2 + $0x120] sm:$0xff]  }
  0x79   :  { %691 = vst [vmem:[#allocation2 + $0x2a0] sm:$0xf] %v8661_v54  ;;  %692 = vst [vmem:[#allocation2 + $0x2a4] sm:$0xf] %v8662_v0  ;;  %v694_v26 = vld [vmem:[#allocation3 + $0x80] sm:$0xf] }
  0x7a   :  { %1096 = vst [vmem:[#allocation2 + $0x198] sm:$0xf] %v694_v26  ;;  %v10974_v54 = vld [vmem:[#allocation2 + $0x18] sm:$0xff]   ;;  %v8663_v0 = vcombine.low %v694_v26, %v695_v24  ;;  %1097 = vst [vmem:[#allocation2 + $0x19c] sm:$0xf] %v695_v24 }
  0x7d   :  { %10039 = vmatmul.mubr.bf16.vlgmr.msra.gmra.mxu0 %v10877_v19  ;;  %v10925_v19 = vld [vmem:[#allocation2 + $0x228] sm:$0xff]  }
  0x7e   :  { %10119 = vmatpush3.bf16.msra.mxu0 %v11584_v41  ;;  %10042 = vmatprep.mubr.bf16.mxu0 %v10881_v39  ;;  %v10915_v41 = vld [vmem:[#allocation6 + $0x108] sm:$0xff]   ;;  %v10926_v39 = vld [vmem:[#allocation2 + $0x120] sm:$0xff]  }
  0x7f   :  { %10120 = vmatprep.subr.bf16.mxu0 %v10885_v30  ;;  %10087 = vmatmul.mubr.bf16.vlgmr.msra.gmra.mxu1 %v10878_v16  ;;  %v10921_v40 = vld [vmem:[#allocation2 + $0x80] sm:$0xff]  }
  0x80   :  { %10167 = vmatpush3.bf16.msra.mxu1 %v11590_v52  ;;  %10090 = vmatprep.mubr.bf16.mxu1 %v10882_v38  ;;  %v10905_v52 = vld [vmem:[#allocation2 + $0x270] sm:$0xff]   ;;  %v10934_v16 = vld [vmem:[#allocation6 + $0x1b0] sm:$0xff]  }
  0x81   :  { %10168 = vmatprep.subr.bf16.mxu1 %v10886_v37  ;;  %v10927_v38 = vld [vmem:[#allocation2 + $0x230] sm:$0xff]  }
  0x82   :  { %10121 = vmatpush3.bf16.msra.mxu0 %v10885_v30  ;;  %v10930_v30 = vld [vmem:[#allocation2 + $0x128] sm:$0xff]  }
  0x83   :  { %10122 = vmatprep.subr.bf16.mxu0 %v10891_v25 }
  0x84   :  { %10169 = vmatpush3.bf16.msra.mxu1 %v10886_v37  ;;  %v10932_v37 = vld [vmem:[#allocation2 + $0x130] sm:$0xff]  }
  0x85   :  { %10043 = vmatmul.mubr.bf16.gmra.mxu0 %v10883_v7  ;;  %10170 = vmatprep.subr.bf16.mxu1 %v10892_v49  ;;  %v10940_v7 = vld [vmem:[#allocation6 + $0x1a8] sm:$0xff]  }
  0x86   :  { %10046 = vmatprep.mubr.bf16.mxu0 %v10887_v6  ;;  %10123 = vmatpush3.bf16.msra.mxu0 %v10891_v25  ;;  %v10931_v25 = vld [vmem:[#allocation2 + $0x238] sm:$0xff]   ;;  %v10935_v6 = vld [vmem:[#allocation6 + $0x1f0] sm:$0xff]  }
  0x87   :  { %10124 = vmatprep.subr.bf16.mxu0 %v10897_v27  ;;  %10091 = vmatmul.mubr.bf16.gmra.mxu1 %v10884_v35  ;;  %v10946_v35 = vld [vmem:[#allocation6 + $0x1a0] sm:$0xff]  }
  0x88   :  { %10094 = vmatprep.mubr.bf16.mxu1 %v10888_v63  ;;  %10171 = vmatpush3.bf16.msra.mxu1 %v10892_v49  ;;  %v10933_v49 = vld [vmem:[#allocation2 + $0x240] sm:$0xff]   ;;  %v10941_v63 = vld [vmem:[#allocation6 + $0x1e8] sm:$0xff]  }
  0x89   :  { %10172 = vmatprep.subr.bf16.mxu1 %v10898_v28 }
  0x8a   :  { %10125 = vmatpush3.bf16.msra.mxu0 %v10897_v27  ;;  %v10936_v27 = vld [vmem:[#allocation2 + $0x138] sm:$0xff]  }
  0x8b   :  { %10126 = vmatprep.subr.bf16.mxu0 %v10903_v11 }
  0x8c   :  { %10173 = vmatpush3.bf16.msra.mxu1 %v10898_v28  ;;  %v10938_v28 = vld [vmem:[#allocation2 + $0x140] sm:$0xff]  }
  0x8d   :  { %10047 = vmatmul.mubr.bf16.gmra.mxu0 %v10889_v13  ;;  %10174 = vmatprep.subr.bf16.mxu1 %v10904_v36  ;;  %v10952_v13 = vld [vmem:[#allocation6 + $0x198] sm:$0xff]  }
  0x8e   :  { %10050 = vmatprep.mubr.bf16.mxu0 %v10893_v31  ;;  %10127 = vmatpush3.bf16.msra.mxu0 %v10903_v11  ;;  %v10937_v11 = vld [vmem:[#allocation2 + $0x248] sm:$0xff]   ;;  %v10947_v31 = vld [vmem:[#allocation6 + $0x1e0] sm:$0xff]  }
  0x8f   :  { %10128 = vmatprep.subr.bf16.mxu0 %v10909_v42  ;;  %10095 = vmatmul.mubr.bf16.gmra.mxu1 %v10890_v29  ;;  %v10939_v29 = vld [vmem:[#allocation2 + $0x250] sm:$0xff]  }
  0x90   :  { %10098 = vmatprep.mubr.bf16.mxu1 %v10894_v43  ;;  %10175 = vmatpush3.bf16.msra.mxu1 %v10904_v36  ;;  %v10942_v36 = vld [vmem:[#allocation2 + $0x148] sm:$0xff]  }
  0x91   :  { %10176 = vmatprep.subr.bf16.mxu1 %v10910_v46  ;;  %v10953_v43 = vld [vmem:[#allocation6 + $0x1d8] sm:$0xff]  }
  0x92   :  { %10129 = vmatpush3.bf16.msra.mxu0 %v10909_v42  ;;  %v10958_v42 = vld [vmem:[#allocation6 + $0x190] sm:$0xff]  }
  0x93   :  { %10130 = vmatprep.subr.bf16.mxu0 %v10915_v41 }
  0x94   :  { %10177 = vmatpush3.bf16.msra.mxu1 %v10910_v46  ;;  %v10964_v46 = vld [vmem:[#allocation6 + $0x188] sm:$0xff]  }
  0x95   :  { %10051 = vmatmul.mubr.bf16.gmra.mxu0 %v10895_v45  ;;  %10178 = vmatprep.subr.bf16.mxu1 %v10916_v48  ;;  %v10943_v45 = vld [vmem:[#allocation2 + $0x258] sm:$0xff]  }
  0x96   :  { %10054 = vmatprep.mubr.bf16.mxu0 %v10899_v47  ;;  %10131 = vmatpush3.bf16.msra.mxu0 %v10915_v41  ;;  %v10944_v47 = vld [vmem:[#allocation2 + $0x150] sm:$0xff]   ;;  %v10959_v41 = vld [vmem:[#allocation6 + $0x1d0] sm:$0xff]  }
  0x97   :  { %10099 = vmatmul.mubr.bf16.gmra.mxu1 %v10896_v55  ;;  %10132 = vmatprep.subr.bf16.mxu0 %v10922_v1  ;;  %v10948_v55 = vld [vmem:[#allocation2 + $0x158] sm:$0xff]  }
  0x98   :  { %10102 = vmatprep.mubr.bf16.mxu1 %v10900_v17  ;;  %10179 = vmatpush3.bf16.msra.mxu1 %v10916_v48  ;;  %v10970_v48 = vld [vmem:[#allocation6 + $0x180] sm:$0xff]   ;;  %v10945_v17 = vld [vmem:[#allocation2 + $0x260] sm:$0xff]  }
  0x99   :  { %10180 = vmatprep.subr.bf16.mxu1 %v10923_v3 }
  0x9a   :  { %10133 = vmatpush3.bf16.msra.mxu0 %v10922_v1  ;;  %v10954_v1 = vld [vmem:[#allocation2 + $0x168] sm:$0xff]  }
  0x9b   :  { %10214 = vmatprep.subr.bf16.mxu0 %v10928_v10 }
  0x9c   :  { %10181 = vmatpush3.bf16.msra.mxu1 %v10923_v3  ;;  %v11620_v3 = vld [vmem:[#allocation6 + $0x78] sm:$0xff]  }
  0x9d   :  { %10055 = vmatmul.mubr.bf16.gmra.mxu0 %v10901_v51  ;;  %10262 = vmatprep.subr.bf16.mxu1 %v10929_v12  ;;  %v10965_v51 = vld [vmem:[#allocation6 + $0x1c8] sm:$0xff]  }
  0x9e   :  { %10058 = vmatprep.mubr.bf16.mxu0 %v10905_v52  ;;  %v10949_v52 = vld [vmem:[#allocation2 + $0x268] sm:$0xff]  }
  0x9f   :  { %10103 = vmatmul.mubr.bf16.gmra.mxu1 %v10902_v4  ;;  %v10956_v4 = vld [vmem:[#allocation2 + $0x170] sm:$0xff]  }
  0xa0   :  { %10106 = vmatprep.mubr.bf16.mxu1 %v10906_v9  ;;  %v10957_v9 = vld [vmem:[#allocation2 + $0x280] sm:$0xff]  }
  0xa5   :  { %10059 = vmatmul.mubr.bf16.gmra.mxu0 %v10907_v20  ;;  %v10968_v20 = vld [vmem:[#allocation2 + $0x190] sm:$0xff]  }
  0xa6   :  { %10062 = vmatprep.mubr.bf16.mxu0 %v10911_v50  ;;  %v10969_v50 = vld [vmem:[#allocation2 + $0x2a0] sm:$0xff]  }
  0xa7   :  { %10107 = vmatmul.mubr.bf16.gmra.mxu1 %v10908_v15  ;;  %v10978_v15 = vld [vmem:[#allocation2 + $0x20] sm:$0xff]  }
  0xa8   :  { %10110 = vmatprep.mubr.bf16.mxu1 %v10912_v32  ;;  %v10982_v32 = vld [vmem:[#allocation6 + $0x230] sm:$0xff]  }
  0xad   :  { %10063 = vmatmul.mubr.bf16.gmra.mxu0 %v10913_v44  ;;  %v807_v44 = vshrl.u32 %v8663_v0, 16 }
  0xae   :  { %10066 = vmatprep.mubr.bf16.mxu0 %v10917_v58  ;;  %v810_v58 = vshll.u32 %v8663_v0, 16  ;;  %v11001_v0 = vld [vmem:[#allocation6 + $0x58] sm:$0xff]  }
  0xaf   :  { %10111 = vmatmul.mubr.bf16.gmra.mxu1 %v10914_v61 }
  0xb0   :  { %10114 = vmatprep.mubr.bf16.mxu1 %v10918_v8  ;;  %v10975_v8 = vld [vmem:[#allocation2 + $0x128] sm:$0xff]  }
  0xb5   :  { %10067 = vmatmul.mubr.bf16.gmra.mxu0 %v10919_v56  ;;  %v809_v56 = vrot.slane %v807_v44, 7 }
  0xb6   :  { %10134 = vmatprep.mubr.bf16.mxu0 %v10924_v57  ;;  %v10979_v57 = vld [vmem:[#allocation2 + $0x130] sm:$0xff]  }
  0xb7   :  { %10115 = vmatmul.mubr.bf16.gmra.mxu1 %v10921_v40  ;;  %v1128_v40 = vrot.slane %v810_v58, 1 }
  0xb8   :  { %10182 = vmatprep.mubr.bf16.mxu1 %v10925_v19 }
  0xbd   :  { %10135 = vmatmul.mubr.bf16.vlgmr.msra.gmra.mxu0 %v10926_v39  ;;  %v10988_v39 = vld [vmem:[#allocation6 + $0x228] sm:$0xff]  }
  0xbe   :  { %10215 = vmatpush3.bf16.msra.mxu0 %v10928_v10  ;;  %10138 = vmatprep.mubr.bf16.mxu0 %v10930_v30  ;;  %v10966_v10 = vld [vmem:[#allocation2 + $0x188] sm:$0xff]   ;;  %v812_v30 = vor.u32 %v810_v58, %v809_v56  ;;  %v10991_v58 = vld [vmem:[#allocation2 + $0x150] sm:$0xff]   ;;  %v11012_v56 = vld [vmem:[#allocation6 + $0x208] sm:$0xff]  }
  0xbf   :  { %10216 = vmatprep.subr.bf16.mxu0 %v10934_v16  ;;  %10183 = vmatmul.mubr.bf16.vlgmr.msra.gmra.mxu1 %v10927_v38  ;;  %v1129_v38 = vor.u32 %v1128_v40, %v807_v44 }
  0xc0   :  { %10263 = vmatpush3.bf16.msra.mxu1 %v10929_v12  ;;  %10186 = vmatprep.mubr.bf16.mxu1 %v10931_v25  ;;  %v10963_v12 = vld [vmem:[#allocation2 + $0x290] sm:$0xff]  }
  0xc1   :  { %10264 = vmatprep.subr.bf16.mxu1 %v10935_v6 }
  0xc2   :  { %10217 = vmatpush3.bf16.msra.mxu0 %v10934_v16  ;;  %v10980_v16 = vld [vmem:[#allocation2 + $0x28] sm:$0xff]  }
  0xc3   :  { %10218 = vmatprep.subr.bf16.mxu0 %v10940_v7 }
  0xc4   :  { %10265 = vmatpush3.bf16.msra.mxu1 %v10935_v6  ;;  %v10984_v6 = vld [vmem:[#allocation2 + $0x30] sm:$0xff]  }
  0xc5   :  { %10139 = vmatmul.mubr.bf16.gmra.mxu0 %v10932_v37  ;;  %10266 = vmatprep.subr.bf16.mxu1 %v10941_v63  ;;  %v934_v37 = vsel %vm11377_vm5, 0, %v812_v30 }
  0xc6   :  { %10142 = vmatprep.mubr.bf16.mxu0 %v10936_v27  ;;  %10219 = vmatpush3.bf16.msra.mxu0 %v10940_v7  ;;  %v10983_v7 = vld [vmem:[#allocation6 + $0x70] sm:$0xff]   ;;  %v8679_v27 = vcombine.low %v934_v37, %v934_v37 }
  0xc7   :  { %10220 = vmatprep.subr.bf16.mxu0 %v10946_v35  ;;  %10187 = vmatmul.mubr.bf16.gmra.mxu1 %v10933_v49  ;;  %v696_v49 = vld [vmem:[#allocation3 + $0x88] sm:$0xf] }
  0xc8   :  { %10190 = vmatprep.mubr.bf16.mxu1 %v10937_v11  ;;  %10267 = vmatpush3.bf16.msra.mxu1 %v10941_v63  ;;  %v697_v63 = vld [vmem:[#allocation3 + $0x8c] sm:$0xf]  ;;  %v1176_v11 = vsel %vm11367_vm4, %v1129_v38, 0  ;;  %1098 = vst [vmem:[#allocation2 + $0x1a0] sm:$0xf] %v696_v49 }
  0xc9   :  { %10268 = vmatprep.subr.bf16.mxu1 %v10947_v31  ;;  %1099 = vst [vmem:[#allocation2 + $0x1a4] sm:$0xf] %v697_v63  ;;  %1063 = vst [vmem:[#allocation2 + $0x88] sm:$0xf] %v8679_v27 }
  0xca   :  { %10221 = vmatpush3.bf16.msra.mxu0 %v10946_v35  ;;  %v8680_v35 = vcombine.high %v934_v37, %v934_v37 }
  0xcb   :  { %10222 = vmatprep.subr.bf16.mxu0 %v10952_v13 }
  0xcc   :  { %10269 = vmatpush3.bf16.msra.mxu1 %v10947_v31  ;;  %v10994_v31 = vld [vmem:[#allocation6 + $0x220] sm:$0xff]   ;;  %1064 = vst [vmem:[#allocation2 + $0x8c] sm:$0xf] %v8680_v35  ;;  %v11674_v35 = vld [vmem:[#allocation3 + $0xa8] sm:$0xf] }
  0xcd   :  { %10143 = vmatmul.mubr.bf16.gmra.mxu0 %v10938_v28  ;;  %10270 = vmatprep.subr.bf16.mxu1 %v10953_v43  ;;  %1106 = vst [vmem:[#allocation2 + $0x1c0] sm:$0xf] %v11674_v35 }
  0xce   :  { %10146 = vmatprep.mubr.bf16.mxu0 %v10942_v36  ;;  %10223 = vmatpush3.bf16.msra.mxu0 %v10952_v13  ;;  %v11627_v36 = vcombine.low %v696_v49, %v697_v63  ;;  %v11676_v49 = vld [vmem:[#allocation3 + $0xac] sm:$0xf] }
  0xcf   :  { %10224 = vmatprep.subr.bf16.mxu0 %v10958_v42  ;;  %10191 = vmatmul.mubr.bf16.gmra.mxu1 %v10939_v29  ;;  %v8712_v29 = vcombine.high %v1176_v11, %v1176_v11  ;;  %1107 = vst [vmem:[#allocation2 + $0x1c4] sm:$0xf] %v11676_v49 }
  0xd0   :  { %10194 = vmatprep.mubr.bf16.mxu1 %v10943_v45  ;;  %10271 = vmatpush3.bf16.msra.mxu1 %v10953_v43  ;;  %v11632_v45 = vld [vmem:[#allocation3 + $0x90] sm:$0xf] }
  0xd1   :  { %10272 = vmatprep.subr.bf16.mxu1 %v10959_v41  ;;  %1100 = vst [vmem:[#allocation2 + $0x1a8] sm:$0xf] %v11632_v45  ;;  %1306 = vst [vmem:[#allocation2 + $0x2ac] sm:$0xf] %v8712_v29  ;;  %v11684_v29 = vld [vmem:[#allocation3 + $0xb4] sm:$0xf] }
  0xd2   :  { %10225 = vmatpush3.bf16.msra.mxu0 %v10958_v42  ;;  %v8711_v42 = vcombine.low %v1176_v11, %v1176_v11  ;;  %1109 = vst [vmem:[#allocation2 + $0x1cc] sm:$0xf] %v11684_v29 }
  0xd3   :  { %10226 = vmatprep.subr.bf16.mxu0 %v10964_v46 }
  0xd4   :  { %10273 = vmatpush3.bf16.msra.mxu1 %v10959_v41  ;;  %1305 = vst [vmem:[#allocation2 + $0x2a8] sm:$0xf] %v8711_v42  ;;  %v11682_v42 = vld [vmem:[#allocation3 + $0xb0] sm:$0xf] }
  0xd5   :  { %10147 = vmatmul.mubr.bf16.gmra.mxu0 %v10944_v47  ;;  %10274 = vmatprep.subr.bf16.mxu1 %v10965_v51  ;;  %1108 = vst [vmem:[#allocation2 + $0x1c8] sm:$0xf] %v11682_v42 }
  0xd6   :  { %10150 = vmatprep.mubr.bf16.mxu0 %v10948_v55  ;;  %10227 = vmatpush3.bf16.msra.mxu0 %v10964_v46  ;;  %v11634_v46 = vld [vmem:[#allocation3 + $0x94] sm:$0xf]  ;;  %v10981_v55 = vld [vmem:[#allocation2 + $0x138] sm:$0xff]  }
  0xd7   :  { %10228 = vmatprep.subr.bf16.mxu0 %v10970_v48  ;;  %10195 = vmatmul.mubr.bf16.gmra.mxu1 %v10945_v17  ;;  %v814_v17 = vshrl.u32 %v11627_v36, 16  ;;  %1101 = vst [vmem:[#allocation2 + $0x1ac] sm:$0xf] %v11634_v46 }
  0xd8   :  { %10198 = vmatprep.mubr.bf16.mxu1 %v10949_v52  ;;  %10275 = vmatpush3.bf16.msra.mxu1 %v10965_v51 }
  0xd9   :  { %10276 = vmatprep.subr.bf16.mxu1 %v10971_v62 }
  0xda   :  { %10229 = vmatpush3.bf16.msra.mxu0 %v10970_v48  ;;  %v10989_v48 = vld [vmem:[#allocation6 + $0x68] sm:$0xff]  }
  0xdb   :  { %10310 = vmatprep.subr.bf16.mxu0 %v10976_v53 }
  0xdc   :  { %10277 = vmatpush3.bf16.msra.mxu1 %v10971_v62  ;;  %v11000_v62 = vld [vmem:[#allocation6 + $0x218] sm:$0xff]  }
  0xdd   :  { %10151 = vmatmul.mubr.bf16.gmra.mxu0 %v10950_v59  ;;  %10358 = vmatprep.subr.bf16.mxu1 %v11620_v3  ;;  %v10985_v59 = vld [vmem:[#allocation2 + $0x140] sm:$0xff]  }
  0xde   :  { %10154 = vmatprep.mubr.bf16.mxu0 %v10954_v1  ;;  %v816_v1 = vrot.slane %v814_v17, 7 }
  0xdf   :  { %10199 = vmatmul.mubr.bf16.gmra.mxu1 %v10951_v60  ;;  %v10986_v60 = vld [vmem:[#allocation2 + $0x38] sm:$0xff]  }
  0xe0   :  { %10202 = vmatprep.mubr.bf16.mxu1 %v10955_v18  ;;  %v11645_v18 = vld [vmem:[#allocation3 + $0x98] sm:$0xf] }
  0xe1   :  { %1102 = vst [vmem:[#allocation2 + $0x1b0] sm:$0xf] %v11645_v18 }
  0xe5   :  { %10155 = vmatmul.mubr.bf16.gmra.mxu0 %v10956_v4  ;;  %v11647_v4 = vld [vmem:[#allocation3 + $0x9c] sm:$0xf] }
  0xe6   :  { %10158 = vmatprep.mubr.bf16.mxu0 %v10960_v5  ;;  %1103 = vst [vmem:[#allocation2 + $0x1b4] sm:$0xf] %v11647_v4 }
  0xe7   :  { %10203 = vmatmul.mubr.bf16.gmra.mxu1 %v10957_v9 }
  0xe8   :  { %10206 = vmatprep.mubr.bf16.mxu1 %v10961_v22  ;;  %v10995_v22 = vld [vmem:[#allocation6 + $0x60] sm:$0xff]  }
  0xed   :  { %10159 = vmatmul.mubr.bf16.gmra.mxu0 %v10962_v34  ;;  %v817_v34 = vshll.u32 %v11627_v36, 16  ;;  %v11704_v36 = vld [vmem:[#allocation3 + $0xb8] sm:$0xf] }
  0xee   :  { %10162 = vmatprep.mubr.bf16.mxu0 %v10966_v10  ;;  %1110 = vst [vmem:[#allocation2 + $0x1d0] sm:$0xf] %v11704_v36 }
  0xef   :  { %10207 = vmatmul.mubr.bf16.gmra.mxu1 %v10963_v12  ;;  %v10990_v12 = vld [vmem:[#allocation2 + $0x40] sm:$0xff]   ;;  %v1130_v27 = vrot.slane %v817_v34, 1 }
  0xf0   :  { %10210 = vmatprep.mubr.bf16.mxu1 %v10967_v14 }
  0xf5   :  { %10163 = vmatmul.mubr.bf16.gmra.mxu0 %v10968_v20 }
  0xf6   :  { %10230 = vmatprep.mubr.bf16.mxu0 %v10972_v21  ;;  %v11006_v21 = vld [vmem:[#allocation6 + $0x210] sm:$0xff]  }
  0xf7   :  { %10211 = vmatmul.mubr.bf16.gmra.mxu1 %v10969_v50  ;;  %v819_v50 = vor.u32 %v817_v34, %v816_v1  ;;  %v11020_v34 = vld [vmem:[#allocation6 + $0x40] sm:$0xff]  }
  0xf8   :  { %10278 = vmatprep.mubr.bf16.mxu1 %v10973_v2 }
  0xfd   :  { %v9944_v61 = vpop.f32.mrf.mxu0  ;;  %10231 = vmatmul.mubr.bf16.vlgmr.msra.gmra.mxu0 %v10974_v54  ;;  %v10987_v54 = vld [vmem:[#allocation2 + $0x148] sm:$0xff]  }
  0xfe   :  { %10311 = vmatpush3.bf16.msra.mxu0 %v10976_v53  ;;  %10234 = vmatprep.mubr.bf16.mxu0 %v10978_v15  ;;  %v11656_v15 = vld [vmem:[#allocation3 + $0xa0] sm:$0xf] }
  0xff   :  { %v1630_v19 = vpop.f32.mrf.mxu0  ;;  %10312 = vmatprep.subr.bf16.mxu0 %v10982_v32  ;;  %v9992_v13 = vpop.f32.mrf.mxu1  ;;  %10279 = vmatmul.mubr.bf16.vlgmr.msra.gmra.mxu1 %v10975_v8  ;;  %1104 = vst [vmem:[#allocation2 + $0x1b8] sm:$0xf] %v11656_v15 }
 0x100   :  { %v11629_v43 = vadd.f32 %v9992_v13, %v9944_v61  ;;  %10359 = vmatpush3.bf16.msra.mxu1 %v11620_v3  ;;  %10282 = vmatprep.mubr.bf16.mxu1 %v10979_v57  ;;  %v935_v57 = vsel %vm11377_vm5, 0, %v819_v50  ;;  %v11013_v13 = vld [vmem:[#allocation6 + $0x48] sm:$0xff]  }
 0x101   :  { %v9945_v25 = vpop.f32.mrf.mxu0  ;;  %v1935_v47 = vpop.f32.mrf.mxu1  ;;  %10360 = vmatprep.subr.bf16.mxu1 %v10983_v7  ;;  %v8682_v30 = vcombine.high %v935_v57, %v935_v57 }
 0x102   :  { %10313 = vmatpush3.bf16.msra.mxu0 %v10982_v32  ;;  %v11639_v51 = vadd.f32 %v1935_v47, %v1630_v19  ;;  %v11658_v32 = vld [vmem:[#allocation3 + $0xa4] sm:$0xf]  ;;  %v10992_v19 = vld [vmem:[#allocation2 + $0x48] sm:$0xff]   ;;  %v10993_v47 = vld [vmem:[#allocation2 + $0x158] sm:$0xff]  }
 0x103   :  { %v1633_v28 = vpop.f32.mrf.mxu0  ;;  %10314 = vmatprep.subr.bf16.mxu0 %v10988_v39  ;;  %v9993_v52 = vpop.f32.mrf.mxu1  ;;  %1105 = vst [vmem:[#allocation2 + $0x1bc] sm:$0xf] %v11658_v32  ;;  %1066 = vst [vmem:[#allocation2 + $0x94] sm:$0xf] %v8682_v30  ;;  %v11713_v50 = vcombine.low %v11656_v15, %v11658_v32  ;;  %v711_v30 = vld [vmem:[#allocation3 + $0xc4] sm:$0xf] }
 0x104   :  { %v11643_v3 = vadd.f32 %v9993_v52, %v9945_v25  ;;  %10361 = vmatpush3.bf16.msra.mxu1 %v10983_v7  ;;  %v11007_v25 = vld [vmem:[#allocation6 + $0x50] sm:$0xff]   ;;  %v11670_v7 = vcombine.low %v11632_v45, %v11634_v46  ;;  %1113 = vst [vmem:[#allocation2 + $0x1dc] sm:$0xf] %v711_v30 }
 0x105   :  { %v9948_v41 = vpop.f32.mrf.mxu0  ;;  %10235 = vmatmul.mubr.bf16.gmra.mxu0 %v10980_v16  ;;  %v1938_v5 = vpop.f32.mrf.mxu1  ;;  %10362 = vmatprep.subr.bf16.mxu1 %v10989_v48  ;;  %v10997_v52 = vld [vmem:[#allocation2 + $0x160] sm:$0xff]  }
 0x106   :  { %10238 = vmatprep.mubr.bf16.mxu0 %v10984_v6  ;;  %10315 = vmatpush3.bf16.msra.mxu0 %v10988_v39  ;;  %v11652_v10 = vadd.f32 %v1938_v5, %v1633_v28  ;;  %v8681_v39 = vcombine.low %v935_v57, %v935_v57  ;;  %v10996_v6 = vld [vmem:[#allocation2 + $0x50] sm:$0xff]   ;;  %v11698_v5 = vld [vmem:[#allocation6 + $0x38] sm:$0xff]  }
 0x107   :  { %v1646_v53 = vpop.f32.mrf.mxu0  ;;  %10316 = vmatprep.subr.bf16.mxu0 %v10994_v31  ;;  %v9996_v14 = vpop.f32.mrf.mxu1  ;;  %10283 = vmatmul.mubr.bf16.gmra.mxu1 %v10981_v55  ;;  %v11019_v28 = vld [vmem:[#allocation6 + $0x200] sm:$0xff]   ;;  %v824_v55 = vshll.u32 %v11670_v7, 16  ;;  %v10999_v57 = vld [vmem:[#allocation2 + $0x168] sm:$0xff]  }
 0x108   :  { %v11654_v2 = vadd.f32 %v9996_v14, %v9948_v41  ;;  %10286 = vmatprep.mubr.bf16.mxu1 %v10985_v59  ;;  %10363 = vmatpush3.bf16.msra.mxu1 %v10989_v48  ;;  %1065 = vst [vmem:[#allocation2 + $0x90] sm:$0xf] %v8681_v39  ;;  %v821_v41 = vshrl.u32 %v11670_v7, 16  ;;  %v1131_v59 = vor.u32 %v1130_v27, %v814_v17  ;;  %v11706_v17 = vld [vmem:[#allocation3 + $0xbc] sm:$0xf] }
 0x109   :  { %v9949_v9 = vpop.f32.mrf.mxu0  ;;  %v1951_v26 = vpop.f32.mrf.mxu1  ;;  %10364 = vmatprep.subr.bf16.mxu1 %v10995_v22  ;;  %1111 = vst [vmem:[#allocation2 + $0x1d4] sm:$0xf] %v11706_v17  ;;  %v11730_v39 = vcombine.low %v11674_v35, %v11676_v49  ;;  %v11739_v35 = vcombine.low %v11682_v42, %v11684_v29 }
 0x10a   :  { %10317 = vmatpush3.bf16.msra.mxu0 %v10994_v31  ;;  %v11660_v44 = vadd.f32 %v1951_v26, %v1646_v53  ;;  %v11694_v53 = vcombine.low %v11645_v18, %v11647_v4  ;;  %v823_v18 = vrot.slane %v821_v41, 7  ;;  %v1132_v4 = vrot.slane %v824_v55, 1 }
 0x10b   :  { %v1649_v20 = vpop.f32.mrf.mxu0  ;;  %10318 = vmatprep.subr.bf16.mxu0 %v11000_v62  ;;  %v9997_v61 = vpop.f32.mrf.mxu1  ;;  %v1177_v26 = vsel %vm11367_vm4, %v1131_v59, 0  ;;  %v13046_v42 = vshrl.u32 %v11730_v39, 16 }
 0x10c   :  { %v11666_v40 = vadd.f32 %v9997_v61, %v9949_v9  ;;  %10365 = vmatpush3.bf16.msra.mxu1 %v10995_v22  ;;  %v11002_v22 = vld [vmem:[#allocation2 + $0x60] sm:$0xff]   ;;  %v8714_v61 = vcombine.high %v1177_v26, %v1177_v26  ;;  %v831_v15 = vshll.u32 %v11694_v53, 16  ;;  %v1133_v49 = vor.u32 %v1132_v4, %v821_v41 }
 0x10d   :  { %v9952_v24 = vpop.f32.mrf.mxu0  ;;  %10239 = vmatmul.mubr.bf16.gmra.mxu0 %v10986_v60  ;;  %v1954_v16 = vpop.f32.mrf.mxu1  ;;  %10366 = vmatprep.subr.bf16.mxu1 %v11001_v0  ;;  %v10998_v60 = vld [vmem:[#allocation2 + $0x58] sm:$0xff]  }
 0x10e   :  { %10242 = vmatprep.mubr.bf16.mxu0 %v10990_v12  ;;  %10319 = vmatpush3.bf16.msra.mxu0 %v11000_v62  ;;  %v11672_v37 = vadd.f32 %v1954_v16, %v1649_v20  ;;  %1308 = vst [vmem:[#allocation2 + $0x2b4] sm:$0xf] %v8714_v61  ;;  %v826_v16 = vor.u32 %v824_v55, %v823_v18  ;;  %v712_v55 = vld [vmem:[#allocation3 + $0xc8] sm:$0xf]  ;;  %v1178_v4 = vsel %vm11367_vm4, %v1133_v49, 0 }
 0x10f   :  { %v1662_v8 = vpop.f32.mrf.mxu0  ;;  %10320 = vmatprep.subr.bf16.mxu0 %v11006_v21  ;;  %v10000_v63 = vpop.f32.mrf.mxu1  ;;  %10287 = vmatmul.mubr.bf16.gmra.mxu1 %v10987_v54  ;;  %1114 = vst [vmem:[#allocation2 + $0x1e0] sm:$0xf] %v712_v55  ;;  %v8716_v61 = vcombine.high %v1178_v4, %v1178_v4 }
 0x110   :  { %v11680_v31 = vadd.f32 %v10000_v63, %v9952_v24  ;;  %10290 = vmatprep.mubr.bf16.mxu1 %v10991_v58  ;;  %10367 = vmatpush3.bf16.msra.mxu1 %v11001_v0  ;;  %v11720_v0 = vld [vmem:[#allocation3 + $0xc0] sm:$0xf]  ;;  %v8713_v58 = vcombine.low %v1177_v26, %v1177_v26  ;;  %v936_v7 = vsel %vm11377_vm5, 0, %v826_v16  ;;  %v11005_v16 = vld [vmem:[#allocation2 + $0x178] sm:$0xff]  }
 0x111   :  { %v9953_v38 = vpop.f32.mrf.mxu0  ;;  %v1967_v45 = vpop.f32.mrf.mxu1  ;;  %10368 = vmatprep.subr.bf16.mxu1 %v11007_v25  ;;  %1112 = vst [vmem:[#allocation2 + $0x1d8] sm:$0xf] %v11720_v0  ;;  %v8684_v18 = vcombine.high %v936_v7, %v936_v7  ;;  %1310 = vst [vmem:[#allocation2 + $0x2bc] sm:$0xf] %v8716_v61 }
 0x112   :  { %10321 = vmatpush3.bf16.msra.mxu0 %v11006_v21  ;;  %v11690_v48 = vadd.f32 %v1967_v45, %v1662_v8  ;;  %v828_v21 = vshrl.u32 %v11694_v53, 16  ;;  %1307 = vst [vmem:[#allocation2 + $0x2b0] sm:$0xf] %v8713_v58  ;;  %v11008_v45 = vld [vmem:[#allocation2 + $0x70] sm:$0xff]   ;;  %v8715_v58 = vcombine.low %v1178_v4, %v1178_v4  ;;  %v11014_v53 = vld [vmem:[#allocation2 + $0x80] sm:$0xff]  }
 0x113   :  { %v1665_v11 = vpop.f32.mrf.mxu0  ;;  %10322 = vmatprep.subr.bf16.mxu0 %v11012_v56  ;;  %v10001_v62 = vpop.f32.mrf.mxu1  ;;  %1068 = vst [vmem:[#allocation2 + $0x9c] sm:$0xf] %v8684_v18  ;;  %v716_v18 = vld [vmem:[#allocation3 + $0xd8] sm:$0xf]  ;;  %v717_v4 = vld [vmem:[#allocation3 + $0xdc] sm:$0xf] }
 0x114   :  { %v11700_v9 = vadd.f32 %v10001_v62, %v9953_v38  ;;  %10369 = vmatpush3.bf16.msra.mxu1 %v11007_v25  ;;  %v11003_v25 = vld [vmem:[#allocation2 + $0x170] sm:$0xff]   ;;  %v13047_v62 = vshll.u32 %v11730_v39, 16  ;;  %1309 = vst [vmem:[#allocation2 + $0x2b8] sm:$0xf] %v8715_v58  ;;  %1118 = vst [vmem:[#allocation2 + $0x1f0] sm:$0xf] %v716_v18 }
 0x115   :  { %v9956_v46 = vpop.f32.mrf.mxu0  ;;  %10243 = vmatmul.mubr.bf16.gmra.mxu0 %v10992_v19  ;;  %v1970_v12 = vpop.f32.mrf.mxu1  ;;  %10370 = vmatprep.subr.bf16.mxu1 %v11013_v13  ;;  %v11726_v19 = vld [vmem:[#allocation6 + $0xb8] sm:$0xff]   ;;  %1119 = vst [vmem:[#allocation2 + $0x1f4] sm:$0xf] %v717_v4 }
 0x116   :  { %10246 = vmatprep.mubr.bf16.mxu0 %v10996_v6  ;;  %10323 = vmatpush3.bf16.msra.mxu0 %v11012_v56  ;;  %v11708_v20 = vadd.f32 %v1970_v12, %v1665_v11  ;;  %v13048_v6 = vshrl.u32 %v11713_v50, 16  ;;  %v11004_v11 = vld [vmem:[#allocation2 + $0x68] sm:$0xff]   ;;  %v13045_v12 = vshrl.u32 %v11739_v35, 16 }
 0x117   :  { %v1678_v1 = vpop.f32.mrf.mxu0  ;;  %10324 = vmatprep.subr.bf16.mxu0 %v11019_v28  ;;  %v10004_v24 = vpop.f32.mrf.mxu1  ;;  %10291 = vmatmul.mubr.bf16.gmra.mxu1 %v10993_v47  ;;  %v838_v47 = vshll.u32 %v11713_v50, 16 }
 0x118   :  { %v11722_v8 = vadd.f32 %v10004_v24, %v9956_v46  ;;  %10294 = vmatprep.mubr.bf16.mxu1 %v10997_v52  ;;  %10371 = vmatpush3.bf16.msra.mxu1 %v11013_v13  ;;  %v830_v13 = vrot.slane %v828_v21, 7  ;;  %v1134_v46 = vrot.slane %v831_v15, 1  ;;  %v11756_v41 = vrot.slane %v13048_v6, 7  ;;  %v714_v24 = vld [vmem:[#allocation3 + $0xd0] sm:$0xf] }
 0x119   :  { %v9957_v14 = vpop.f32.mrf.mxu0  ;;  %v1983_v32 = vpop.f32.mrf.mxu1  ;;  %10372 = vmatprep.subr.bf16.mxu1 %v11020_v34  ;;  %1116 = vst [vmem:[#allocation2 + $0x1e8] sm:$0xf] %v714_v24 }
 0x11a   :  { %10325 = vmatpush3.bf16.msra.mxu0 %v11019_v28  ;;  %v11732_v38 = vadd.f32 %v1983_v32, %v1678_v1  ;;  %v713_v1 = vld [vmem:[#allocation3 + $0xcc] sm:$0xf]  ;;  %v833_v49 = vor.u32 %v831_v15, %v830_v13 }
 0x11b   :  { %v1681_v54 = vpop.f32.mrf.mxu0  ;;  %10406 = vmatprep.subr.bf16.mxu0 %v11698_v5  ;;  %v10005_v27 = vpop.f32.mrf.mxu1  ;;  %1115 = vst [vmem:[#allocation2 + $0x1e4] sm:$0xf] %v713_v1 }
 0x11c   :  { %v11743_v28 = vadd.f32 %v10005_v27, %v9957_v14  ;;  %10373 = vmatpush3.bf16.msra.mxu1 %v11020_v34  ;;  %v11762_v14 = vcombine.low %v11704_v36, %v11706_v17  ;;  %v11770_v36 = vrot.slane %v838_v47, 1  ;;  %v11774_v17 = vrot.slane %v13046_v42, 7  ;;  %v718_v42 = vld [vmem:[#allocation3 + $0xe0] sm:$0xf] }
 0x11d   :  { %v9960_v56 = vpop.f32.mrf.mxu0  ;;  %10247 = vmatmul.mubr.bf16.gmra.mxu0 %v10998_v60  ;;  %v1986_v52 = vpop.f32.mrf.mxu1  ;;  %10454 = vmatprep.subr.bf16.mxu1 %v11726_v19  ;;  %v8683_v60 = vcombine.low %v936_v7, %v936_v7  ;;  %1120 = vst [vmem:[#allocation2 + $0x1f8] sm:$0xf] %v718_v42 }
 0x11e   :  { %10250 = vmatprep.mubr.bf16.mxu0 %v11002_v22  ;;  %v11752_v29 = vadd.f32 %v1986_v52, %v1681_v54  ;;  %v715_v54 = vld [vmem:[#allocation3 + $0xd4] sm:$0xf]  ;;  %v1135_v52 = vor.u32 %v1134_v46, %v828_v21 }
 0x11f   :  { %v1694_v63 = vpop.f32.mrf.mxu0  ;;  %v10008_v22 = vpop.f32.mrf.mxu1  ;;  %10295 = vmatmul.mubr.bf16.gmra.mxu1 %v10999_v57  ;;  %1067 = vst [vmem:[#allocation2 + $0x98] sm:$0xf] %v8683_v60  ;;  %1117 = vst [vmem:[#allocation2 + $0x1ec] sm:$0xf] %v715_v54 }
 0x120   :  { %v11766_v26 = vadd.f32 %v10008_v22, %v9960_v56  ;;  %10298 = vmatprep.mubr.bf16.mxu1 %v11003_v25  ;;  %v13050_v56 = vshll.u32 %v11739_v35, 16  ;;  %v11778_v25 = vcombine.low %v11720_v0, %v711_v30  ;;  %v11009_v0 = vld [vmem:[#allocation2 + $0x180] sm:$0xff]   ;;  %v11010_v30 = vld [vmem:[#allocation2 + $0x78] sm:$0xff]   ;;  %v11790_v22 = vrot.slane %v13047_v62, 1 }
 0x121   :  { %v9961_v59 = vpop.f32.mrf.mxu0  ;;  %v1999_v32 = vpop.f32.mrf.mxu1 }
 0x122   :  { %13056 = vst [vmem:[#allocation12_spill] sm:$0xff] %v11766_v26  ;;  %v11780_v27 = vadd.f32 %v1999_v32, %v1694_v63  ;;  %v11794_v63 = vrot.slane %v13045_v12, 7  ;;  %v937_v32 = vsel %vm11377_vm5, 0, %v833_v49  ;;  %v11816_v12 = vrot.slane %v13050_v56, 1 }
 0x123   :  { %v1697_v34 = vpop.f32.mrf.mxu0  ;;  %v10009_v7 = vpop.f32.mrf.mxu1  ;;  %v8685_v62 = vcombine.low %v937_v32, %v937_v32  ;;  %v8686_v6 = vcombine.high %v937_v32, %v937_v32 }
 0x124   :  { %13057 = vst [vmem:[#allocation13_spill] sm:$0xff] %v11780_v27  ;;  %v11798_v15 = vadd.f32 %v10009_v7, %v9961_v59 }
 0x125   :  { %v9964_v57 = vpop.f32.mrf.mxu0  ;;  %10251 = vmatmul.mubr.bf16.gmra.mxu0 %v11004_v11  ;;  %v11782_v11 = vcombine.low %v712_v55, %v713_v1  ;;  %v2002_v21 = vpop.f32.mrf.mxu1  ;;  %v1179_v1 = vsel %vm11367_vm4, %v1135_v52, 0  ;;  %1069 = vst [vmem:[#allocation2 + $0xa0] sm:$0xf] %v8685_v62  ;;  %1070 = vst [vmem:[#allocation2 + $0xa4] sm:$0xf] %v8686_v6  ;;  %v11015_v52 = vld [vmem:[#allocation2 + $0x190] sm:$0xff]  }
 0x126   :  { %10254 = vmatprep.mubr.bf16.mxu0 %v11008_v45  ;;  %v13049_v45 = vshrl.u32 %v11762_v14, 16  ;;  %13058 = vst [vmem:[#allocation14_spill] sm:$0xff] %v11798_v15  ;;  %v11802_v58 = vadd.f32 %v2002_v21, %v1697_v34  ;;  %v11812_v21 = vcombine.low %v714_v24, %v715_v54  ;;  %v8717_v61 = vcombine.low %v1179_v1, %v1179_v1 }
 0x127   :  { %v1710_v60 = vpop.f32.mrf.mxu0  ;;  %v10012_v59 = vpop.f32.mrf.mxu1  ;;  %10299 = vmatmul.mubr.bf16.gmra.mxu1 %v11005_v16  ;;  %v8718_v46 = vcombine.high %v1179_v1, %v1179_v1  ;;  %v11011_v16 = vld [vmem:[#allocation2 + $0x188] sm:$0xff]   ;;  %v840_v24 = vor.u32 %v838_v47, %v11756_v41  ;;  %v13063_v1 = vshrl.u32 %v11778_v25, 16  ;;  %v13064_v41 = vshll.u32 %v11778_v25, 16 }
 0x128   :  { %13059 = vst [vmem:[#allocation15_spill] sm:$0xff] %v11802_v58  ;;  %v11810_v34 = vadd.f32 %v10012_v59, %v9964_v57  ;;  %10302 = vmatprep.mubr.bf16.mxu1 %v11009_v0  ;;  %v11820_v32 = vrot.slane %v13049_v45, 7  ;;  %v719_v57 = vld [vmem:[#allocation3 + $0xe4] sm:$0xf]  ;;  %v13062_v0 = vshll.u32 %v11762_v14, 16  ;;  %v11835_v45 = vcombine.low %v716_v18, %v717_v4  ;;  %v11017_v47 = vld [vmem:[#allocation2 + $0x88] sm:$0xff]  }
 0x129   :  { %v9965_v13 = vpop.f32.mrf.mxu0  ;;  %v2015_v49 = vpop.f32.mrf.mxu1  ;;  %v11833_v59 = vrot.slane %v13063_v1, 7  ;;  %1121 = vst [vmem:[#allocation2 + $0x1fc] sm:$0xf] %v719_v57  ;;  %1311 = vst [vmem:[#allocation2 + $0x2c0] sm:$0xf] %v8717_v61  ;;  %v13066_v1 = vshrl.u32 %v11713_v50, 16 }
 0x12a   :  { %13060 = vst [vmem:[#allocation16_spill] sm:$0xff] %v11810_v34  ;;  %v11825_v54 = vadd.f32 %v2015_v49, %v1710_v60  ;;  %1312 = vst [vmem:[#allocation2 + $0x2c4] sm:$0xf] %v8718_v46  ;;  %v11839_v60 = vrot.slane %v13064_v41, 1  ;;  %v11021_v46 = vld [vmem:[#allocation2 + $0x230] sm:$0xff]   ;;  %v13068_v61 = vshll.u32 %v11782_v11, 16 }
 0x12b   :  { %v1713_v7 = vpop.f32.mrf.mxu0  ;;  %v10013_v6 = vpop.f32.mrf.mxu1  ;;  %v1137_v18 = vor.u32 %v11770_v36, %v13066_v1  ;;  %v938_v50 = vsel %vm11377_vm5, 0, %v840_v24  ;;  %v13051_v1 = vshrl.u32 %v11835_v45, 16  ;;  %v721_v41 = vld [vmem:[#allocation3 + $0xec] sm:$0xf] }
 0x12c   :  { %13061 = vst [vmem:[#allocation17_spill] sm:$0xff] %v11825_v54  ;;  %v11850_v4 = vadd.f32 %v10013_v6, %v9965_v13  ;;  %v11854_v56 = vrot.slane %v13068_v61, 1  ;;  %v720_v54 = vld [vmem:[#allocation3 + $0xe8] sm:$0xf]  ;;  %v13070_v13 = vshrl.u32 %v11730_v39, 16 }
 0x12d   :  { %v9968_v55 = vpop.f32.mrf.mxu0  ;;  %10255 = vmatmul.mubr.bf16.gmra.mxu0 %v11010_v30  ;;  %v11829_v30 = vrot.slane %v13062_v0, 1  ;;  %v11845_v0 = vcombine.low %v718_v42, %v719_v57  ;;  %v2018_v34 = vpop.f32.mrf.mxu1  ;;  %1122 = vst [vmem:[#allocation2 + $0x200] sm:$0xf] %v720_v54  ;;  %v13069_v42 = vshll.u32 %v11730_v39, 16  ;;  %v11871_v27 = vcombine.low %v720_v54, %v721_v41  ;;  %1123 = vst [vmem:[#allocation2 + $0x204] sm:$0xf] %v721_v41 }
 0x12e   :  { %10258 = vmatprep.mubr.bf16.mxu0 %v11014_v53  ;;  %v13065_v53 = vshrl.u32 %v11782_v11, 16  ;;  %13067 = vst [vmem:[#allocation18_spill] sm:$0xff] %v11850_v4  ;;  %v1139_v57 = vor.u32 %v11790_v22, %v13070_v13  ;;  %v11866_v6 = vadd.f32 %v2018_v34, %v1713_v7  ;;  %v1180_v39 = vsel %vm11367_vm4, %v1137_v18, 0  ;;  %v722_v7 = vld [vmem:[#allocation3 + $0xf0] sm:$0xf] }
 0x12f   :  { %v1726_v62 = vpop.f32.mrf.mxu0  ;;  %v847_v36 = vor.u32 %v13069_v42, %v11774_v17  ;;  %v10016_v4 = vpop.f32.mrf.mxu1  ;;  %10303 = vmatmul.mubr.bf16.gmra.mxu1 %v11011_v16  ;;  %v8688_v17 = vcombine.high %v938_v50, %v938_v50  ;;  %v723_v34 = vld [vmem:[#allocation3 + $0xf4] sm:$0xf]  ;;  %v8719_v42 = vcombine.low %v1180_v39, %v1180_v39  ;;  %v8720_v13 = vcombine.high %v1180_v39, %v1180_v39 }
 0x130   :  { %v11843_v49 = vrot.slane %v13065_v53, 7  ;;  %13071 = vst [vmem:[#allocation19_spill] sm:$0xff] %v11866_v6  ;;  %v8687_v53 = vcombine.low %v938_v50, %v938_v50  ;;  %v11875_v22 = vadd.f32 %v10016_v4, %v9968_v55  ;;  %10306 = vmatprep.mubr.bf16.mxu1 %v11015_v52  ;;  %v13073_v16 = vshll.u32 %v11739_v35, 16  ;;  %1124 = vst [vmem:[#allocation2 + $0x208] sm:$0xf] %v722_v7 }
 0x131   :  { %v9969_v58 = vpop.f32.mrf.mxu0  ;;  %v2031_v24 = vpop.f32.mrf.mxu1  ;;  %v13074_v41 = vshrl.u32 %v11812_v21, 16  ;;  %1125 = vst [vmem:[#allocation2 + $0x20c] sm:$0xf] %v723_v34  ;;  %1072 = vst [vmem:[#allocation2 + $0xac] sm:$0xf] %v8688_v17  ;;  %v13077_v39 = vshll.u32 %v11762_v14, 16 }
 0x132   :  { %13072 = vst [vmem:[#allocation20_spill] sm:$0xff] %v11875_v22  ;;  %1071 = vst [vmem:[#allocation2 + $0xa8] sm:$0xf] %v8687_v53  ;;  %v854_v61 = vor.u32 %v13073_v16, %v11794_v63  ;;  %v11885_v4 = vadd.f32 %v2031_v24, %v1726_v62  ;;  %v11022_v53 = vld [vmem:[#allocation2 + $0x190] sm:$0xff]   ;;  %v13076_v63 = vshrl.u32 %v11739_v35, 16  ;;  %v11018_v62 = vld [vmem:[#allocation2 + $0x198] sm:$0xff]  }
 0x133   :  { %v1729_v15 = vpop.f32.mrf.mxu0  ;;  %v879_v50 = vrot.slane %v13074_v41, 7  ;;  %1313 = vst [vmem:[#allocation2 + $0x2c8] sm:$0xf] %v8719_v42  ;;  %1314 = vst [vmem:[#allocation2 + $0x2cc] sm:$0xf] %v8720_v13  ;;  %v861_v16 = vor.u32 %v13077_v39, %v11820_v32  ;;  %v13078_v41 = vshrl.u32 %v11762_v14, 16  ;;  %v10017_v17 = vpop.f32.mrf.mxu1  ;;  %v11916_v39 = vcombine.low %v722_v7, %v723_v34 }
 0x134   :  { %13075 = vst [vmem:[#allocation21_spill] sm:$0xff] %v11885_v4  ;;  %v13079_v42 = vshll.u32 %v11812_v21, 16  ;;  %v11904_v35 = vrot.slane %v13051_v1, 7  ;;  %v13081_v14 = vshrl.u32 %v11845_v0, 16  ;;  %v13084_v1 = vshrl.u32 %v11778_v25, 16 }
 0x135   :  { %v9972_v54 = vpop.f32.mrf.mxu0  ;;  %10259 = vmatmul.mubr.bf16.gmra.mxu0 %v11017_v47  ;;  %v1141_v47 = vor.u32 %v11816_v12, %v13076_v63  ;;  %v11896_v52 = vor.u32 %v11829_v30, %v13078_v41  ;;  %v13080_v12 = vshll.u32 %v11835_v45, 16  ;;  %v11914_v63 = vadd.f32 %v10017_v17, %v9969_v58  ;;  %v11027_v17 = vld [vmem:[#allocation2 + $0x240] sm:$0xff]  }
 0x136   :  { %10326 = vmatprep.mubr.bf16.mxu0 %v11021_v46  ;;  %v11023_v46 = vld [vmem:[#allocation2 + $0x238] sm:$0xff]   ;;  %v11900_v13 = vrot.slane %v13079_v42, 1  ;;  %v11912_v30 = vrot.slane %v13081_v14, 7  ;;  %v13083_v41 = vshll.u32 %v11778_v25, 16  ;;  %v11926_v55 = vor.u32 %v11839_v60, %v13084_v1 }
 0x137   :  { %v1742_v24 = vpop.f32.mrf.mxu0  ;;  %v11908_v32 = vrot.slane %v13080_v12, 1  ;;  %13082 = vst [vmem:[#allocation22_spill] sm:$0xff] %v11914_v63  ;;  %v2034_v12 = vpop.f32.mrf.mxu1  ;;  %v13085_v4 = vshll.u32 %v11845_v0, 16  ;;  %v13086_v58 = vshrl.u32 %v11871_v27, 16  ;;  %v13087_v34 = vshll.u32 %v11782_v11, 16  ;;  %10307 = vmatmul.mubr.bf16.gmra.mxu1 %v11018_v62 }
 0x138   :  { %v11921_v42 = vor.u32 %v13083_v41, %v11833_v59  ;;  %v13088_v25 = vshrl.u32 %v11782_v11, 16  ;;  %v11946_v1 = vadd.f32 %v2034_v12, %v1729_v15  ;;  %v1181_v63 = vsel %vm11367_vm4, %v1139_v57, 0  ;;  %v11033_v11 = vld [vmem:[#allocation6 + $0x30] sm:$0xff]   ;;  %10374 = vmatprep.mubr.bf16.mxu1 %v11022_v53 }
 0x139   :  { %v9973_v18 = vpop.f32.mrf.mxu0  ;;  %v11930_v14 = vrot.slane %v13085_v4, 1  ;;  %v11934_v7 = vrot.slane %v13086_v58, 7  ;;  %v11939_v59 = vor.u32 %v13087_v34, %v11843_v49  ;;  %v13090_v4 = vshll.u32 %v11871_v27, 16  ;;  %v10020_v49 = vpop.f32.mrf.mxu1 }
 0x13a   :  { %v11944_v60 = vor.u32 %v11854_v56, %v13088_v25  ;;  %13089 = vst [vmem:[#allocation23_spill] sm:$0xff] %v11946_v1  ;;  %v939_v58 = vsel %vm11377_vm5, 0, %v847_v36  ;;  %v8721_v25 = vcombine.low %v1181_v63, %v1181_v63  ;;  %v8722_v15 = vcombine.high %v1181_v63, %v1181_v63 }
 0x13b   :  { %v11950_v41 = vrot.slane %v13090_v4, 1  ;;  %v1745_v34 = vpop.f32.mrf.mxu0  ;;  %v8689_v22 = vcombine.low %v939_v58, %v939_v58  ;;  %v8690_v56 = vcombine.high %v939_v58, %v939_v58  ;;  %v11956_v12 = vadd.f32 %v10020_v49, %v9972_v54  ;;  %v2047_v57 = vpop.f32.mrf.mxu1 }
 0x13c   :  { %v940_v1 = vsel %vm11377_vm5, 0, %v854_v61  ;;  %v13091_v36 = vshll.u32 %v11812_v21, 16  ;;  %1315 = vst [vmem:[#allocation2 + $0x2d0] sm:$0xf] %v8721_v25  ;;  %1316 = vst [vmem:[#allocation2 + $0x2d4] sm:$0xf] %v8722_v15  ;;  %v11968_v58 = vadd.f32 %v2047_v57, %v1742_v24 }
 0x13d   :  { %v10040_v62 = vpop.f32.mrf.mxu0  ;;  %10327 = vmatmul.mubr.bf16.vlgmr.msra.gmra.mxu0 %v11023_v46  ;;  %1073 = vst [vmem:[#allocation2 + $0xb0] sm:$0xf] %v8689_v22  ;;  %1074 = vst [vmem:[#allocation2 + $0xb4] sm:$0xf] %v8690_v56  ;;  %v8691_v54 = vcombine.low %v940_v1, %v940_v1  ;;  %v8692_v53 = vcombine.high %v940_v1, %v940_v1  ;;  %v1182_v63 = vsel %vm11367_vm4, %v1141_v47, 0  ;;  %v941_v22 = vsel %vm11377_vm5, 0, %v861_v16  ;;  %v10021_v49 = vpop.f32.mrf.mxu1 }
 0x13e   :  { %v11963_v6 = vor.u32 %v13091_v36, %v879_v50  ;;  %13092 = vst [vmem:[#allocation24_spill] sm:$0xff] %v11968_v58  ;;  %v2418_v61 = vadd.f32 %v10040_v62, %v11629_v43  ;;  %v11024_v50 = vld [vmem:[#allocation2 + $0x198] sm:$0xff]   ;;  %10407 = vmatpush3.bf16.msra.mxu0 %v11698_v5  ;;  %10330 = vmatprep.mubr.bf16.mxu0 %v11027_v17  ;;  %v11030_v25 = vld [vmem:[#allocation2 + $0x248] sm:$0xff]   ;;  %v11974_v1 = vld [vmem:[#allocation6 + $0xb0] sm:$0xff]   ;;  %v1183_v5 = vsel %vm11367_vm4, %v11896_v52, 0 }
 0x13f   :  { %v8723_v46 = vcombine.low %v1182_v63, %v1182_v63  ;;  %v2289_v56 = vpop.f32.mrf.mxu0  ;;  %10408 = vmatprep.subr.bf16.mxu0 %v11033_v11  ;;  %v11041_v15 = vld [vmem:[#allocation6 + $0x28] sm:$0xff]   ;;  %1075 = vst [vmem:[#allocation2 + $0xb8] sm:$0xf] %v8691_v54  ;;  %1076 = vst [vmem:[#allocation2 + $0xbc] sm:$0xf] %v8692_v53  ;;  %v8724_v47 = vcombine.high %v1182_v63, %v1182_v63  ;;  %v8693_v24 = vcombine.low %v941_v22, %v941_v22  ;;  %v11029_v36 = vld [vmem:[#allocation2 + $0x1a0] sm:$0xff]   ;;  %v2050_v4 = vpop.f32.mrf.mxu1 }
 0x140   :  { %v8694_v43 = vcombine.high %v941_v22, %v941_v22  ;;  %v11979_v17 = vadd.f32 %v10021_v49, %v9973_v18  ;;  %v2416_v16 = vadd.f32 %v2289_v56, %v11639_v51  ;;  %v11035_v57 = vld [vmem:[#allocation2 + $0x250] sm:$0xff]   ;;  %v8725_v62 = vcombine.low %v1183_v5, %v1183_v5  ;;  %10375 = vmatmul.mubr.bf16.vlgmr.msra.gmra.mxu1 %v11024_v50 }
 0x141   :  { %1317 = vst [vmem:[#allocation2 + $0x2d8] sm:$0xf] %v8723_v46  ;;  %v8726_v26 = vcombine.high %v1183_v5, %v1183_v5  ;;  %v10041_v58 = vpop.f32.mrf.mxu0  ;;  %v13093_v54 = vshrl.u32 %v11916_v39, 16  ;;  %1318 = vst [vmem:[#allocation2 + $0x2dc] sm:$0xf] %v8724_v47  ;;  %v942_v18 = vsel %vm11377_vm5, 0, %v11921_v42  ;;  %v11997_v22 = vadd.f32 %v2050_v4, %v1745_v34  ;;  %10455 = vmatpush3.bf16.msra.mxu1 %v11726_v19 }
 0x142   :  { %1077 = vst [vmem:[#allocation2 + $0xc0] sm:$0xf] %v8693_v24  ;;  %1078 = vst [vmem:[#allocation2 + $0xc4] sm:$0xf] %v8694_v43  ;;  %v13094_v51 = vshrl.u32 %v11812_v21, 16  ;;  %v13095_v63 = vshll.u32 %v11835_v45, 16  ;;  %v2419_v49 = vadd.f32 %v10041_v58, %v11643_v3  ;;  %10409 = vmatpush3.bf16.msra.mxu0 %v11033_v11  ;;  %v8695_v47 = vcombine.low %v942_v18, %v942_v18  ;;  %v10088_v24 = vpop.f32.mrf.mxu1 }
 0x143   :  { %v11984_v53 = vrot.slane %v13093_v54, 7  ;;  %v12000_v56 = vld [vmem:[#allocation6 + $0x20] sm:$0xff]   ;;  %1319 = vst [vmem:[#allocation2 + $0x2e0] sm:$0xf] %v8725_v62  ;;  %1320 = vst [vmem:[#allocation2 + $0x2e4] sm:$0xf] %v8726_v26  ;;  %v8696_v42 = vcombine.high %v942_v18, %v942_v18  ;;  %v2292_v21 = vpop.f32.mrf.mxu0  ;;  %10410 = vmatprep.subr.bf16.mxu0 %v11041_v15  ;;  %v12019_v4 = vadd.f32 %v10088_v24, %v2418_v61  ;;  %10378 = vmatprep.mubr.bf16.mxu1 %v11029_v36 }
 0x144   :  { %v1149_v52 = vor.u32 %v11900_v13, %v13094_v51  ;;  %v11995_v46 = vor.u32 %v13095_v63, %v11904_v35  ;;  %v13096_v13 = vshll.u32 %v11916_v39, 16  ;;  %v1184_v35 = vsel %vm11367_vm4, %v11926_v55, 0  ;;  %1079 = vst [vmem:[#allocation2 + $0xc8] sm:$0xf] %v8695_v47  ;;  %10456 = vmatprep.subr.bf16.mxu1 %v11974_v1  ;;  %v11032_v54 = vld [vmem:[#allocation2 + $0x1a8] sm:$0xff]   ;;  %v11038_v63 = vld [vmem:[#allocation2 + $0x258] sm:$0xff]  }
 0x145   :  { %v13097_v3 = vshrl.u32 %v11835_v45, 16  ;;  %v13098_v26 = vshll.u32 %v11845_v0, 16  ;;  %v2417_v58 = vadd.f32 %v2292_v21, %v11652_v10  ;;  %1080 = vst [vmem:[#allocation2 + $0xcc] sm:$0xf] %v8696_v42  ;;  %v8727_v55 = vcombine.low %v1184_v35, %v1184_v35  ;;  %v10044_v50 = vpop.f32.mrf.mxu0  ;;  %10331 = vmatmul.mubr.bf16.gmra.mxu0 %v11030_v25  ;;  %v11057_v47 = vld [vmem:[#allocation6 + $0x18] sm:$0xff]   ;;  %10457 = vmatpush3.bf16.msra.mxu1 %v11974_v1 }
 0x146   :  { %v12004_v43 = vrot.slane %v13096_v13, 1  ;;  %v943_v45 = vsel %vm11377_vm5, 0, %v11939_v59  ;;  %v8728_v61 = vcombine.high %v1184_v35, %v1184_v35  ;;  %v1185_v10 = vsel %vm11367_vm4, %v11944_v60, 0  ;;  %10334 = vmatprep.mubr.bf16.mxu0 %v11035_v57  ;;  %10411 = vmatpush3.bf16.msra.mxu0 %v11041_v15 }
 0x147   :  { %v12012_v34 = vor.u32 %v11908_v32, %v13097_v3  ;;  %v12017_v11 = vor.u32 %v13098_v26, %v11912_v30  ;;  %v2675_v32 = vpop.f32.mrf.mxu1  ;;  %v11042_v30 = vld [vmem:[#allocation6 + $0xa8] sm:$0xff]   ;;  %v8697_v5 = vcombine.low %v943_v45, %v943_v45  ;;  %v8698_v62 = vcombine.high %v943_v45, %v943_v45  ;;  %1321 = vst [vmem:[#allocation2 + $0x2e8] sm:$0xf] %v8727_v55  ;;  %v2305_v51 = vpop.f32.mrf.mxu0  ;;  %v12043_v3 = vld [vmem:[#allocation6 + $0xa0] sm:$0xff]  }
 0x148   :  { %v12030_v19 = vadd.f32 %v2675_v32, %v2416_v16  ;;  %v2422_v36 = vadd.f32 %v10044_v50, %v11654_v2  ;;  %v8729_v59 = vcombine.low %v1185_v10, %v1185_v10  ;;  %v944_v25 = vsel %vm11377_vm5, 0, %v11963_v6  ;;  %10412 = vmatprep.subr.bf16.mxu0 %v12000_v56  ;;  %1322 = vst [vmem:[#allocation2 + $0x2ec] sm:$0xf] %v8728_v61  ;;  %v11037_v6 = vld [vmem:[#allocation2 + $0x1b0] sm:$0xff]   ;;  %v11043_v32 = vld [vmem:[#allocation2 + $0x260] sm:$0xff]  }
 0x149   :  { %v10089_v18 = vpop.f32.mrf.mxu1  ;;  %1081 = vst [vmem:[#allocation2 + $0xd0] sm:$0xf] %v8697_v5  ;;  %1082 = vst [vmem:[#allocation2 + $0xd4] sm:$0xf] %v8698_v62  ;;  %v8730_v60 = vcombine.high %v1185_v10, %v1185_v10  ;;  %v8699_v2 = vcombine.low %v944_v25, %v944_v25  ;;  %v8700_v16 = vcombine.high %v944_v25, %v944_v25  ;;  %v1186_v15 = vsel %vm11367_vm4, %v1149_v52, 0  ;;  %v10045_v35 = vpop.f32.mrf.mxu0 }
 0x14a   :  { %v12039_v57 = vadd.f32 %v10089_v18, %v2419_v49  ;;  %v2420_v42 = vadd.f32 %v2305_v51, %v11660_v44  ;;  %1323 = vst [vmem:[#allocation2 + $0x2f0] sm:$0xf] %v8729_v59  ;;  %v8731_v24 = vcombine.low %v1186_v15, %v1186_v15  ;;  %v8732_v21 = vcombine.high %v1186_v15, %v1186_v15  ;;  %v11040_v51 = vld [vmem:[#allocation2 + $0x1b8] sm:$0xff]  }
 0x14b   :  { %v2678_v13 = vpop.f32.mrf.mxu1  ;;  %10458 = vmatprep.subr.bf16.mxu1 %v11042_v30  ;;  %1324 = vst [vmem:[#allocation2 + $0x2f4] sm:$0xf] %v8730_v60  ;;  %1083 = vst [vmem:[#allocation2 + $0xd8] sm:$0xf] %v8699_v2  ;;  %v945_v52 = vsel %vm11377_vm5, 0, %v11995_v46  ;;  %v13099_v44 = vshrl.u32 %v11845_v0, 16  ;;  %v2423_v45 = vadd.f32 %v10045_v35, %v11666_v40  ;;  %10413 = vmatpush3.bf16.msra.mxu0 %v12000_v56  ;;  %v2308_v0 = vpop.f32.mrf.mxu0 }
 0x14c   :  { %1084 = vst [vmem:[#allocation2 + $0xdc] sm:$0xf] %v8700_v16  ;;  %v13100_v49 = vshll.u32 %v11871_v27, 16  ;;  %v12054_v55 = vadd.f32 %v2678_v13, %v2417_v58  ;;  %1325 = vst [vmem:[#allocation2 + $0x2f8] sm:$0xf] %v8731_v24  ;;  %v8701_v50 = vcombine.low %v945_v52, %v945_v52  ;;  %v8702_v61 = vcombine.high %v945_v52, %v945_v52  ;;  %v11046_v16 = vld [vmem:[#allocation2 + $0x268] sm:$0xff]  }
 0x14d   :  { %v1153_v1 = vor.u32 %v11930_v14, %v13099_v44  ;;  %1326 = vst [vmem:[#allocation2 + $0x2fc] sm:$0xf] %v8732_v21  ;;  %v10092_v46 = vpop.f32.mrf.mxu1  ;;  %10379 = vmatmul.mubr.bf16.gmra.mxu1 %v11032_v54  ;;  %10414 = vmatprep.subr.bf16.mxu0 %v11057_v47  ;;  %v11065_v14 = vld [vmem:[#allocation6 + $0x10] sm:$0xff]   ;;  %v13101_v58 = vshrl.u32 %v11871_v27, 16  ;;  %v13102_v56 = vshll.u32 %v11916_v39, 16  ;;  %v13103_v62 = vshrl.u32 %v11916_v39, 16 }
 0x14e   :  { %v903_v26 = vor.u32 %v13100_v49, %v11934_v7  ;;  %v1187_v7 = vsel %vm11367_vm4, %v12012_v34, 0  ;;  %v12072_v54 = vadd.f32 %v10092_v46, %v2422_v36  ;;  %v2421_v59 = vadd.f32 %v2308_v0, %v11672_v37  ;;  %10382 = vmatprep.mubr.bf16.mxu1 %v11037_v6  ;;  %10459 = vmatpush3.bf16.msra.mxu1 %v11042_v30  ;;  %v11058_v39 = vld [vmem:[#allocation6 + $0x98] sm:$0xff]   ;;  %v11073_v15 = vld [vmem:[#allocation6 + $0x8] sm:$0xff]   ;;  %v11045_v13 = vld [vmem:[#allocation2 + $0x1c0] sm:$0xff]  }
 0x14f   :  { %v1155_v40 = vor.u32 %v11950_v41, %v13101_v58  ;;  %v910_v5 = vor.u32 %v13102_v56, %v11984_v53  ;;  %v12070_v10 = vor.u32 %v12004_v43, %v13103_v62  ;;  %1085 = vst [vmem:[#allocation2 + $0xe0] sm:$0xf] %v8701_v50  ;;  %1086 = vst [vmem:[#allocation2 + $0xe4] sm:$0xf] %v8702_v61  ;;  %v946_v41 = vsel %vm11377_vm5, 0, %v12017_v11  ;;  %v2691_v34 = vpop.f32.mrf.mxu1  ;;  %v10048_v53 = vpop.f32.mrf.mxu0  ;;  %v11066_v49 = vld [vmem:[#allocation6 + $0x90] sm:$0xff]  }
 0x150   :  { %v8733_v27 = vcombine.low %v1187_v7, %v1187_v7  ;;  %10335 = vmatmul.mubr.bf16.gmra.mxu0 %v11038_v63  ;;  %10460 = vmatprep.subr.bf16.mxu1 %v12043_v3  ;;  %v8734_v43 = vcombine.high %v1187_v7, %v1187_v7  ;;  %v8703_v36 = vcombine.low %v946_v41, %v946_v41  ;;  %v1188_v37 = vsel %vm11367_vm4, %v1153_v1, 0  ;;  %v11081_v0 = vld [vmem:[#allocation6] sm:$0xff]  }
 0x151   :  { %v8704_v25 = vcombine.high %v946_v41, %v946_v41  ;;  %v12081_v30 = vadd.f32 %v2691_v34, %v2420_v42  ;;  %v2426_v18 = vadd.f32 %v10048_v53, %v11680_v31  ;;  %10338 = vmatprep.mubr.bf16.mxu0 %v11043_v32  ;;  %10415 = vmatpush3.bf16.msra.mxu0 %v11057_v47  ;;  %v947_v63 = vsel %vm11377_vm5, 0, %v903_v26  ;;  %v10093_v60 = vpop.f32.mrf.mxu1  ;;  %v2321_v2 = vpop.f32.mrf.mxu0  ;;  %v11051_v32 = vld [vmem:[#allocation2 + $0x270] sm:$0xff]   ;;  %v11054_v34 = vld [vmem:[#allocation2 + $0x278] sm:$0xff]   ;;  %v12106_v53 = vld [vmem:[#allocation6 + $0xf8] sm:$0xff]  }
 0x152   :  { %1327 = vst [vmem:[#allocation2 + $0x300] sm:$0xf] %v8733_v27  ;;  %v8735_v11 = vcombine.low %v1188_v37, %v1188_v37  ;;  %10416 = vmatprep.subr.bf16.mxu0 %v11065_v14  ;;  %1328 = vst [vmem:[#allocation2 + $0x304] sm:$0xf] %v8734_v43  ;;  %v8736_v42 = vcombine.high %v1188_v37, %v1188_v37  ;;  %v8705_v6 = vcombine.low %v947_v63, %v947_v63 }
 0x153   :  { %1087 = vst [vmem:[#allocation2 + $0xe8] sm:$0xf] %v8703_v36  ;;  %1088 = vst [vmem:[#allocation2 + $0xec] sm:$0xf] %v8704_v25  ;;  %v8706_v24 = vcombine.high %v947_v63, %v947_v63  ;;  %v1189_v31 = vsel %vm11367_vm4, %v1155_v40, 0  ;;  %v12088_v47 = vadd.f32 %v10093_v60, %v2423_v45  ;;  %v2424_v21 = vadd.f32 %v2321_v2, %v11690_v48  ;;  %v2694_v44 = vpop.f32.mrf.mxu1  ;;  %v10049_v1 = vpop.f32.mrf.mxu0  ;;  %v11053_v36 = vld [vmem:[#allocation2 + $0x1d0] sm:$0xff]  }
 0x154   :  { %10461 = vmatpush3.bf16.msra.mxu1 %v12043_v3  ;;  %1329 = vst [vmem:[#allocation2 + $0x308] sm:$0xf] %v8735_v11  ;;  %v8737_v35 = vcombine.low %v1189_v31, %v1189_v31  ;;  %v8738_v52 = vcombine.high %v1189_v31, %v1189_v31  ;;  %1330 = vst [vmem:[#allocation2 + $0x30c] sm:$0xf] %v8736_v42  ;;  %v948_v26 = vsel %vm11377_vm5, 0, %v910_v5  ;;  %v1190_v7 = vsel %vm11367_vm4, %v12070_v10, 0 }
 0x155   :  { %10462 = vmatprep.subr.bf16.mxu1 %v11058_v39  ;;  %1089 = vst [vmem:[#allocation2 + $0xf0] sm:$0xf] %v8705_v6  ;;  %1090 = vst [vmem:[#allocation2 + $0xf4] sm:$0xf] %v8706_v24  ;;  %v12094_v45 = vadd.f32 %v2694_v44, %v2421_v59  ;;  %v2427_v48 = vadd.f32 %v10049_v1, %v11700_v9  ;;  %10417 = vmatpush3.bf16.msra.mxu0 %v11065_v14  ;;  %v10096_v61 = vpop.f32.mrf.mxu1  ;;  %v2324_v46 = vpop.f32.mrf.mxu0  ;;  %v11074_v5 = vld [vmem:[#allocation6 + $0x88] sm:$0xff]   ;;  %v11048_v10 = vld [vmem:[#allocation2 + $0x1c8] sm:$0xff]  }
 0x156   :  { %1331 = vst [vmem:[#allocation2 + $0x310] sm:$0xf] %v8737_v35  ;;  %1332 = vst [vmem:[#allocation2 + $0x314] sm:$0xf] %v8738_v52  ;;  %v8707_v3 = vcombine.low %v948_v26, %v948_v26  ;;  %v8708_v50 = vcombine.high %v948_v26, %v948_v26  ;;  %10383 = vmatmul.mubr.bf16.gmra.mxu1 %v11040_v51  ;;  %10418 = vmatprep.subr.bf16.mxu0 %v11073_v15  ;;  %v11059_v11 = vld [vmem:[#allocation2 + $0x280] sm:$0xff]   ;;  %v12118_v42 = vld [vmem:[#allocation6 + $0x138] sm:$0xff]  }
 0x157   :  { %v12100_v58 = vadd.f32 %v10096_v61, %v2426_v18  ;;  %v2425_v40 = vadd.f32 %v2324_v46, %v11708_v20  ;;  %10386 = vmatprep.mubr.bf16.mxu1 %v11045_v13  ;;  %v8739_v9 = vcombine.low %v1190_v7, %v1190_v7  ;;  %v2707_v14 = vpop.f32.mrf.mxu1  ;;  %v10052_v56 = vpop.f32.mrf.mxu0  ;;  %v8740_v62 = vcombine.high %v1190_v7, %v1190_v7  ;;  %v13104_v6 = vld [vmem:[#allocation12_spill] sm:$0xff]  ;;  %v13105_v52 = vld [vmem:[#allocation13_spill] sm:$0xff]  ;;  %v11061_v44 = vld [vmem:[#allocation2 + $0x1e0] sm:$0xff]  }
 0x158   :  { %10463 = vmatpush3.bf16.msra.mxu1 %v11058_v39  ;;  %1091 = vst [vmem:[#allocation2 + $0xf8] sm:$0xf] %v8707_v3  ;;  %1092 = vst [vmem:[#allocation2 + $0xfc] sm:$0xf] %v8708_v50  ;;  %10339 = vmatmul.mubr.bf16.gmra.mxu0 %v11046_v16  ;;  %v12103_v59 = vadd.f32 %v2707_v14, %v2424_v21  ;;  %v2430_v27 = vadd.f32 %v10052_v56, %v11722_v8  ;;  %v11082_v8 = vld [vmem:[#allocation6 + $0x80] sm:$0xff]   ;;  %v11056_v21 = vld [vmem:[#allocation2 + $0x1d8] sm:$0xff]  }
 0x159   :  { %10464 = vmatprep.subr.bf16.mxu1 %v11066_v49  ;;  %10342 = vmatprep.mubr.bf16.mxu0 %v11051_v32  ;;  %1333 = vst [vmem:[#allocation2 + $0x318] sm:$0xf] %v8739_v9  ;;  %v10097_v20 = vpop.f32.mrf.mxu1  ;;  %v2337_v41 = vpop.f32.mrf.mxu0  ;;  %1334 = vst [vmem:[#allocation2 + $0x31c] sm:$0xf] %v8740_v62  ;;  %v11062_v26 = vld [vmem:[#allocation2 + $0x288] sm:$0xff]   ;;  %v13106_v32 = vld [vmem:[#allocation14_spill] sm:$0xff] }
 0x15a   :  { %10419 = vmatpush3.bf16.msra.mxu0 %v11073_v15  ;;  %v12108_v39 = vadd.f32 %v10097_v20, %v2427_v48  ;;  %v2428_v43 = vadd.f32 %v2337_v41, %v11732_v38  ;;  %v11067_v50 = vld [vmem:[#allocation2 + $0x290] sm:$0xff]   ;;  %v13107_v7 = vld [vmem:[#allocation15_spill] sm:$0xff] }
 0x15b   :  { %10420 = vmatprep.subr.bf16.mxu0 %v11081_v0  ;;  %v2710_v25 = vpop.f32.mrf.mxu1  ;;  %v10053_v37 = vpop.f32.mrf.mxu0 }
 0x15c   :  { %10465 = vmatpush3.bf16.msra.mxu1 %v11066_v49  ;;  %v12111_v18 = vadd.f32 %v2710_v25, %v2425_v40  ;;  %v2431_v51 = vadd.f32 %v10053_v37, %v11743_v28 }
 0x15d   :  { %10466 = vmatprep.subr.bf16.mxu1 %v11074_v5  ;;  %v10100_v63 = vpop.f32.mrf.mxu1  ;;  %v2340_v60 = vpop.f32.mrf.mxu0 }
 0x15e   :  { %10421 = vmatpush3.bf16.msra.mxu0 %v11081_v0  ;;  %10387 = vmatmul.mubr.bf16.gmra.mxu1 %v11048_v10  ;;  %v12115_v2 = vadd.f32 %v10100_v63, %v2430_v27  ;;  %v2429_v38 = vadd.f32 %v2340_v60, %v11752_v29  ;;  %v11064_v10 = vld [vmem:[#allocation2 + $0x1e8] sm:$0xff]   ;;  %v11075_v60 = vld [vmem:[#allocation2 + $0x2a0] sm:$0xff]  }
 0x15f   :  { %10502 = vmatprep.subr.bf16.mxu0 %v12106_v53  ;;  %10390 = vmatprep.mubr.bf16.mxu1 %v11053_v36  ;;  %v2723_v16 = vpop.f32.mrf.mxu1  ;;  %v10056_v15 = vpop.f32.mrf.mxu0  ;;  %v11069_v36 = vld [vmem:[#allocation2 + $0x1f0] sm:$0xff]  }
 0x160   :  { %10467 = vmatpush3.bf16.msra.mxu1 %v11074_v5  ;;  %10343 = vmatmul.mubr.bf16.gmra.mxu0 %v11054_v34  ;;  %v12120_v28 = vadd.f32 %v2723_v16, %v2428_v43  ;;  %v2434_v24 = vadd.f32 %v10056_v15, %v13104_v6  ;;  %v13108_v5 = vld [vmem:[#allocation16_spill] sm:$0xff]  ;;  %v13109_v34 = vld [vmem:[#allocation17_spill] sm:$0xff]  ;;  %v13111_v6 = vld [vmem:[#allocation19_spill] sm:$0xff] }
 0x161   :  { %10468 = vmatprep.subr.bf16.mxu1 %v11082_v8  ;;  %10346 = vmatprep.mubr.bf16.mxu0 %v11059_v11  ;;  %v10101_v31 = vpop.f32.mrf.mxu1  ;;  %v2353_v13 = vpop.f32.mrf.mxu0  ;;  %v13110_v11 = vld [vmem:[#allocation18_spill] sm:$0xff] }
 0x162   :  { %v12123_v35 = vadd.f32 %v10101_v31, %v2431_v51  ;;  %v2432_v29 = vadd.f32 %v2353_v13, %v13105_v52  ;;  %v13112_v52 = vld [vmem:[#allocation20_spill] sm:$0xff] }
 0x163   :  { %v2726_v1 = vpop.f32.mrf.mxu1  ;;  %v10057_v49 = vpop.f32.mrf.mxu0 }
 0x164   :  { %10469 = vmatpush3.bf16.msra.mxu1 %v11082_v8  ;;  %v12127_v48 = vadd.f32 %v2726_v1, %v2429_v38  ;;  %v2435_v3 = vadd.f32 %v10057_v49, %v13106_v32  ;;  %v11070_v8 = vld [vmem:[#allocation2 + $0x298] sm:$0xff]  }
 0x165   :  { %10550 = vmatprep.subr.bf16.mxu1 %v12118_v42  ;;  %v10104_v61 = vpop.f32.mrf.mxu1  ;;  %v2356_v46 = vpop.f32.mrf.mxu0  ;;  %v11072_v1 = vld [vmem:[#allocation2 + $0x1f8] sm:$0xff]  }
 0x166   :  { %10391 = vmatmul.mubr.bf16.gmra.mxu1 %v11056_v21  ;;  %v12130_v0 = vadd.f32 %v10104_v61, %v2434_v24  ;;  %v2433_v40 = vadd.f32 %v2356_v46, %v13107_v7  ;;  %v13113_v32 = vld [vmem:[#allocation21_spill] sm:$0xff]  ;;  %v11078_v7 = vld [vmem:[#allocation2 + $0x2a8] sm:$0xff]  }
 0x167   :  { %10394 = vmatprep.mubr.bf16.mxu1 %v11061_v44  ;;  %v2739_v9 = vpop.f32.mrf.mxu1  ;;  %v10060_v14 = vpop.f32.mrf.mxu0 }
 0x168   :  { %10347 = vmatmul.mubr.bf16.gmra.mxu0 %v11062_v26  ;;  %v12133_v56 = vadd.f32 %v2739_v9, %v2432_v29  ;;  %v2438_v62 = vadd.f32 %v10060_v14, %v13108_v5  ;;  %v13114_v9 = vld [vmem:[#allocation22_spill] sm:$0xff] }
 0x169   :  { %10350 = vmatprep.mubr.bf16.mxu0 %v11067_v50  ;;  %v10105_v27 = vpop.f32.mrf.mxu1  ;;  %v2369_v20 = vpop.f32.mrf.mxu0  ;;  %v11077_v50 = vld [vmem:[#allocation2 + $0x200] sm:$0xff]  }
 0x16a   :  { %v12136_v41 = vadd.f32 %v10105_v27, %v2435_v3  ;;  %v2436_v43 = vadd.f32 %v2369_v20, %v13109_v34  ;;  %v11083_v5 = vld [vmem:[#allocation2 + $0x80] sm:$0xff]   ;;  %v13115_v20 = vld [vmem:[#allocation23_spill] sm:$0xff] }
 0x16b   :  { %v2742_v25 = vpop.f32.mrf.mxu1  ;;  %v10061_v37 = vpop.f32.mrf.mxu0 }
 0x16c   :  { %v12139_v51 = vadd.f32 %v2742_v25, %v2433_v40  ;;  %v2439_v63 = vadd.f32 %v10061_v37, %v13110_v11  ;;  %v11080_v11 = vld [vmem:[#allocation2 + $0x208] sm:$0xff]  }
 0x16d   :  { %v10108_v38 = vpop.f32.mrf.mxu1  ;;  %v2372_v16 = vpop.f32.mrf.mxu0 }
 0x16e   :  { %10395 = vmatmul.mubr.bf16.gmra.mxu1 %v11064_v10  ;;  %v12142_v15 = vadd.f32 %v10108_v38, %v2438_v62  ;;  %v2437_v24 = vadd.f32 %v2372_v16, %v13111_v6  ;;  %v13116_v38 = vld [vmem:[#allocation24_spill] sm:$0xff]  ;;  %v11084_v6 = vld [vmem:[#allocation2 + $0x2a0] sm:$0xff]  }
 0x16f   :  { %10398 = vmatprep.mubr.bf16.mxu1 %v11069_v36  ;;  %v2755_v31 = vpop.f32.mrf.mxu1  ;;  %v10064_v21 = vpop.f32.mrf.mxu0 }
 0x170   :  { %10351 = vmatmul.mubr.bf16.gmra.mxu0 %v11070_v8  ;;  %v12145_v13 = vadd.f32 %v2755_v31, %v2436_v43  ;;  %v2442_v29 = vadd.f32 %v10064_v21, %v13112_v52  ;;  %v11085_v21 = vld [vmem:[#allocation2 + $0x88] sm:$0xff]  }
 0x171   :  { %10354 = vmatprep.mubr.bf16.mxu0 %v11075_v60  ;;  %v10109_v44 = vpop.f32.mrf.mxu1  ;;  %v2385_v49 = vpop.f32.mrf.mxu0 }
 0x172   :  { %v12148_v26 = vadd.f32 %v10109_v44, %v2439_v63  ;;  %v2440_v3 = vadd.f32 %v2385_v49, %v13113_v32  ;;  %v11089_v44 = vld [vmem:[#allocation2 + $0x90] sm:$0xff]   ;;  %v11093_v49 = vld [vmem:[#allocation6 + $0xf0] sm:$0xff]  }
 0x173   :  { %v2758_v61 = vpop.f32.mrf.mxu1  ;;  %v10065_v46 = vpop.f32.mrf.mxu0 }
 0x174   :  { %v12151_v40 = vadd.f32 %v2758_v61, %v2437_v24  ;;  %v2443_v14 = vadd.f32 %v10065_v46, %v13114_v9  ;;  %v11086_v46 = vld [vmem:[#allocation2 + $0x2a8] sm:$0xff]  }
 0x175   :  { %v10112_v62 = vpop.f32.mrf.mxu1  ;;  %v2388_v27 = vpop.f32.mrf.mxu0 }
 0x176   :  { %10399 = vmatmul.mubr.bf16.gmra.mxu1 %v11072_v1  ;;  %v12154_v10 = vadd.f32 %v10112_v62, %v2442_v29  ;;  %v2441_v34 = vadd.f32 %v2388_v27, %v13115_v20  ;;  %v11099_v62 = vld [vmem:[#allocation6 + $0xe8] sm:$0xff]  }
 0x177   :  { %10402 = vmatprep.mubr.bf16.mxu1 %v11077_v50  ;;  %v2771_v43 = vpop.f32.mrf.mxu1  ;;  %v10068_v36 = vpop.f32.mrf.mxu0  ;;  %v11091_v20 = vld [vmem:[#allocation2 + $0x98] sm:$0xff]  }
 0x178   :  { %10355 = vmatmul.mubr.bf16.gmra.mxu0 %v11078_v7  ;;  %v12157_v25 = vadd.f32 %v2771_v43, %v2440_v3  ;;  %v2446_v37 = vadd.f32 %v10068_v36, %v11956_v12  ;;  %v11094_v36 = vld [vmem:[#allocation6 + $0x130] sm:$0xff]  }
 0x179   :  { %10422 = vmatprep.mubr.bf16.mxu0 %v11083_v5  ;;  %v10113_v8 = vpop.f32.mrf.mxu1  ;;  %v2401_v63 = vpop.f32.mrf.mxu0 }
 0x17a   :  { %v12160_v60 = vadd.f32 %v10113_v8, %v2443_v14  ;;  %v2444_v16 = vadd.f32 %v2401_v63, %v13116_v38  ;;  %v11105_v63 = vld [vmem:[#allocation6 + $0xe0] sm:$0xff]  }
 0x17b   :  { %v2774_v24 = vpop.f32.mrf.mxu1  ;;  %v10069_v31 = vpop.f32.mrf.mxu0 }
 0x17c   :  { %v12163_v52 = vadd.f32 %v2774_v24, %v2441_v34  ;;  %v2447_v29 = vadd.f32 %v10069_v31, %v11979_v17  ;;  %v11090_v17 = vld [vmem:[#allocation2 + $0x2b0] sm:$0xff]   ;;  %v11092_v24 = vld [vmem:[#allocation2 + $0x2b8] sm:$0xff]  }
 0x17d   :  { %v10116_v1 = vpop.f32.mrf.mxu1  ;;  %v2404_v12 = vpop.f32.mrf.mxu0 }
 0x17e   :  { %10403 = vmatmul.mubr.bf16.gmra.mxu1 %v11080_v11  ;;  %v12166_v32 = vadd.f32 %v10116_v1, %v2446_v37  ;;  %v2445_v3 = vadd.f32 %v2404_v12, %v11997_v22 }
 0x17f   :  { %10470 = vmatprep.mubr.bf16.mxu1 %v11084_v6  ;;  %v2787_v50 = vpop.f32.mrf.mxu1  ;;  %v10136_v61 = vpop.f32.mrf.mxu0 }
 0x180   :  { %10423 = vmatmul.mubr.bf16.vlgmr.msra.gmra.mxu0 %v11085_v21  ;;  %v12169_v7 = vadd.f32 %v2787_v50, %v2444_v16  ;;  %v3190_v9 = vadd.f32 %v10136_v61, %v12019_v4  ;;  %v11106_v61 = vld [vmem:[#allocation6 + $0x120] sm:$0xff]  }
 0x181   :  { %10503 = vmatpush3.bf16.msra.mxu0 %v12106_v53  ;;  %10426 = vmatprep.mubr.bf16.mxu0 %v11089_v44  ;;  %v10117_v14 = vpop.f32.mrf.mxu1  ;;  %v3061_v5 = vpop.f32.mrf.mxu0  ;;  %v11095_v53 = vld [vmem:[#allocation2 + $0xa0] sm:$0xff]  }
 0x182   :  { %10504 = vmatprep.subr.bf16.mxu0 %v11093_v49  ;;  %v12173_v27 = vadd.f32 %v10117_v14, %v2447_v29  ;;  %v3188_v22 = vadd.f32 %v3061_v5, %v12030_v19  ;;  %v11096_v29 = vld [vmem:[#allocation2 + $0x2c0] sm:$0xff]  }
 0x183   :  { %v2790_v34 = vpop.f32.mrf.mxu1  ;;  %v10137_v43 = vpop.f32.mrf.mxu0  ;;  %v11117_v5 = vld [vmem:[#allocation6 + $0xd0] sm:$0xff]  }
 0x184   :  { %v12176_v37 = vadd.f32 %v2790_v34, %v2445_v3  ;;  %v3191_v4 = vadd.f32 %v10137_v43, %v12039_v57  ;;  %v11100_v57 = vld [vmem:[#allocation6 + $0x128] sm:$0xff]   ;;  %v11098_v34 = vld [vmem:[#allocation2 + $0x2c8] sm:$0xff]  }
 0x185   :  { %10505 = vmatpush3.bf16.msra.mxu0 %v11093_v49  ;;  %v10184_v8 = vpop.f32.mrf.mxu1  ;;  %v3064_v11 = vpop.f32.mrf.mxu0  ;;  %v11097_v49 = vld [vmem:[#allocation2 + $0xa8] sm:$0xff]  }
 0x186   :  { %10471 = vmatmul.mubr.bf16.vlgmr.msra.gmra.mxu1 %v11086_v46  ;;  %10506 = vmatprep.subr.bf16.mxu0 %v11099_v62  ;;  %v12179_v38 = vadd.f32 %v10184_v8, %v3190_v9  ;;  %v3189_v19 = vadd.f32 %v3064_v11, %v12054_v55  ;;  %v11101_v9 = vld [vmem:[#allocation2 + $0xb0] sm:$0xff]   ;;  %v11112_v43 = vld [vmem:[#allocation6 + $0x118] sm:$0xff]   ;;  %v11123_v11 = vld [vmem:[#allocation6 + $0xc8] sm:$0xff]  }
 0x187   :  { %10551 = vmatpush3.bf16.msra.mxu1 %v12118_v42  ;;  %10474 = vmatprep.mubr.bf16.mxu1 %v11090_v17  ;;  %v3447_v16 = vpop.f32.mrf.mxu1  ;;  %v10140_v6 = vpop.f32.mrf.mxu0  ;;  %v11111_v42 = vld [vmem:[#allocation6 + $0xd8] sm:$0xff]  }
 0x188   :  { %10427 = vmatmul.mubr.bf16.gmra.mxu0 %v11091_v20  ;;  %10552 = vmatprep.subr.bf16.mxu1 %v11094_v36  ;;  %v12183_v31 = vadd.f32 %v3447_v16, %v3188_v22  ;;  %v3194_v21 = vadd.f32 %v10140_v6, %v12072_v54 }
 0x189   :  { %10430 = vmatprep.mubr.bf16.mxu0 %v11095_v53  ;;  %10507 = vmatpush3.bf16.msra.mxu0 %v11099_v62  ;;  %v10185_v44 = vpop.f32.mrf.mxu1  ;;  %v3077_v1 = vpop.f32.mrf.mxu0 }
 0x18a   :  { %10508 = vmatprep.subr.bf16.mxu0 %v11105_v63  ;;  %v12186_v12 = vadd.f32 %v10185_v44, %v3191_v4  ;;  %v3192_v55 = vadd.f32 %v3077_v1, %v12081_v30  ;;  %v11102_v4 = vld [vmem:[#allocation2 + $0x2d0] sm:$0xff]  }
 0x18b   :  { %10553 = vmatpush3.bf16.msra.mxu1 %v11094_v36  ;;  %v3450_v3 = vpop.f32.mrf.mxu1  ;;  %v10141_v50 = vpop.f32.mrf.mxu0  ;;  %v11129_v1 = vld [vmem:[#allocation6 + $0xc0] sm:$0xff]  }
 0x18c   :  { %10554 = vmatprep.subr.bf16.mxu1 %v11100_v57  ;;  %v12189_v46 = vadd.f32 %v3450_v3, %v3189_v19  ;;  %v3195_v54 = vadd.f32 %v10141_v50, %v12088_v47  ;;  %v11103_v19 = vld [vmem:[#allocation2 + $0xb8] sm:$0xff]  }
 0x18d   :  { %10509 = vmatpush3.bf16.msra.mxu0 %v11105_v63  ;;  %v10188_v17 = vpop.f32.mrf.mxu1  ;;  %v3080_v14 = vpop.f32.mrf.mxu0  ;;  %v11104_v3 = vld [vmem:[#allocation2 + $0x2d8] sm:$0xff]  }
 0x18e   :  { %10475 = vmatmul.mubr.bf16.gmra.mxu1 %v11092_v24  ;;  %10510 = vmatprep.subr.bf16.mxu0 %v11111_v42  ;;  %v12192_v62 = vadd.f32 %v10188_v17, %v3194_v21  ;;  %v3193_v30 = vadd.f32 %v3080_v14, %v12094_v45  ;;  %v11118_v24 = vld [vmem:[#allocation6 + $0x110] sm:$0xff]   ;;  %v11124_v50 = vld [vmem:[#allocation6 + $0x108] sm:$0xff]  }
 0x18f   :  { %10478 = vmatprep.mubr.bf16.mxu1 %v11096_v29  ;;  %10555 = vmatpush3.bf16.msra.mxu1 %v11100_v57  ;;  %v3463_v22 = vpop.f32.mrf.mxu1  ;;  %v10144_v20 = vpop.f32.mrf.mxu0  ;;  %v11107_v21 = vld [vmem:[#allocation2 + $0xc0] sm:$0xff]  }
 0x190   :  { %10431 = vmatmul.mubr.bf16.gmra.mxu0 %v11097_v49  ;;  %10556 = vmatprep.subr.bf16.mxu1 %v11106_v61  ;;  %v12195_v47 = vadd.f32 %v3463_v22, %v3192_v55  ;;  %v3198_v36 = vadd.f32 %v10144_v20, %v12100_v58  ;;  %v11108_v20 = vld [vmem:[#allocation2 + $0x2e0] sm:$0xff]  }
 0x191   :  { %10434 = vmatprep.mubr.bf16.mxu0 %v11101_v9  ;;  %10511 = vmatpush3.bf16.msra.mxu0 %v11111_v42  ;;  %v10189_v53 = vpop.f32.mrf.mxu1  ;;  %v3093_v8 = vpop.f32.mrf.mxu0  ;;  %v725_v9 = vld [vmem:[#allocation3 + $0xfc] sm:$0xf] }
 0x192   :  { %10512 = vmatprep.subr.bf16.mxu0 %v11117_v5  ;;  %v12198_v45 = vadd.f32 %v10189_v53, %v3195_v54  ;;  %v3196_v63 = vadd.f32 %v3093_v8, %v12103_v59  ;;  %v724_v54 = vld [vmem:[#allocation3 + $0xf8] sm:$0xf]  ;;  %1127 = vst [vmem:[#allocation2 + $0x214] sm:$0xf] %v725_v9 }
 0x193   :  { %10557 = vmatpush3.bf16.msra.mxu1 %v11106_v61  ;;  %v3466_v16 = vpop.f32.mrf.mxu1  ;;  %v10145_v6 = vpop.f32.mrf.mxu0  ;;  %1126 = vst [vmem:[#allocation2 + $0x210] sm:$0xf] %v724_v54 }
 0x194   :  { %10558 = vmatprep.subr.bf16.mxu1 %v11112_v43  ;;  %v12201_v57 = vadd.f32 %v3466_v16, %v3193_v30  ;;  %v3199_v58 = vadd.f32 %v10145_v6, %v12108_v39 }
 0x195   :  { %10513 = vmatpush3.bf16.msra.mxu0 %v11117_v5  ;;  %v10192_v29 = vpop.f32.mrf.mxu1  ;;  %v3096_v44 = vpop.f32.mrf.mxu0  ;;  %v12212_v5 = vcombine.low %v724_v54, %v725_v9 }
 0x196   :  { %10479 = vmatmul.mubr.bf16.gmra.mxu1 %v11098_v34  ;;  %10514 = vmatprep.subr.bf16.mxu0 %v11123_v11  ;;  %v12204_v42 = vadd.f32 %v10192_v29, %v3198_v36  ;;  %v3197_v59 = vadd.f32 %v3096_v44, %v12111_v18  ;;  %v12210_v18 = vld [vmem:[#allocation6 + $0x178] sm:$0xff]   ;;  %v11130_v36 = vld [vmem:[#allocation6 + $0x100] sm:$0xff]  }
 0x197   :  { %10482 = vmatprep.mubr.bf16.mxu1 %v11102_v4  ;;  %10559 = vmatpush3.bf16.msra.mxu1 %v11112_v43  ;;  %v3479_v55 = vpop.f32.mrf.mxu1  ;;  %v10148_v49 = vpop.f32.mrf.mxu0  ;;  %v11109_v43 = vld [vmem:[#allocation2 + $0xc8] sm:$0xff]   ;;  %v912_v4 = vshrl.u32 %v12212_v5, 16  ;;  %v915_v53 = vshll.u32 %v12212_v5, 16 }
 0x198   :  { %10435 = vmatmul.mubr.bf16.gmra.mxu0 %v11103_v19  ;;  %10560 = vmatprep.subr.bf16.mxu1 %v11118_v24  ;;  %v12207_v39 = vadd.f32 %v3479_v55, %v3196_v63  ;;  %v3202_v61 = vadd.f32 %v10148_v49, %v12115_v2  ;;  %v11113_v63 = vld [vmem:[#allocation2 + $0xd0] sm:$0xff]   ;;  %v11110_v55 = vld [vmem:[#allocation2 + $0x2e8] sm:$0xff]  }
 0x199   :  { %10438 = vmatprep.mubr.bf16.mxu0 %v11107_v21  ;;  %10515 = vmatpush3.bf16.msra.mxu0 %v11123_v11  ;;  %v10193_v17 = vpop.f32.mrf.mxu1  ;;  %v3109_v14 = vpop.f32.mrf.mxu0  ;;  %v914_v16 = vrot.slane %v912_v4, 7 }
 0x19a   :  { %10516 = vmatprep.subr.bf16.mxu0 %v11129_v1  ;;  %v12214_v30 = vadd.f32 %v10193_v17, %v3199_v58  ;;  %v3200_v22 = vadd.f32 %v3109_v14, %v12120_v28 }
 0x19b   :  { %10561 = vmatpush3.bf16.msra.mxu1 %v11118_v24  ;;  %v3482_v2 = vpop.f32.mrf.mxu1  ;;  %v10149_v34 = vpop.f32.mrf.mxu0  ;;  %v917_v29 = vor.u32 %v915_v53, %v914_v16 }
 0x19c   :  { %10562 = vmatprep.subr.bf16.mxu1 %v11124_v50  ;;  %v12219_v8 = vadd.f32 %v3482_v2, %v3197_v59  ;;  %v3203_v11 = vadd.f32 %v10149_v34, %v12123_v35  ;;  %v12228_v35 = vld [vmem:[#allocation6 + $0x1b8] sm:$0xff]   ;;  %v11119_v2 = vld [vmem:[#allocation2 + $0xe0] sm:$0xff]  }
 0x19d   :  { %10517 = vmatpush3.bf16.msra.mxu0 %v11129_v1  ;;  %v10196_v19 = vpop.f32.mrf.mxu1  ;;  %v3112_v28 = vpop.f32.mrf.mxu0 }
 0x19e   :  { %10483 = vmatmul.mubr.bf16.gmra.mxu1 %v11104_v3  ;;  %10598 = vmatprep.subr.bf16.mxu0 %v12210_v18  ;;  %v12225_v6 = vadd.f32 %v10196_v19, %v3202_v61  ;;  %v3201_v24 = vadd.f32 %v3112_v28, %v12127_v48  ;;  %v949_v48 = vsel %vm11377_vm5, 0, %v917_v29  ;;  %v11114_v61 = vld [vmem:[#allocation2 + $0x2f0] sm:$0xff]   ;;  %v11116_v28 = vld [vmem:[#allocation2 + $0x2f8] sm:$0xff]  }
 0x19f   :  { %10486 = vmatprep.mubr.bf16.mxu1 %v11108_v20  ;;  %10563 = vmatpush3.bf16.msra.mxu1 %v11124_v50  ;;  %v3495_v58 = vpop.f32.mrf.mxu1  ;;  %v10152_v21 = vpop.f32.mrf.mxu0  ;;  %v8709_v54 = vcombine.low %v949_v48, %v949_v48  ;;  %v8710_v9 = vcombine.high %v949_v48, %v949_v48 }
 0x1a0   :  { %10439 = vmatmul.mubr.bf16.gmra.mxu0 %v11109_v43  ;;  %10564 = vmatprep.subr.bf16.mxu1 %v11130_v36  ;;  %v12232_v44 = vadd.f32 %v3495_v58, %v3200_v22  ;;  %v3206_v1 = vadd.f32 %v10152_v21, %v12130_v0  ;;  %v11115_v22 = vld [vmem:[#allocation2 + $0xd8] sm:$0xff]   ;;  %v11120_v21 = vld [vmem:[#allocation2 + $0x300] sm:$0xff]  }
 0x1a1   :  { %10442 = vmatprep.mubr.bf16.mxu0 %v11113_v63  ;;  %v10197_v59 = vpop.f32.mrf.mxu1  ;;  %v3125_v49 = vpop.f32.mrf.mxu0  ;;  %1093 = vst [vmem:[#allocation2 + $0x100] sm:$0xf] %v8709_v54  ;;  %1094 = vst [vmem:[#allocation2 + $0x104] sm:$0xf] %v8710_v9 }
 0x1a2   :  { %v12237_v3 = vadd.f32 %v10197_v59, %v3203_v11  ;;  %v3204_v50 = vadd.f32 %v3125_v49, %v12133_v56  ;;  %v11125_v49 = vld [vmem:[#allocation2 + $0xf0] sm:$0xff]  }
 0x1a3   :  { %10565 = vmatpush3.bf16.msra.mxu1 %v11130_v36  ;;  %v3498_v17 = vpop.f32.mrf.mxu1  ;;  %v10153_v14 = vpop.f32.mrf.mxu0 }
 0x1a4   :  { %10646 = vmatprep.subr.bf16.mxu1 %v12228_v35  ;;  %v12241_v0 = vadd.f32 %v3498_v17, %v3201_v24  ;;  %v3207_v20 = vadd.f32 %v10153_v14, %v12136_v41 }
 0x1a5   :  { %v10200_v33 = vpop.f32.mrf.mxu1  ;;  %v3128_v34 = vpop.f32.mrf.mxu0 }
 0x1a6   :  { %10487 = vmatmul.mubr.bf16.gmra.mxu1 %v11110_v55  ;;  %v12244_v56 = vadd.f32 %v10200_v33, %v3206_v1  ;;  %v3205_v43 = vadd.f32 %v3128_v34, %v12139_v51  ;;  %v11121_v51 = vld [vmem:[#allocation2 + $0xe8] sm:$0xff]   ;;  %v11126_v34 = vld [vmem:[#allocation2 + $0x310] sm:$0xff]  }
 0x1a7   :  { %10490 = vmatprep.mubr.bf16.mxu1 %v11114_v61  ;;  %v3511_v36 = vpop.f32.mrf.mxu1  ;;  %v10156_v11 = vpop.f32.mrf.mxu0 }
 0x1a8   :  { %10443 = vmatmul.mubr.bf16.gmra.mxu0 %v11115_v22  ;;  %v12247_v63 = vadd.f32 %v3511_v36, %v3204_v50  ;;  %v3210_v19 = vadd.f32 %v10156_v11, %v12142_v15  ;;  %v1158_v50 = vrot.slane %v915_v53, 1  ;;  %v11127_v11 = vld [vmem:[#allocation2 + $0xf8] sm:$0xff]  }
 0x1a9   :  { %10446 = vmatprep.mubr.bf16.mxu0 %v11119_v2  ;;  %v10201_v41 = vpop.f32.mrf.mxu1  ;;  %v3141_v16 = vpop.f32.mrf.mxu0 }
 0x1aa   :  { %v12250_v24 = vadd.f32 %v10201_v41, %v3207_v20  ;;  %v3208_v58 = vadd.f32 %v3141_v16, %v12145_v13  ;;  %v1159_v17 = vor.u32 %v1158_v50, %v912_v4  ;;  %v11122_v20 = vld [vmem:[#allocation2 + $0x308] sm:$0xff]  }
 0x1ab   :  { %v3514_v29 = vpop.f32.mrf.mxu1  ;;  %v10157_v1 = vpop.f32.mrf.mxu0  ;;  %v11131_v41 = vld [vmem:[#allocation2 + $0x88] sm:$0xff]  }
 0x1ac   :  { %v12253_v59 = vadd.f32 %v3514_v29, %v3205_v43  ;;  %v3211_v55 = vadd.f32 %v10157_v1, %v12148_v26  ;;  %v1191_v53 = vsel %vm11367_vm4, %v1159_v17, 0  ;;  %v11137_v17 = vld [vmem:[#allocation2 + $0x98] sm:$0xff]  }
 0x1ad   :  { %v10204_v48 = vpop.f32.mrf.mxu1  ;;  %v3144_v15 = vpop.f32.mrf.mxu0  ;;  %v8741_v43 = vcombine.low %v1191_v53, %v1191_v53  ;;  %v8742_v36 = vcombine.high %v1191_v53, %v1191_v53 }
 0x1ae   :  { %13117 = vst [vmem:[#allocation12_spill] sm:$0xff] %v12253_v59  ;;  %10491 = vmatmul.mubr.bf16.gmra.mxu1 %v11116_v28  ;;  %v12258_v61 = vadd.f32 %v10204_v48, %v3210_v19  ;;  %v3209_v54 = vadd.f32 %v3144_v15, %v12151_v40  ;;  %v11132_v15 = vld [vmem:[#allocation2 + $0x198] sm:$0xff]  }
 0x1af   :  { %10494 = vmatprep.mubr.bf16.mxu1 %v11120_v21  ;;  %v3527_v13 = vpop.f32.mrf.mxu1  ;;  %v10160_v9 = vpop.f32.mrf.mxu0  ;;  %1335 = vst [vmem:[#allocation2 + $0x320] sm:$0xf] %v8741_v43  ;;  %1336 = vst [vmem:[#allocation2 + $0x324] sm:$0xf] %v8742_v36 }
 0x1b0   :  { %10447 = vmatmul.mubr.bf16.gmra.mxu0 %v11121_v51  ;;  %v12263_v14 = vadd.f32 %v3527_v13, %v3208_v58  ;;  %v3214_v26 = vadd.f32 %v10160_v9, %v12154_v10  ;;  %v11128_v51 = vld [vmem:[#allocation2 + $0x318] sm:$0xff]  }
 0x1b1   :  { %10450 = vmatprep.mubr.bf16.mxu0 %v11125_v49  ;;  %v10205_v22 = vpop.f32.mrf.mxu1  ;;  %v3157_v2 = vpop.f32.mrf.mxu0 }
 0x1b2   :  { %v12268_v33 = vadd.f32 %v10205_v22, %v3211_v55  ;;  %v3212_v40 = vadd.f32 %v3157_v2, %v12157_v25  ;;  %v11141_v22 = vld [vmem:[#allocation6 + $0x170] sm:$0xff]  }
 0x1b3   :  { %v3530_v5 = vpop.f32.mrf.mxu1  ;;  %v10161_v4 = vpop.f32.mrf.mxu0 }
 0x1b4   :  { %13118 = vst [vmem:[#allocation13_spill] sm:$0xff] %v12268_v33  ;;  %v12271_v19 = vadd.f32 %v3530_v5, %v3209_v54  ;;  %v3215_v10 = vadd.f32 %v10161_v4, %v12160_v60  ;;  %v11147_v4 = vld [vmem:[#allocation6 + $0x168] sm:$0xff]  }
 0x1b5   :  { %v10208_v28 = vpop.f32.mrf.mxu1  ;;  %v3160_v23 = vpop.f32.mrf.mxu0 }
 0x1b6   :  { %13119 = vst [vmem:[#allocation14_spill] sm:$0xff] %v12271_v19  ;;  %10495 = vmatmul.mubr.bf16.gmra.mxu1 %v11122_v20  ;;  %v12274_v16 = vadd.f32 %v10208_v28, %v3214_v26  ;;  %v3213_v25 = vadd.f32 %v3160_v23, %v12163_v52  ;;  %v11133_v52 = vld [vmem:[#allocation2 + $0x90] sm:$0xff]   ;;  %v11142_v23 = vld [vmem:[#allocation6 + $0x1b0] sm:$0xff]  }
 0x1b7   :  { %10498 = vmatprep.mubr.bf16.mxu1 %v11126_v34  ;;  %v3543_v58 = vpop.f32.mrf.mxu1  ;;  %v10164_v21 = vpop.f32.mrf.mxu0  ;;  %v11163_v19 = vld [vmem:[#allocation2 + $0xe0] sm:$0xff]  }
 0x1b8   :  { %10451 = vmatmul.mubr.bf16.gmra.mxu0 %v11127_v11  ;;  %v12277_v29 = vadd.f32 %v3543_v58, %v3212_v40  ;;  %v3218_v1 = vadd.f32 %v10164_v21, %v12166_v32  ;;  %v11134_v40 = vld [vmem:[#allocation2 + $0x1a0] sm:$0xff]   ;;  %v11153_v21 = vld [vmem:[#allocation6 + $0x160] sm:$0xff]  }
 0x1b9   :  { %10518 = vmatprep.mubr.bf16.mxu0 %v11131_v41  ;;  %v10209_v60 = vpop.f32.mrf.mxu1  ;;  %v3173_v55 = vpop.f32.mrf.mxu0 }
 0x1ba   :  { %v12280_v49 = vadd.f32 %v10209_v60, %v3215_v10  ;;  %v3216_v48 = vadd.f32 %v3173_v55, %v12169_v7  ;;  %v11139_v10 = vld [vmem:[#allocation2 + $0xa0] sm:$0xff]   ;;  %v11140_v60 = vld [vmem:[#allocation2 + $0x1b0] sm:$0xff]  }
 0x1bb   :  { %v3546_v50 = vpop.f32.mrf.mxu1  ;;  %v10165_v54 = vpop.f32.mrf.mxu0 }
 0x1bc   :  { %13120 = vst [vmem:[#allocation15_spill] sm:$0xff] %v12280_v49  ;;  %v12283_v13 = vadd.f32 %v3546_v50, %v3213_v25  ;;  %v3219_v9 = vadd.f32 %v10165_v54, %v12173_v27  ;;  %v11138_v27 = vld [vmem:[#allocation2 + $0x1a8] sm:$0xff]  }
 0x1bd   :  { %v10212_v26 = vpop.f32.mrf.mxu1  ;;  %v3176_v32 = vpop.f32.mrf.mxu0  ;;  %v11159_v54 = vld [vmem:[#allocation6 + $0x158] sm:$0xff]  }
 0x1be   :  { %13121 = vst [vmem:[#allocation16_spill] sm:$0xff] %v12283_v13  ;;  %10499 = vmatmul.mubr.bf16.gmra.mxu1 %v11128_v51  ;;  %v12286_v20 = vadd.f32 %v10212_v26, %v3218_v1  ;;  %v3217_v2 = vadd.f32 %v3176_v32, %v12176_v37  ;;  %v11148_v51 = vld [vmem:[#allocation6 + $0x1a8] sm:$0xff]   ;;  %v11162_v49 = vld [vmem:[#allocation2 + $0x1e8] sm:$0xff]  }
 0x1bf   :  { %10566 = vmatprep.mubr.bf16.mxu1 %v11132_v15  ;;  %v3559_v53 = vpop.f32.mrf.mxu1  ;;  %v10232_v7 = vpop.f32.mrf.mxu0  ;;  %v11149_v26 = vld [vmem:[#allocation2 + $0xb8] sm:$0xff]  }
 0x1c0   :  { %10519 = vmatmul.mubr.bf16.vlgmr.msra.gmra.mxu0 %v11133_v52  ;;  %v12289_v34 = vadd.f32 %v3559_v53, %v3216_v48  ;;  %v12292_v43 = vadd.f32 %v10232_v7, %v12179_v38  ;;  %v11144_v48 = vld [vmem:[#allocation2 + $0x1b8] sm:$0xff]   ;;  %v11145_v52 = vld [vmem:[#allocation2 + $0xb0] sm:$0xff]   ;;  %v11146_v7 = vld [vmem:[#allocation2 + $0x1c0] sm:$0xff]  }
 0x1c1   :  { %10599 = vmatpush3.bf16.msra.mxu0 %v12210_v18  ;;  %10522 = vmatprep.mubr.bf16.mxu0 %v11137_v17  ;;  %v10213_v36 = vpop.f32.mrf.mxu1  ;;  %v3834_v5 = vpop.f32.mrf.mxu0  ;;  %v11143_v18 = vld [vmem:[#allocation2 + $0xa8] sm:$0xff]  }
 0x1c2   :  { %10600 = vmatprep.subr.bf16.mxu0 %v11141_v22  ;;  %v12295_v11 = vadd.f32 %v10213_v36, %v3219_v9  ;;  %v12298_v37 = vadd.f32 %v3834_v5, %v12183_v31  ;;  %v11150_v36 = vld [vmem:[#allocation2 + $0x1c8] sm:$0xff]  }
 0x1c3   :  { %v3562_v41 = vpop.f32.mrf.mxu1  ;;  %v12300_v28 = vpop.f32.mrf.mxu0 }
 0x1c4   :  { %13122 = vst [vmem:[#allocation17_spill] sm:$0xff] %v12295_v11  ;;  %v12302_v38 = vadd.f32 %v3562_v41, %v3217_v2  ;;  %v11165_v2 = vld [vmem:[#allocation6 + $0x150] sm:$0xff]  }
 0x1c5   :  { %10601 = vmatpush3.bf16.msra.mxu0 %v11141_v22  ;;  %v12304_v25 = vpop.f32.mrf.mxu1  ;;  %v12306_v58 = vpop.f32.mrf.mxu0 }
 0x1c6   :  { %13123 = vst [vmem:[#allocation18_spill] sm:$0xff] %v12302_v38  ;;  %10567 = vmatmul.mubr.bf16.vlgmr.msra.gmra.mxu1 %v11134_v40  ;;  %10602 = vmatprep.subr.bf16.mxu0 %v11147_v4  ;;  %v11160_v40 = vld [vmem:[#allocation6 + $0x198] sm:$0xff]   ;;  %v11158_v38 = vld [vmem:[#allocation2 + $0x1e0] sm:$0xff]  }
 0x1c7   :  { %10647 = vmatpush3.bf16.msra.mxu1 %v12228_v35  ;;  %10570 = vmatprep.mubr.bf16.mxu1 %v11138_v27  ;;  %v12309_v31 = vpop.f32.mrf.mxu1  ;;  %v10236_v1 = vpop.f32.mrf.mxu0 }
 0x1c8   :  { %10523 = vmatmul.mubr.bf16.gmra.mxu0 %v11139_v10  ;;  %10648 = vmatprep.subr.bf16.mxu1 %v11142_v23  ;;  %v12312_v55 = vadd.f32 %v10236_v1, %v12192_v62  ;;  %v11154_v62 = vld [vmem:[#allocation6 + $0x1a0] sm:$0xff]   ;;  %v11171_v10 = vld [vmem:[#allocation6 + $0x148] sm:$0xff]   ;;  %v11155_v1 = vld [vmem:[#allocation2 + $0xc8] sm:$0xff]  }
 0x1c9   :  { %10526 = vmatprep.mubr.bf16.mxu0 %v11143_v18  ;;  %10603 = vmatpush3.bf16.msra.mxu0 %v11147_v4  ;;  %v12314_v15 = vpop.f32.mrf.mxu1  ;;  %v3850_v50 = vpop.f32.mrf.mxu0 }
 0x1ca   :  { %10604 = vmatprep.subr.bf16.mxu0 %v11153_v21  ;;  %v12317_v35 = vadd.f32 %v3850_v50, %v12195_v47 }
 0x1cb   :  { %10649 = vmatpush3.bf16.msra.mxu1 %v11142_v23  ;;  %v12319_v9 = vpop.f32.mrf.mxu1  ;;  %v12321_v17 = vpop.f32.mrf.mxu0  ;;  %v11151_v23 = vld [vmem:[#allocation2 + $0xc0] sm:$0xff]  }
 0x1cc   :  { %10650 = vmatprep.subr.bf16.mxu1 %v11148_v51 }
 0x1cd   :  { %10605 = vmatpush3.bf16.msra.mxu0 %v11153_v21  ;;  %v12323_v32 = vpop.f32.mrf.mxu1  ;;  %v12325_v22 = vpop.f32.mrf.mxu0 }
 0x1ce   :  { %10571 = vmatmul.mubr.bf16.gmra.mxu1 %v11140_v60  ;;  %10606 = vmatprep.subr.bf16.mxu0 %v11159_v54 }
 0x1cf   :  { %10574 = vmatprep.mubr.bf16.mxu1 %v11144_v48  ;;  %10651 = vmatpush3.bf16.msra.mxu1 %v11148_v51  ;;  %v12327_v47 = vpop.f32.mrf.mxu1  ;;  %v10240_v53 = vpop.f32.mrf.mxu0  ;;  %v11178_v48 = vld [vmem:[#allocation6 + $0x140] sm:$0xff]  }
 0x1d0   :  { %10527 = vmatmul.mubr.bf16.gmra.mxu0 %v11145_v52  ;;  %10652 = vmatprep.subr.bf16.mxu1 %v11154_v62  ;;  %v12330_v27 = vadd.f32 %v10240_v53, %v12204_v42  ;;  %v11166_v42 = vld [vmem:[#allocation6 + $0x190] sm:$0xff]   ;;  %v11172_v52 = vld [vmem:[#allocation6 + $0x188] sm:$0xff]  }
 0x1d1   :  { %10530 = vmatprep.mubr.bf16.mxu0 %v11149_v26  ;;  %10607 = vmatpush3.bf16.msra.mxu0 %v11159_v54  ;;  %v12332_v5 = vpop.f32.mrf.mxu1  ;;  %v3866_v4 = vpop.f32.mrf.mxu0  ;;  %v11152_v54 = vld [vmem:[#allocation2 + $0x1d0] sm:$0xff]   ;;  %v12350_v26 = vld [vmem:[#allocation6 + $0x1f8] sm:$0xff]  }
 0x1d2   :  { %10608 = vmatprep.subr.bf16.mxu0 %v11165_v2  ;;  %v12335_v41 = vadd.f32 %v3866_v4, %v12207_v39 }
 0x1d3   :  { %10653 = vmatpush3.bf16.msra.mxu1 %v11154_v62  ;;  %v12337_v18 = vpop.f32.mrf.mxu1  ;;  %v12339_v21 = vpop.f32.mrf.mxu0 }
 0x1d4   :  { %10654 = vmatprep.subr.bf16.mxu1 %v11160_v40 }
 0x1d5   :  { %10609 = vmatpush3.bf16.msra.mxu0 %v11165_v2  ;;  %v12341_v60 = vpop.f32.mrf.mxu1  ;;  %v12343_v51 = vpop.f32.mrf.mxu0 }
 0x1d6   :  { %10575 = vmatmul.mubr.bf16.gmra.mxu1 %v11146_v7  ;;  %10610 = vmatprep.subr.bf16.mxu0 %v11171_v10 }
 0x1d7   :  { %10578 = vmatprep.mubr.bf16.mxu1 %v11150_v36  ;;  %10655 = vmatpush3.bf16.msra.mxu1 %v11160_v40  ;;  %v12345_v39 = vpop.f32.mrf.mxu1  ;;  %v10244_v50 = vpop.f32.mrf.mxu0  ;;  %v11156_v40 = vld [vmem:[#allocation2 + $0x1d8] sm:$0xff]   ;;  %v11157_v36 = vld [vmem:[#allocation2 + $0xd0] sm:$0xff]  }
 0x1d8   :  { %10531 = vmatmul.mubr.bf16.gmra.mxu0 %v11151_v23  ;;  %10656 = vmatprep.subr.bf16.mxu1 %v11166_v42  ;;  %v12348_v62 = vadd.f32 %v10244_v50, %v12225_v6  ;;  %v11179_v6 = vld [vmem:[#allocation6 + $0x180] sm:$0xff]  }
 0x1d9   :  { %10534 = vmatprep.mubr.bf16.mxu0 %v11155_v1  ;;  %10611 = vmatpush3.bf16.msra.mxu0 %v11171_v10  ;;  %v12352_v2 = vpop.f32.mrf.mxu1  ;;  %v3882_v53 = vpop.f32.mrf.mxu0  ;;  %v11161_v1 = vld [vmem:[#allocation2 + $0xd8] sm:$0xff]  }
 0x1da   :  { %10612 = vmatprep.subr.bf16.mxu0 %v11178_v48  ;;  %v12355_v7 = vadd.f32 %v3882_v53, %v12232_v44  ;;  %v12366_v44 = vld [vmem:[#allocation6 + $0x238] sm:$0xff]  }
 0x1db   :  { %10657 = vmatpush3.bf16.msra.mxu1 %v11166_v42  ;;  %v12357_v4 = vpop.f32.mrf.mxu1  ;;  %v12359_v23 = vpop.f32.mrf.mxu0 }
 0x1dc   :  { %10658 = vmatprep.subr.bf16.mxu1 %v11172_v52 }
 0x1dd   :  { %10613 = vmatpush3.bf16.msra.mxu0 %v11178_v48  ;;  %v12361_v10 = vpop.f32.mrf.mxu1  ;;  %v12363_v50 = vpop.f32.mrf.mxu0 }
 0x1de   :  { %10579 = vmatmul.mubr.bf16.gmra.mxu1 %v11152_v54  ;;  %10694 = vmatprep.subr.bf16.mxu0 %v12350_v26 }
 0x1df   :  { %10582 = vmatprep.mubr.bf16.mxu1 %v11156_v40  ;;  %10659 = vmatpush3.bf16.msra.mxu1 %v11172_v52  ;;  %v12368_v42 = vpop.f32.mrf.mxu1  ;;  %v10248_v53 = vpop.f32.mrf.mxu0 }
 0x1e0   :  { %10535 = vmatmul.mubr.bf16.gmra.mxu0 %v11157_v36  ;;  %10660 = vmatprep.subr.bf16.mxu1 %v11179_v6  ;;  %v12371_v11 = vadd.f32 %v10248_v53, %v12244_v56  ;;  %v11167_v36 = vld [vmem:[#allocation2 + $0xe8] sm:$0xff]  }
 0x1e1   :  { %10538 = vmatprep.mubr.bf16.mxu0 %v11161_v1  ;;  %v12373_v48 = vpop.f32.mrf.mxu1  ;;  %v3898_v54 = vpop.f32.mrf.mxu0 }
 0x1e2   :  { %13124 = vst [vmem:[#allocation19_spill] sm:$0xff] %v12371_v11  ;;  %v12376_v13 = vadd.f32 %v3898_v54, %v12247_v63  ;;  %v11164_v54 = vld [vmem:[#allocation2 + $0x1f0] sm:$0xff]  }
 0x1e3   :  { %10661 = vmatpush3.bf16.msra.mxu1 %v11179_v6  ;;  %v12378_v40 = vpop.f32.mrf.mxu1  ;;  %v12380_v52 = vpop.f32.mrf.mxu0 }
 0x1e4   :  { %13125 = vst [vmem:[#allocation20_spill] sm:$0xff] %v12376_v13  ;;  %10742 = vmatprep.subr.bf16.mxu1 %v12366_v44 }
 0x1e5   :  { %v12383_v33 = vpop.f32.mrf.mxu1  ;;  %v12385_v56 = vpop.f32.mrf.mxu0 }
 0x1e6   :  { %13126 = vst [vmem:[#allocation21_spill] sm:$0xff] %v12383_v33  ;;  %10583 = vmatmul.mubr.bf16.gmra.mxu1 %v11158_v38  ;;  %13127 = vst [vmem:[#allocation22_spill] sm:$0xff] %v12385_v56  ;;  %v11168_v33 = vld [vmem:[#allocation2 + $0x1f8] sm:$0xff]  }
 0x1e7   :  { %10586 = vmatprep.mubr.bf16.mxu1 %v11162_v49  ;;  %v12387_v1 = vpop.f32.mrf.mxu1  ;;  %v10252_v63 = vpop.f32.mrf.mxu0  ;;  %v11169_v49 = vld [vmem:[#allocation2 + $0xf0] sm:$0xff]  }
 0x1e8   :  { %13128 = vst [vmem:[#allocation23_spill] sm:$0xff] %v12387_v1  ;;  %10539 = vmatmul.mubr.bf16.gmra.mxu0 %v11163_v19  ;;  %v12390_v6 = vadd.f32 %v10252_v63, %v12258_v61  ;;  %v11173_v1 = vld [vmem:[#allocation2 + $0xf8] sm:$0xff]   ;;  %v11170_v63 = vld [vmem:[#allocation2 + $0x200] sm:$0xff]  }
 0x1e9   :  { %10542 = vmatprep.mubr.bf16.mxu0 %v11167_v36  ;;  %v12392_v53 = vpop.f32.mrf.mxu1  ;;  %v3914_v13 = vpop.f32.mrf.mxu0 }
 0x1ea   :  { %13129 = vst [vmem:[#allocation24_spill] sm:$0xff] %v12390_v6  ;;  %v12395_v59 = vadd.f32 %v3914_v13, %v12263_v14 }
 0x1eb   :  { %v12397_v38 = vpop.f32.mrf.mxu1  ;;  %v12399_v56 = vpop.f32.mrf.mxu0 }
 0x1ec   :  { %13130 = vst [vmem:[#allocation25_spill] sm:$0xff] %v12395_v59  ;;  %13131 = vst [vmem:[#allocation26_spill] sm:$0xff] %v12399_v56 }
 0x1ed   :  { %v12401_v11 = vpop.f32.mrf.mxu1  ;;  %v12403_v61 = vpop.f32.mrf.mxu0 }
 0x1ee   :  { %13132 = vst [vmem:[#allocation27_spill] sm:$0xff] %v12401_v11  ;;  %10587 = vmatmul.mubr.bf16.gmra.mxu1 %v11164_v54  ;;  %13133 = vst [vmem:[#allocation28_spill] sm:$0xff] %v12403_v61  ;;  %v11174_v11 = vld [vmem:[#allocation2 + $0x208] sm:$0xff]  }
 0x1ef   :  { %10590 = vmatprep.mubr.bf16.mxu1 %v11168_v33  ;;  %v12405_v19 = vpop.f32.mrf.mxu1  ;;  %v10256_v36 = vpop.f32.mrf.mxu0  ;;  %v11176_v33 = vld [vmem:[#allocation2 + $0x100] sm:$0xff]  }
 0x1f0   :  { %13134 = vst [vmem:[#allocation29_spill] sm:$0xff] %v12405_v19  ;;  %10543 = vmatmul.mubr.bf16.gmra.mxu0 %v11169_v49  ;;  %v12408_v14 = vadd.f32 %v10256_v36, %v12274_v16  ;;  %v11180_v19 = vld [vmem:[#allocation2 + $0x2a8] sm:$0xff]   ;;  %v11177_v36 = vld [vmem:[#allocation2 + $0x210] sm:$0xff]  }
 0x1f1   :  { %10546 = vmatprep.mubr.bf16.mxu0 %v11173_v1  ;;  %v12410_v13 = vpop.f32.mrf.mxu1  ;;  %v3930_v59 = vpop.f32.mrf.mxu0 }
 0x1f2   :  { %13135 = vst [vmem:[#allocation30_spill] sm:$0xff] %v12408_v14  ;;  %v12413_v6 = vadd.f32 %v3930_v59, %v12277_v29 }
 0x1f3   :  { %v12415_v54 = vpop.f32.mrf.mxu1  ;;  %v12417_v61 = vpop.f32.mrf.mxu0 }
 0x1f4   :  { %13136 = vst [vmem:[#allocation31_spill] sm:$0xff] %v12413_v6  ;;  %13137 = vst [vmem:[#allocation32_spill] sm:$0xff] %v12417_v61 }
 0x1f5   :  { %v12419_v56 = vpop.f32.mrf.mxu1  ;;  %v12421_v16 = vpop.f32.mrf.mxu0 }
 0x1f6   :  { %13138 = vst [vmem:[#allocation33_spill] sm:$0xff] %v12419_v56  ;;  %10591 = vmatmul.mubr.bf16.gmra.mxu1 %v11170_v63  ;;  %13139 = vst [vmem:[#allocation34_spill] sm:$0xff] %v12421_v16  ;;  %v11181_v56 = vld [vmem:[#allocation2 + $0x90] sm:$0xff]  }
 0x1f7   :  { %10594 = vmatprep.mubr.bf16.mxu1 %v11174_v11  ;;  %v12423_v1 = vpop.f32.mrf.mxu1  ;;  %v10260_v49 = vpop.f32.mrf.mxu0  ;;  %v11182_v11 = vld [vmem:[#allocation2 + $0x2b0] sm:$0xff]  }
 0x1f8   :  { %13140 = vst [vmem:[#allocation35_spill] sm:$0xff] %v12423_v1  ;;  %10547 = vmatmul.mubr.bf16.gmra.mxu0 %v11176_v33  ;;  %v12426_v59 = vadd.f32 %v10260_v49, %v12286_v20  ;;  %v11186_v1 = vld [vmem:[#allocation2 + $0x2b8] sm:$0xff]   ;;  %v3964_v33 = vadd.f32 %v12300_v28, %v12186_v12  ;;  %v4348_v28 = vadd.f32 %v12309_v31, %v12298_v37  ;;  %v11192_v37 = vld [vmem:[#allocation2 + $0x2c8] sm:$0xff]  }
 0x1f9   :  { %10614 = vmatprep.mubr.bf16.mxu0 %v11180_v19  ;;  %v12428_v29 = vpop.f32.mrf.mxu1  ;;  %v3946_v6 = vpop.f32.mrf.mxu0  ;;  %v11190_v19 = vld [vmem:[#allocation6 + $0x1f0] sm:$0xff]   ;;  %v11196_v12 = vld [vmem:[#allocation6 + $0x1e8] sm:$0xff]   ;;  %v3968_v31 = vadd.f32 %v12321_v17, %v12198_v45  ;;  %v3966_v45 = vadd.f32 %v12325_v22, %v12201_v57  ;;  %v4352_v57 = vadd.f32 %v12327_v47, %v12317_v35  ;;  %v3972_v35 = vadd.f32 %v12339_v21, %v12214_v30 }
 0x1fa   :  { %13141 = vst [vmem:[#allocation36_spill] sm:$0xff] %v12426_v59  ;;  %v12431_v14 = vadd.f32 %v3946_v6, %v12289_v34  ;;  %v4350_v6 = vadd.f32 %v12304_v25, %v12292_v43 }
 0x1fb   :  { %v12433_v63 = vpop.f32.mrf.mxu1  ;;  %v12435_v16 = vpop.f32.mrf.mxu0  ;;  %v4355_v22 = vadd.f32 %v12332_v5, %v3968_v31 }
 0x1fc   :  { %13142 = vst [vmem:[#allocation37_spill] sm:$0xff] %v12431_v14  ;;  %v3962_v14 = vadd.f32 %v12306_v58, %v12189_v46  ;;  %v12460_v46 = vld [vmem:[%s13043_s2] ss:$0 sm:$0xff] }
 0x1fd   :  { %v12437_v61 = vpop.f32.mrf.mxu1  ;;  %v12439_v20 = vpop.f32.mrf.mxu0  ;;  %v11188_v58 = vld [vmem:[#allocation2 + $0x2c0] sm:$0xff]  }
 0x1fe   :  { %13143 = vst [vmem:[#allocation38_spill] sm:$0xff] %v12437_v61  ;;  %10595 = vmatmul.mubr.bf16.gmra.mxu1 %v11177_v36  ;;  %13144 = vst [vmem:[#allocation39_spill] sm:$0xff] %v12439_v20  ;;  %v11183_v20 = vld [vmem:[#allocation2 + $0x98] sm:$0xff]  }
 0x1ff   :  { %10662 = vmatprep.mubr.bf16.mxu1 %v11181_v56  ;;  %v12443_v49 = vpop.f32.mrf.mxu1  ;;  %v10328_v34 = vpop.f32.mrf.mxu0  ;;  %v4351_v56 = vadd.f32 %v12314_v15, %v3964_v33 }
 0x200   :  { %13145 = vst [vmem:[#allocation40_spill] sm:$0xff] %v12443_v49  ;;  %10615 = vmatmul.mubr.bf16.vlgmr.msra.gmra.mxu0 %v11182_v11  ;;  %v4737_v11 = vadd.f32 %v10328_v34, %v4350_v6  ;;  %v11187_v49 = vld [vmem:[#allocation2 + $0xa0] sm:$0xff]   ;;  %v11202_v34 = vld [vmem:[#allocation6 + $0x1e0] sm:$0xff]  }
 0x201   :  { %10695 = vmatpush3.bf16.msra.mxu0 %v12350_v26  ;;  %10618 = vmatprep.mubr.bf16.mxu0 %v11186_v1  ;;  %v12450_v36 = vpop.f32.mrf.mxu1  ;;  %v4608_v61 = vpop.f32.mrf.mxu0  ;;  %v11191_v26 = vld [vmem:[#allocation6 + $0x230] sm:$0xff]   ;;  %v4349_v1 = vadd.f32 %v12319_v9, %v3962_v14 }
 0x202   :  { %13146 = vst [vmem:[#allocation41_spill] sm:$0xff] %v12450_v36  ;;  %10696 = vmatprep.subr.bf16.mxu0 %v11190_v19  ;;  %v4735_v36 = vadd.f32 %v4608_v61, %v4348_v28  ;;  %v4775_v6 = vadd.f32 %v12460_v46, %v4737_v11  ;;  %v4354_v61 = vadd.f32 %v12323_v32, %v12312_v55  ;;  %v11208_v32 = vld [vmem:[#allocation6 + $0x1d8] sm:$0xff]  }
 0x203   :  { %v12455_v43 = vpop.f32.mrf.mxu1  ;;  %v10329_v25 = vpop.f32.mrf.mxu0 }
 0x204   :  { %13147 = vst [vmem:[#allocation42_spill] sm:$0xff] %v12455_v43  ;;  %v4738_v59 = vadd.f32 %v10329_v25, %v4351_v56 }
 0x205   :  { %10697 = vmatpush3.bf16.msra.mxu0 %v11190_v19  ;;  %v12465_v15 = vpop.f32.mrf.mxu1  ;;  %v4611_v33 = vpop.f32.mrf.mxu0  ;;  %v4773_v19 = vadd.f32 %v12460_v46, %v4735_v36  ;;  %v11193_v36 = vld [vmem:[#allocation2 + $0xb0] sm:$0xff]  }
 0x206   :  { %10663 = vmatmul.mubr.bf16.vlgmr.msra.gmra.mxu1 %v11183_v20  ;;  %10698 = vmatprep.subr.bf16.mxu0 %v11196_v12  ;;  %v4776_v43 = vadd.f32 %v12460_v46, %v4738_v59  ;;  %v4736_v9 = vadd.f32 %v4611_v33, %v4349_v1  ;;  %v11197_v20 = vld [vmem:[#allocation6 + $0x228] sm:$0xff]   ;;  %v4353_v1 = vadd.f32 %v12337_v18, %v3966_v45  ;;  %v11209_v45 = vld [vmem:[#allocation6 + $0x218] sm:$0xff]  }
 0x207   :  { %10743 = vmatpush3.bf16.msra.mxu1 %v12366_v44  ;;  %10666 = vmatprep.mubr.bf16.mxu1 %v11187_v49  ;;  %v12474_v17 = vpop.f32.mrf.mxu1  ;;  %v10332_v14 = vpop.f32.mrf.mxu0  ;;  %v11189_v49 = vld [vmem:[#allocation2 + $0xa8] sm:$0xff]   ;;  %v4358_v18 = vadd.f32 %v12341_v60, %v12330_v27  ;;  %v11220_v60 = vld [vmem:[#allocation6 + $0x1c8] sm:$0xff]  }
 0x208   :  { %10619 = vmatmul.mubr.bf16.gmra.mxu0 %v11188_v58  ;;  %10744 = vmatprep.subr.bf16.mxu1 %v11191_v26  ;;  %v9312_v28 = vpack.c.bf16 %v4776_v43, %v4775_v6  ;;  %v4774_v44 = vadd.f32 %v12460_v46, %v4736_v9  ;;  %v4741_v11 = vadd.f32 %v10332_v14, %v4354_v61  ;;  %v11203_v58 = vld [vmem:[#allocation6 + $0x220] sm:$0xff]   ;;  %v11198_v6 = vld [vmem:[#allocation2 + $0x2d8] sm:$0xff]  }
 0x209   :  { %10622 = vmatprep.mubr.bf16.mxu0 %v11192_v37  ;;  %10699 = vmatpush3.bf16.msra.mxu0 %v11196_v12  ;;  %v12478_v59 = vpop.f32.mrf.mxu1  ;;  %v4624_v55 = vpop.f32.mrf.mxu0  ;;  %v11194_v12 = vld [vmem:[#allocation2 + $0x2d0] sm:$0xff]  }
 0x20a   :  { %10700 = vmatprep.subr.bf16.mxu0 %v11202_v34  ;;  %9464 = vst [vmem:[#allocation8 + $0x8] sm:$0xff] %v9312_v28   ;;  %v9307_v56 = vpack.c.bf16 %v4774_v44, %v4773_v19  ;;  %v4739_v37 = vadd.f32 %v4624_v55, %v4352_v57  ;;  %v4779_v31 = vadd.f32 %v12460_v46, %v4741_v11  ;;  %v11195_v44 = vld [vmem:[#allocation2 + $0xb8] sm:$0xff]   ;;  %v11199_v57 = vld [vmem:[#allocation2 + $0xc0] sm:$0xff]  }
 0x20b   :  { %10745 = vmatpush3.bf16.msra.mxu1 %v11191_v26  ;;  %v12483_v43 = vpop.f32.mrf.mxu1  ;;  %v10333_v25 = vpop.f32.mrf.mxu0  ;;  %v11214_v26 = vld [vmem:[#allocation6 + $0x1d0] sm:$0xff]  }
 0x20c   :  { %10746 = vmatprep.subr.bf16.mxu1 %v11197_v20  ;;  %9308 = vst [vmem:[#allocation8] sm:$0xff] %v9307_v56   ;;  %v4742_v33 = vadd.f32 %v10333_v25, %v4355_v22  ;;  %v4777_v14 = vadd.f32 %v12460_v46, %v4739_v37  ;;  %v11215_v11 = vld [vmem:[#allocation6 + $0x210] sm:$0xff]  }
 0x20d   :  { %10701 = vmatpush3.bf16.msra.mxu0 %v11202_v34  ;;  %v12488_v47 = vpop.f32.mrf.mxu1  ;;  %v4627_v5 = vpop.f32.mrf.mxu0  ;;  %v3970_v34 = vadd.f32 %v12343_v51, %v12219_v8  ;;  %v4356_v8 = vadd.f32 %v12345_v39, %v12335_v41  ;;  %v4359_v51 = vadd.f32 %v12352_v2, %v3972_v35  ;;  %v3976_v41 = vadd.f32 %v12359_v23, %v12237_v3 }
 0x20e   :  { %10667 = vmatmul.mubr.bf16.gmra.mxu1 %v11189_v49  ;;  %10702 = vmatprep.subr.bf16.mxu0 %v11208_v32  ;;  %v4780_v9 = vadd.f32 %v12460_v46, %v4742_v33  ;;  %v4740_v61 = vadd.f32 %v4627_v5, %v4353_v1  ;;  %v11204_v1 = vld [vmem:[#allocation2 + $0x2e8] sm:$0xff]   ;;  %v3974_v35 = vadd.f32 %v12363_v50, %v12241_v0  ;;  %v11221_v5 = vld [vmem:[#allocation6 + $0x208] sm:$0xff]  }
 0x20f   :  { %10670 = vmatprep.mubr.bf16.mxu1 %v11193_v36  ;;  %10747 = vmatpush3.bf16.msra.mxu1 %v11197_v20  ;;  %v12496_v30 = vpop.f32.mrf.mxu1  ;;  %v4357_v36 = vadd.f32 %v12357_v4, %v3970_v34  ;;  %v4362_v4 = vadd.f32 %v12361_v10, %v12348_v62  ;;  %v4360_v0 = vadd.f32 %v12368_v42, %v12355_v7 }
 0x210   :  { %v10336_v21 = vpop.f32.mrf.mxu0  ;;  %10623 = vmatmul.mubr.bf16.gmra.mxu0 %v11194_v12  ;;  %10748 = vmatprep.subr.bf16.mxu1 %v11203_v58  ;;  %v9322_v19 = vpack.c.bf16 %v4780_v9, %v4779_v31  ;;  %v4778_v28 = vadd.f32 %v12460_v46, %v4740_v61  ;;  %v4363_v10 = vadd.f32 %v12373_v48, %v3976_v41 }
 0x211   :  { %10626 = vmatprep.mubr.bf16.mxu0 %v11198_v6  ;;  %10703 = vmatpush3.bf16.msra.mxu0 %v11208_v32  ;;  %v12500_v20 = vpop.f32.mrf.mxu1  ;;  %v4745_v55 = vadd.f32 %v10336_v21, %v4358_v18  ;;  %v11200_v32 = vld [vmem:[#allocation2 + $0x2e0] sm:$0xff]   ;;  %v11201_v18 = vld [vmem:[#allocation2 + $0xc8] sm:$0xff]   ;;  %v11205_v21 = vld [vmem:[#allocation2 + $0xd0] sm:$0xff]   ;;  %v3980_v7 = vadd.f32 %v12380_v52, %v12250_v24 }
 0x212   :  { %v4640_v27 = vpop.f32.mrf.mxu0  ;;  %10704 = vmatprep.subr.bf16.mxu0 %v11214_v26  ;;  %9466 = vst [vmem:[#allocation8 + $0x18] sm:$0xff] %v9322_v19   ;;  %v9317_v49 = vpack.c.bf16 %v4778_v28, %v4777_v14  ;;  %v11206_v19 = vld [vmem:[#allocation2 + $0x2f0] sm:$0xff]   ;;  %v13151_v52 = vld [vmem:[#allocation22_spill] sm:$0xff] }
 0x213   :  { %10749 = vmatpush3.bf16.msra.mxu1 %v11203_v58  ;;  %v12505_v22 = vpop.f32.mrf.mxu1  ;;  %v4743_v25 = vadd.f32 %v4640_v27, %v4356_v8  ;;  %v11226_v58 = vld [vmem:[#allocation6 + $0x1c0] sm:$0xff]   ;;  %v4783_v37 = vadd.f32 %v12460_v46, %v4745_v55  ;;  %v11210_v8 = vld [vmem:[#allocation2 + $0x2f8] sm:$0xff]  }
 0x214   :  { %v10337_v56 = vpop.f32.mrf.mxu0  ;;  %10750 = vmatprep.subr.bf16.mxu1 %v11209_v45  ;;  %9465 = vst [vmem:[#allocation8 + $0x10] sm:$0xff] %v9317_v49   ;;  %v11227_v28 = vld [vmem:[#allocation6 + $0x200] sm:$0xff]  }
 0x215   :  { %v4746_v12 = vadd.f32 %v10337_v56, %v4359_v51  ;;  %10705 = vmatpush3.bf16.msra.mxu0 %v11214_v26  ;;  %v4781_v26 = vadd.f32 %v12460_v46, %v4743_v25  ;;  %v13150_v24 = vld [vmem:[#allocation12_spill] sm:$0xff] }
 0x216   :  { %v12510_v39 = vpop.f32.mrf.mxu1  ;;  %10671 = vmatmul.mubr.bf16.gmra.mxu1 %v11195_v44  ;;  %v4643_v2 = vpop.f32.mrf.mxu0  ;;  %10706 = vmatprep.subr.bf16.mxu0 %v11220_v60  ;;  %v4361_v44 = vadd.f32 %v12378_v40, %v3974_v35  ;;  %v13148_v40 = vld [vmem:[#allocation19_spill] sm:$0xff] }
 0x217   :  { %v4784_v33 = vadd.f32 %v12460_v46, %v4746_v12  ;;  %v4744_v6 = vadd.f32 %v4643_v2, %v4357_v36  ;;  %10674 = vmatprep.mubr.bf16.mxu1 %v11199_v57  ;;  %10751 = vmatpush3.bf16.msra.mxu1 %v11209_v45  ;;  %v13149_v57 = vld [vmem:[#allocation21_spill] sm:$0xff]  ;;  %v3978_v36 = vadd.f32 %v13151_v52, %v13150_v24 }
 0x218   :  { %v12518_v3 = vpop.f32.mrf.mxu1  ;;  %v10340_v23 = vpop.f32.mrf.mxu0  ;;  %10627 = vmatmul.mubr.bf16.gmra.mxu0 %v11200_v32  ;;  %10752 = vmatprep.subr.bf16.mxu1 %v11215_v11  ;;  %v4366_v56 = vadd.f32 %v13149_v57, %v13148_v40  ;;  %v11207_v2 = vld [vmem:[#allocation2 + $0xd8] sm:$0xff]  }
 0x219   :  { %v9332_v31 = vpack.c.bf16 %v4784_v33, %v4783_v37  ;;  %v4782_v9 = vadd.f32 %v12460_v46, %v4744_v6  ;;  %10630 = vmatprep.mubr.bf16.mxu0 %v11204_v1  ;;  %10707 = vmatpush3.bf16.msra.mxu0 %v11220_v60  ;;  %v4749_v34 = vadd.f32 %v10340_v23, %v4362_v4  ;;  %v13152_v37 = vld [vmem:[#allocation20_spill] sm:$0xff]  ;;  %v13153_v33 = vld [vmem:[#allocation23_spill] sm:$0xff]  ;;  %v13160_v52 = vld [vmem:[#allocation25_spill] sm:$0xff] }
 0x21a   :  { %v12522_v61 = vpop.f32.mrf.mxu1  ;;  %v4656_v62 = vpop.f32.mrf.mxu0  ;;  %10708 = vmatprep.subr.bf16.mxu0 %v11226_v58  ;;  %v4364_v6 = vadd.f32 %v13153_v33, %v13152_v37  ;;  %v4367_v4 = vadd.f32 %v12392_v53, %v3980_v7  ;;  %v13154_v53 = vld [vmem:[#allocation13_spill] sm:$0xff] }
 0x21b   :  { %9468 = vst [vmem:[#allocation8 + $0x28] sm:$0xff] %v9332_v31   ;;  %v9327_v50 = vpack.c.bf16 %v4782_v9, %v4781_v26  ;;  %10753 = vmatpush3.bf16.msra.mxu1 %v11215_v11  ;;  %v4747_v27 = vadd.f32 %v4656_v62, %v4360_v0  ;;  %v4787_v51 = vadd.f32 %v12460_v46, %v4749_v34  ;;  %v11212_v9 = vld [vmem:[#allocation2 + $0x300] sm:$0xff]  }
 0x21c   :  { %v12527_v45 = vpop.f32.mrf.mxu1  ;;  %v10341_v14 = vpop.f32.mrf.mxu0  ;;  %10754 = vmatprep.subr.bf16.mxu1 %v11221_v5 }
 0x21d   :  { %9467 = vst [vmem:[#allocation8 + $0x20] sm:$0xff] %v9327_v50   ;;  %v4750_v60 = vadd.f32 %v10341_v14, %v4363_v10  ;;  %10709 = vmatpush3.bf16.msra.mxu0 %v11226_v58  ;;  %v4785_v25 = vadd.f32 %v12460_v46, %v4747_v27  ;;  %v11216_v10 = vld [vmem:[#allocation2 + $0x308] sm:$0xff]   ;;  %v13156_v27 = vld [vmem:[#allocation24_spill] sm:$0xff] }
 0x21e   :  { %v12532_v42 = vpop.f32.mrf.mxu1  ;;  %10675 = vmatmul.mubr.bf16.gmra.mxu1 %v11201_v18  ;;  %v4659_v48 = vpop.f32.mrf.mxu0  ;;  %v4365_v18 = vadd.f32 %v12397_v38, %v3978_v36  ;;  %v13161_v36 = vld [vmem:[#allocation29_spill] sm:$0xff] }
 0x21f   :  { %v4788_v49 = vadd.f32 %v12460_v46, %v4750_v60  ;;  %v4748_v55 = vadd.f32 %v4659_v48, %v4361_v44  ;;  %10678 = vmatprep.mubr.bf16.mxu1 %v11205_v21  ;;  %10755 = vmatpush3.bf16.msra.mxu1 %v11221_v5  ;;  %v11211_v5 = vld [vmem:[#allocation2 + $0xe0] sm:$0xff]   ;;  %v13157_v60 = vld [vmem:[#allocation27_spill] sm:$0xff] }
 0x220   :  { %v12538_v32 = vpop.f32.mrf.mxu1  ;;  %v10344_v11 = vpop.f32.mrf.mxu0  ;;  %10631 = vmatmul.mubr.bf16.gmra.mxu0 %v11206_v19  ;;  %10756 = vmatprep.subr.bf16.mxu1 %v11227_v28  ;;  %v13155_v21 = vld [vmem:[#allocation26_spill] sm:$0xff]  ;;  %v4370_v38 = vadd.f32 %v13157_v60, %v13156_v27 }
 0x221   :  { %v9342_v12 = vpack.c.bf16 %v4788_v49, %v4787_v51  ;;  %v4786_v1 = vadd.f32 %v12460_v46, %v4748_v55  ;;  %10634 = vmatprep.mubr.bf16.mxu0 %v11210_v8  ;;  %v4753_v23 = vadd.f32 %v10344_v11, %v4366_v56  ;;  %v3984_v14 = vadd.f32 %v13155_v21, %v13154_v53  ;;  %v13158_v48 = vld [vmem:[#allocation14_spill] sm:$0xff]  ;;  %v13159_v51 = vld [vmem:[#allocation28_spill] sm:$0xff]  ;;  %v11213_v11 = vld [vmem:[#allocation2 + $0xe8] sm:$0xff]  }
 0x222   :  { %v12544_v41 = vpop.f32.mrf.mxu1  ;;  %v4672_v58 = vpop.f32.mrf.mxu0  ;;  %v3982_v49 = vadd.f32 %v13159_v51, %v13158_v48  ;;  %v13164_v53 = vld [vmem:[#allocation30_spill] sm:$0xff]  ;;  %v13165_v21 = vld [vmem:[#allocation33_spill] sm:$0xff] }
 0x223   :  { %9470 = vst [vmem:[#allocation8 + $0x38] sm:$0xff] %v9342_v12   ;;  %v9337_v35 = vpack.c.bf16 %v4786_v1, %v4785_v25  ;;  %10757 = vmatpush3.bf16.msra.mxu1 %v11227_v28  ;;  %v4751_v62 = vadd.f32 %v4672_v58, %v4364_v6  ;;  %v4791_v19 = vadd.f32 %v12460_v46, %v4753_v23  ;;  %v11217_v58 = vld [vmem:[#allocation2 + $0xf0] sm:$0xff]   ;;  %v11219_v51 = vld [vmem:[#allocation2 + $0xf8] sm:$0xff]  }
 0x224   :  { %v12549_v26 = vpop.f32.mrf.mxu1  ;;  %v10345_v31 = vpop.f32.mrf.mxu0  ;;  %v4368_v25 = vadd.f32 %v13161_v36, %v13160_v52  ;;  %v4371_v12 = vadd.f32 %v12410_v13, %v3984_v14  ;;  %v11218_v6 = vld [vmem:[#allocation2 + $0x310] sm:$0xff]   ;;  %v11223_v36 = vld [vmem:[#allocation2 + $0x100] sm:$0xff]  }
 0x225   :  { %9469 = vst [vmem:[#allocation8 + $0x30] sm:$0xff] %v9337_v35   ;;  %v4754_v0 = vadd.f32 %v10345_v31, %v4367_v4  ;;  %v4789_v55 = vadd.f32 %v12460_v46, %v4751_v62  ;;  %v4369_v4 = vadd.f32 %v12415_v54, %v3982_v49  ;;  %v13163_v13 = vld [vmem:[#allocation32_spill] sm:$0xff]  ;;  %v4374_v54 = vadd.f32 %v13165_v21, %v13164_v53  ;;  %v13174_v53 = vld [vmem:[#allocation39_spill] sm:$0xff] }
 0x226   :  { %v12552_v50 = vpop.f32.mrf.mxu1  ;;  %10679 = vmatmul.mubr.bf16.gmra.mxu1 %v11207_v2  ;;  %v4675_v34 = vpop.f32.mrf.mxu0 }
 0x227   :  { %v4792_v28 = vadd.f32 %v12460_v46, %v4754_v0  ;;  %v4752_v44 = vadd.f32 %v4675_v34, %v4365_v18  ;;  %10682 = vmatprep.mubr.bf16.mxu1 %v11211_v5  ;;  %v11222_v5 = vld [vmem:[#allocation2 + $0x318] sm:$0xff]   ;;  %v13162_v18 = vld [vmem:[#allocation15_spill] sm:$0xff] }
 0x228   :  { %v12560_v8 = vpop.f32.mrf.mxu1  ;;  %v10348_v7 = vpop.f32.mrf.mxu0  ;;  %10635 = vmatmul.mubr.bf16.gmra.mxu0 %v11212_v9  ;;  %v3988_v62 = vadd.f32 %v13163_v13, %v13162_v18  ;;  %v13171_v13 = vld [vmem:[#allocation36_spill] sm:$0xff] }
 0x229   :  { %v9352_v40 = vpack.c.bf16 %v4792_v28, %v4791_v19  ;;  %v4790_v57 = vadd.f32 %v12460_v46, %v4752_v44  ;;  %10638 = vmatprep.mubr.bf16.mxu0 %v11216_v10  ;;  %v4757_v2 = vadd.f32 %v10348_v7, %v4370_v38  ;;  %v13166_v28 = vld [vmem:[#allocation16_spill] sm:$0xff]  ;;  %v13167_v44 = vld [vmem:[#allocation34_spill] sm:$0xff] }
 0x22a   :  { %v12566_v56 = vpop.f32.mrf.mxu1  ;;  %v4688_v24 = vpop.f32.mrf.mxu0  ;;  %v3986_v27 = vadd.f32 %v13167_v44, %v13166_v28  ;;  %v11225_v44 = vld [vmem:[#allocation2 + $0x108] sm:$0xff]  }
 0x22b   :  { %9472 = vst [vmem:[#allocation8 + $0x48] sm:$0xff] %v9352_v40   ;;  %v9347_v1 = vpack.c.bf16 %v4790_v57, %v4789_v55  ;;  %v4755_v35 = vadd.f32 %v4688_v24, %v4368_v25  ;;  %v4795_v0 = vadd.f32 %v12460_v46, %v4757_v2  ;;  %v13168_v55 = vld [vmem:[#allocation31_spill] sm:$0xff] }
 0x22c   :  { %v12571_v37 = vpop.f32.mrf.mxu1  ;;  %v10349_v33 = vpop.f32.mrf.mxu0  ;;  %v13169_v40 = vld [vmem:[#allocation35_spill] sm:$0xff]  ;;  %v4373_v2 = vadd.f32 %v12433_v63, %v3986_v27 }
 0x22d   :  { %9471 = vst [vmem:[#allocation8 + $0x40] sm:$0xff] %v9347_v1   ;;  %v4758_v23 = vadd.f32 %v10349_v33, %v4371_v12  ;;  %v4793_v60 = vadd.f32 %v12460_v46, %v4755_v35  ;;  %v4372_v57 = vadd.f32 %v13169_v40, %v13168_v55  ;;  %v11224_v1 = vld [vmem:[#allocation2 + $0x320] sm:$0xff]  }
 0x22e   :  { %v12574_v31 = vpop.f32.mrf.mxu1  ;;  %10683 = vmatmul.mubr.bf16.gmra.mxu1 %v11213_v11  ;;  %v4691_v9 = vpop.f32.mrf.mxu0  ;;  %v4375_v11 = vadd.f32 %v12428_v29, %v3988_v62  ;;  %v13172_v62 = vld [vmem:[#allocation38_spill] sm:$0xff] }
 0x22f   :  { %v4796_v10 = vadd.f32 %v12460_v46, %v4758_v23  ;;  %v4756_v34 = vadd.f32 %v4691_v9, %v4369_v4  ;;  %10686 = vmatprep.mubr.bf16.mxu1 %v11217_v58  ;;  %v13170_v23 = vld [vmem:[#allocation17_spill] sm:$0xff]  ;;  %v4378_v63 = vadd.f32 %v13172_v62, %v13171_v13 }
 0x230   :  { %v12582_v14 = vpop.f32.mrf.mxu1  ;;  %v10352_v19 = vpop.f32.mrf.mxu0  ;;  %10639 = vmatmul.mubr.bf16.gmra.mxu0 %v11218_v6  ;;  %v11228_v6 = vld [vmem:[#allocation2 + $0x1a0] sm:$0xff]   ;;  %v3992_v29 = vadd.f32 %v12435_v16, %v13170_v23 }
 0x231   :  { %v9362_v38 = vpack.c.bf16 %v4796_v10, %v4795_v0  ;;  %v4794_v7 = vadd.f32 %v12460_v46, %v4756_v34  ;;  %10642 = vmatprep.mubr.bf16.mxu0 %v11222_v5  ;;  %v4761_v52 = vadd.f32 %v10352_v19, %v4374_v54  ;;  %v13173_v34 = vld [vmem:[#allocation18_spill] sm:$0xff] }
 0x232   :  { %v12588_v48 = vpop.f32.mrf.mxu1  ;;  %v4704_v49 = vpop.f32.mrf.mxu0  ;;  %v3990_v21 = vadd.f32 %v13174_v53, %v13173_v34  ;;  %v11231_v34 = vld [vmem:[#allocation2 + $0x2b8] sm:$0xff]  }
 0x233   :  { %9474 = vst [vmem:[#allocation8 + $0x58] sm:$0xff] %v9362_v38   ;;  %v9357_v24 = vpack.c.bf16 %v4794_v7, %v4793_v60  ;;  %v4759_v58 = vadd.f32 %v4704_v49, %v4372_v57  ;;  %v4799_v5 = vadd.f32 %v12460_v46, %v4761_v52  ;;  %v13175_v60 = vld [vmem:[#allocation37_spill] sm:$0xff]  ;;  %v13176_v38 = vld [vmem:[#allocation40_spill] sm:$0xff]  ;;  %v11230_v52 = vld [vmem:[#allocation2 + $0x1a8] sm:$0xff]  }
 0x234   :  { %v12593_v25 = vpop.f32.mrf.mxu1  ;;  %v10353_v12 = vpop.f32.mrf.mxu0  ;;  %v4376_v7 = vadd.f32 %v13176_v38, %v13175_v60  ;;  %v11229_v57 = vld [vmem:[#allocation2 + $0x2b0] sm:$0xff]  }
 0x235   :  { %9473 = vst [vmem:[#allocation8 + $0x50] sm:$0xff] %v9357_v24   ;;  %v4762_v33 = vadd.f32 %v10353_v12, %v4375_v11  ;;  %v4797_v54 = vadd.f32 %v12460_v46, %v4759_v58  ;;  %v11232_v58 = vld [vmem:[#allocation2 + $0x1b0] sm:$0xff]  }
 0x236   :  { %v12596_v4 = vpop.f32.mrf.mxu1  ;;  %10687 = vmatmul.mubr.bf16.gmra.mxu1 %v11219_v51  ;;  %v4707_v35 = vpop.f32.mrf.mxu0  ;;  %v13177_v51 = vld [vmem:[#allocation41_spill] sm:$0xff] }
 0x237   :  { %v4800_v9 = vadd.f32 %v12460_v46, %v4762_v33  ;;  %v4760_v18 = vadd.f32 %v4707_v35, %v4373_v2  ;;  %10690 = vmatprep.mubr.bf16.mxu1 %v11223_v36  ;;  %v4379_v49 = vadd.f32 %v13177_v51, %v3992_v29  ;;  %v13178_v36 = vld [vmem:[#allocation42_spill] sm:$0xff] }
 0x238   :  { %v12604_v0 = vpop.f32.mrf.mxu1  ;;  %v10356_v10 = vpop.f32.mrf.mxu0  ;;  %10643 = vmatmul.mubr.bf16.gmra.mxu0 %v11224_v1  ;;  %v4377_v12 = vadd.f32 %v13178_v36, %v3990_v21 }
 0x239   :  { %v9372_v19 = vpack.c.bf16 %v4800_v9, %v4799_v5  ;;  %v4798_v16 = vadd.f32 %v12460_v46, %v4760_v18  ;;  %10710 = vmatprep.mubr.bf16.mxu0 %v11228_v6  ;;  %v4765_v40 = vadd.f32 %v10356_v10, %v4378_v63 }
 0x23a   :  { %v12610_v28 = vpop.f32.mrf.mxu1  ;;  %v4720_v27 = vpop.f32.mrf.mxu0 }
 0x23b   :  { %9476 = vst [vmem:[#allocation8 + $0x68] sm:$0xff] %v9372_v19   ;;  %v9367_v55 = vpack.c.bf16 %v4798_v16, %v4797_v54  ;;  %v4763_v1 = vadd.f32 %v4720_v27, %v4376_v7  ;;  %v4803_v35 = vadd.f32 %v12460_v46, %v4765_v40  ;;  %v11233_v19 = vld [vmem:[#allocation2 + $0x2c0] sm:$0xff]   ;;  %v11234_v27 = vld [vmem:[#allocation2 + $0x1b8] sm:$0xff]  }
 0x23c   :  { %v12615_v11 = vpop.f32.mrf.mxu1  ;;  %v10357_v24 = vpop.f32.mrf.mxu0 }
 0x23d   :  { %9475 = vst [vmem:[#allocation8 + $0x60] sm:$0xff] %v9367_v55   ;;  %v4766_v2 = vadd.f32 %v10357_v24, %v4379_v49  ;;  %v4801_v18 = vadd.f32 %v12460_v46, %v4763_v1  ;;  %v11235_v24 = vld [vmem:[#allocation2 + $0x2c8] sm:$0xff]  }
 0x23e   :  { %v12618_v33 = vpop.f32.mrf.mxu1  ;;  %10691 = vmatmul.mubr.bf16.gmra.mxu1 %v11225_v44  ;;  %v4723_v6 = vpop.f32.mrf.mxu0 }
 0x23f   :  { %v4804_v23 = vadd.f32 %v12460_v46, %v4766_v2  ;;  %v4764_v29 = vadd.f32 %v4723_v6, %v4377_v12  ;;  %10758 = vmatprep.mubr.bf16.mxu1 %v11229_v57  ;;  %v11237_v12 = vld [vmem:[#allocation2 + $0x2d0] sm:$0xff]  }
 0x240   :  { %v12622_v5 = vpop.f32.mrf.mxu1  ;;  %v10424_v9 = vpop.f32.mrf.mxu0  ;;  %10711 = vmatmul.mubr.bf16.vlgmr.msra.gmra.mxu0 %v11230_v52 }
 0x241   :  { %v9382_v13 = vpack.c.bf16 %v4804_v23, %v4803_v35  ;;  %v4802_v62 = vadd.f32 %v12460_v46, %v4764_v29  ;;  %v5555_v63 = vadd.f32 %v10424_v9, %v12465_v15  ;;  %10714 = vmatprep.mubr.bf16.mxu0 %v11232_v58  ;;  %v11236_v46 = vld [vmem:[#allocation2 + $0x1c0] sm:$0xff]   ;;  %v11240_v35 = vld [vmem:[#allocation2 + $0x1d0] sm:$0xff]  }
 0x242   :  { %v12627_v10 = vpop.f32.mrf.mxu1  ;;  %v5546_v53 = vpop.f32.mrf.mxu0 }
 0x243   :  { %9478 = vst [vmem:[#allocation8 + $0x78] sm:$0xff] %v9382_v13   ;;  %v9377_v21 = vpack.c.bf16 %v4802_v62, %v4801_v18  ;;  %v5547_v54 = vadd.f32 %v5546_v53, %v12474_v17 }
 0x244   :  { %v12630_v16 = vpop.f32.mrf.mxu1  ;;  %v10425_v44 = vpop.f32.mrf.mxu0 }
 0x245   :  { %9477 = vst [vmem:[#allocation8 + $0x70] sm:$0xff] %v9377_v21   ;;  %v5558_v60 = vadd.f32 %v10425_v44, %v12478_v59 }
 0x246   :  { %v10472_v38 = vpop.f32.mrf.mxu1  ;;  %10759 = vmatmul.mubr.bf16.vlgmr.msra.gmra.mxu1 %v11231_v34  ;;  %v5549_v15 = vpop.f32.mrf.mxu0  ;;  %v11239_v34 = vld [vmem:[#allocation2 + $0x2d8] sm:$0xff]  }
 0x247   :  { %v12633_v7 = vadd.f32 %v10472_v38, %v5555_v63  ;;  %v5550_v51 = vadd.f32 %v5549_v15, %v12483_v43  ;;  %10762 = vmatprep.mubr.bf16.mxu1 %v11233_v19  ;;  %v11238_v43 = vld [vmem:[#allocation2 + $0x1c8] sm:$0xff]  }
 0x248   :  { %v5900_v49 = vpop.f32.mrf.mxu1  ;;  %v10428_v55 = vpop.f32.mrf.mxu0  ;;  %10715 = vmatmul.mubr.bf16.gmra.mxu0 %v11234_v27 }
 0x249   :  { %v12636_v17 = vadd.f32 %v5900_v49, %v5547_v54  ;;  %v5571_v40 = vadd.f32 %v10428_v55, %v12488_v47  ;;  %10718 = vmatprep.mubr.bf16.mxu0 %v11236_v46  ;;  %v11241_v54 = vld [vmem:[#allocation2 + $0x2e0] sm:$0xff]  }
 0x24a   :  { %v10473_v57 = vpop.f32.mrf.mxu1  ;;  %v5562_v59 = vpop.f32.mrf.mxu0  ;;  %v11244_v46 = vld [vmem:[#allocation2 + $0x1e0] sm:$0xff]  }
 0x24b   :  { %v12639_v52 = vadd.f32 %v10473_v57, %v5558_v60  ;;  %v5563_v36 = vadd.f32 %v5562_v59, %v12496_v30 }
 0x24c   :  { %v5903_v1 = vpop.f32.mrf.mxu1  ;;  %v10429_v2 = vpop.f32.mrf.mxu0 }
 0x24d   :  { %v12642_v58 = vadd.f32 %v5903_v1, %v5550_v51  ;;  %v5574_v6 = vadd.f32 %v10429_v2, %v12500_v20 }
 0x24e   :  { %v10476_v23 = vpop.f32.mrf.mxu1  ;;  %10763 = vmatmul.mubr.bf16.gmra.mxu1 %v11235_v24  ;;  %v5565_v47 = vpop.f32.mrf.mxu0  ;;  %v11243_v24 = vld [vmem:[#allocation2 + $0x2e8] sm:$0xff]  }
 0x24f   :  { %v12645_v29 = vadd.f32 %v10476_v23, %v5571_v40  ;;  %v5566_v9 = vadd.f32 %v5565_v47, %v12505_v22  ;;  %10766 = vmatprep.mubr.bf16.mxu1 %v11237_v12  ;;  %v11242_v22 = vld [vmem:[#allocation2 + $0x1d8] sm:$0xff]   ;;  %v11245_v12 = vld [vmem:[#allocation2 + $0x2f0] sm:$0xff]  }
 0x250   :  { %v5916_v18 = vpop.f32.mrf.mxu1  ;;  %v10432_v13 = vpop.f32.mrf.mxu0  ;;  %10719 = vmatmul.mubr.bf16.gmra.mxu0 %v11238_v43 }
 0x251   :  { %v12648_v30 = vadd.f32 %v5916_v18, %v5563_v36  ;;  %v5587_v62 = vadd.f32 %v10432_v13, %v12510_v39  ;;  %10722 = vmatprep.mubr.bf16.mxu0 %v11240_v35  ;;  %v11248_v35 = vld [vmem:[#allocation2 + $0x1f0] sm:$0xff]  }
 0x252   :  { %v10477_v63 = vpop.f32.mrf.mxu1  ;;  %v5578_v20 = vpop.f32.mrf.mxu0 }
 0x253   :  { %v12651_v53 = vadd.f32 %v10477_v63, %v5574_v6  ;;  %v5579_v21 = vadd.f32 %v5578_v20, %v12518_v3 }
 0x254   :  { %v5919_v19 = vpop.f32.mrf.mxu1  ;;  %v10433_v44 = vpop.f32.mrf.mxu0 }
 0x255   :  { %v12654_v27 = vadd.f32 %v5919_v19, %v5566_v9  ;;  %v5590_v60 = vadd.f32 %v10433_v44, %v12522_v61 }
 0x256   :  { %v10480_v38 = vpop.f32.mrf.mxu1  ;;  %10767 = vmatmul.mubr.bf16.gmra.mxu1 %v11239_v34  ;;  %v5581_v39 = vpop.f32.mrf.mxu0  ;;  %v11247_v34 = vld [vmem:[#allocation2 + $0x2f8] sm:$0xff]  }
 0x257   :  { %v12657_v15 = vadd.f32 %v10480_v38, %v5587_v62  ;;  %v5582_v51 = vadd.f32 %v5581_v39, %v12527_v45  ;;  %10770 = vmatprep.mubr.bf16.mxu1 %v11241_v54  ;;  %v11246_v45 = vld [vmem:[#allocation2 + $0x1e8] sm:$0xff]   ;;  %v11249_v54 = vld [vmem:[#allocation2 + $0x300] sm:$0xff]  }
 0x258   :  { %v5932_v49 = vpop.f32.mrf.mxu1  ;;  %v10436_v55 = vpop.f32.mrf.mxu0  ;;  %10723 = vmatmul.mubr.bf16.gmra.mxu0 %v11242_v22 }
 0x259   :  { %v12660_v3 = vadd.f32 %v5932_v49, %v5579_v21  ;;  %v5603_v40 = vadd.f32 %v10436_v55, %v12532_v42  ;;  %10726 = vmatprep.mubr.bf16.mxu0 %v11244_v46  ;;  %v11252_v46 = vld [vmem:[#allocation2 + $0x200] sm:$0xff]  }
 0x25a   :  { %v10481_v57 = vpop.f32.mrf.mxu1  ;;  %v5594_v61 = vpop.f32.mrf.mxu0 }
 0x25b   :  { %v12663_v59 = vadd.f32 %v10481_v57, %v5590_v60  ;;  %v5595_v36 = vadd.f32 %v5594_v61, %v12538_v32 }
 0x25c   :  { %v5935_v1 = vpop.f32.mrf.mxu1  ;;  %v10437_v2 = vpop.f32.mrf.mxu0 }
 0x25d   :  { %v12666_v43 = vadd.f32 %v5935_v1, %v5582_v51  ;;  %v5606_v6 = vadd.f32 %v10437_v2, %v12544_v41 }
 0x25e   :  { %v10484_v23 = vpop.f32.mrf.mxu1  ;;  %10771 = vmatmul.mubr.bf16.gmra.mxu1 %v11243_v24  ;;  %v5597_v42 = vpop.f32.mrf.mxu0  ;;  %v11251_v24 = vld [vmem:[#allocation2 + $0x308] sm:$0xff]  }
 0x25f   :  { %v12669_v47 = vadd.f32 %v10484_v23, %v5603_v40  ;;  %v5598_v9 = vadd.f32 %v5597_v42, %v12549_v26  ;;  %10774 = vmatprep.mubr.bf16.mxu1 %v11245_v12  ;;  %v11250_v26 = vld [vmem:[#allocation2 + $0x1f8] sm:$0xff]   ;;  %v11253_v12 = vld [vmem:[#allocation2 + $0x310] sm:$0xff]  }
 0x260   :  { %v5948_v18 = vpop.f32.mrf.mxu1  ;;  %v10440_v13 = vpop.f32.mrf.mxu0  ;;  %10727 = vmatmul.mubr.bf16.gmra.mxu0 %v11246_v45 }
 0x261   :  { %v12672_v32 = vadd.f32 %v5948_v18, %v5595_v36  ;;  %v5619_v62 = vadd.f32 %v10440_v13, %v12552_v50  ;;  %10730 = vmatprep.mubr.bf16.mxu0 %v11248_v35  ;;  %v11256_v35 = vld [vmem:[#allocation2 + $0x210] sm:$0xff]  }
 0x262   :  { %v10485_v63 = vpop.f32.mrf.mxu1  ;;  %v5610_v41 = vpop.f32.mrf.mxu0 }
 0x263   :  { %v12675_v20 = vadd.f32 %v10485_v63, %v5606_v6  ;;  %v5611_v21 = vadd.f32 %v5610_v41, %v12560_v8 }
 0x264   :  { %v5951_v19 = vpop.f32.mrf.mxu1  ;;  %v10441_v44 = vpop.f32.mrf.mxu0 }
 0x265   :  { %v12678_v22 = vadd.f32 %v5951_v19, %v5598_v9  ;;  %v5622_v60 = vadd.f32 %v10441_v44, %v12566_v56 }
 0x266   :  { %v10488_v38 = vpop.f32.mrf.mxu1  ;;  %10775 = vmatmul.mubr.bf16.gmra.mxu1 %v11247_v34  ;;  %v5613_v50 = vpop.f32.mrf.mxu0  ;;  %v11255_v34 = vld [vmem:[#allocation2 + $0x318] sm:$0xff]  }
 0x267   :  { %v12681_v39 = vadd.f32 %v10488_v38, %v5619_v62  ;;  %v5614_v51 = vadd.f32 %v5613_v50, %v12571_v37  ;;  %10778 = vmatprep.mubr.bf16.mxu1 %v11249_v54  ;;  %v11254_v37 = vld [vmem:[#allocation2 + $0x208] sm:$0xff]   ;;  %v11257_v54 = vld [vmem:[#allocation2 + $0x320] sm:$0xff]  }
 0x268   :  { %v5964_v49 = vpop.f32.mrf.mxu1  ;;  %v10444_v55 = vpop.f32.mrf.mxu0  ;;  %10731 = vmatmul.mubr.bf16.gmra.mxu0 %v11250_v26 }
 0x269   :  { %v12684_v8 = vadd.f32 %v5964_v49, %v5611_v21  ;;  %v5635_v40 = vadd.f32 %v10444_v55, %v12574_v31  ;;  %10734 = vmatprep.mubr.bf16.mxu0 %v11252_v46 }
 0x26a   :  { %v10489_v57 = vpop.f32.mrf.mxu1  ;;  %v5626_v56 = vpop.f32.mrf.mxu0 }
 0x26b   :  { %v12687_v61 = vadd.f32 %v10489_v57, %v5622_v60  ;;  %v5627_v36 = vadd.f32 %v5626_v56, %v12582_v14  ;;  %v11259_v57 = vld [vmem:[#allocation2 + $0x328] sm:$0xff]  }
 0x26c   :  { %v5967_v1 = vpop.f32.mrf.mxu1  ;;  %v10445_v2 = vpop.f32.mrf.mxu0 }
 0x26d   :  { %v12690_v45 = vadd.f32 %v5967_v1, %v5614_v51  ;;  %v5638_v6 = vadd.f32 %v10445_v2, %v12588_v48 }
 0x26e   :  { %v10492_v23 = vpop.f32.mrf.mxu1  ;;  %10779 = vmatmul.mubr.bf16.gmra.mxu1 %v11251_v24  ;;  %v5629_v31 = vpop.f32.mrf.mxu0 }
 0x26f   :  { %v12693_v42 = vadd.f32 %v10492_v23, %v5635_v40  ;;  %v5630_v9 = vadd.f32 %v5629_v31, %v12593_v25  ;;  %10782 = vmatprep.mubr.bf16.mxu1 %v11253_v12  ;;  %v11258_v25 = vld [vmem:[#allocation2 + $0x218] sm:$0xff]  }
 0x270   :  { %v5980_v18 = vpop.f32.mrf.mxu1  ;;  %v10448_v13 = vpop.f32.mrf.mxu0  ;;  %10735 = vmatmul.mubr.bf16.gmra.mxu0 %v11254_v37 }
 0x271   :  { %v12696_v14 = vadd.f32 %v5980_v18, %v5627_v36  ;;  %v5651_v62 = vadd.f32 %v10448_v13, %v12596_v4  ;;  %10738 = vmatprep.mubr.bf16.mxu0 %v11256_v35 }
 0x272   :  { %v10493_v63 = vpop.f32.mrf.mxu1  ;;  %v5642_v48 = vpop.f32.mrf.mxu0 }
 0x273   :  { %v12699_v41 = vadd.f32 %v10493_v63, %v5638_v6  ;;  %v5643_v21 = vadd.f32 %v5642_v48, %v12604_v0 }
 0x274   :  { %v5983_v19 = vpop.f32.mrf.mxu1  ;;  %v10449_v44 = vpop.f32.mrf.mxu0 }
 0x275   :  { %v12702_v26 = vadd.f32 %v5983_v19, %v5630_v9  ;;  %v5654_v60 = vadd.f32 %v10449_v44, %v12610_v28 }
 0x276   :  { %v10496_v46 = vpop.f32.mrf.mxu1  ;;  %10783 = vmatmul.mubr.bf16.gmra.mxu1 %v11255_v34  ;;  %v5645_v38 = vpop.f32.mrf.mxu0 }
 0x277   :  { %v12705_v4 = vadd.f32 %v10496_v46, %v5651_v62  ;;  %v5646_v50 = vadd.f32 %v5645_v38, %v12615_v11  ;;  %10786 = vmatprep.mubr.bf16.mxu1 %v11257_v54 }
 0x278   :  { %v5996_v51 = vpop.f32.mrf.mxu1  ;;  %v10452_v49 = vpop.f32.mrf.mxu0  ;;  %10739 = vmatmul.mubr.bf16.gmra.mxu0 %v11258_v25 }
 0x279   :  { %v12708_v0 = vadd.f32 %v5996_v51, %v5643_v21  ;;  %v5667_v55 = vadd.f32 %v10452_v49, %v12618_v33 }
 0x27a   :  { %v10497_v40 = vpop.f32.mrf.mxu1  ;;  %v5658_v24 = vpop.f32.mrf.mxu0 }
 0x27b   :  { %v12711_v56 = vadd.f32 %v10497_v40, %v5654_v60  ;;  %v5659_v28 = vadd.f32 %v5658_v24, %v12622_v5 }
 0x27c   :  { %v5999_v36 = vpop.f32.mrf.mxu1  ;;  %v10453_v12 = vpop.f32.mrf.mxu0 }
 0x27d   :  { %v12714_v1 = vadd.f32 %v5999_v36, %v5646_v50  ;;  %v5670_v11 = vadd.f32 %v10453_v12, %v12627_v10 }
 0x27e   :  { %v10500_v2 = vpop.f32.mrf.mxu1  ;;  %10787 = vmatmul.mubr.bf16.gmra.mxu1 %v11259_v57  ;;  %v5661_v37 = vpop.f32.mrf.mxu0 }
 0x27f   :  { %v12717_v6 = vadd.f32 %v10500_v2, %v5667_v55  ;;  %v5662_v33 = vadd.f32 %v5661_v37, %v12630_v16 }
 0x280   :  { %v6012_v35 = vpop.f32.mrf.mxu1  ;;  %v10520_v23 = vpop.f32.mrf.mxu0 }
 0x281   :  { %v12720_v31 = vadd.f32 %v6012_v35, %v5659_v28  ;;  %v6414_v9 = vadd.f32 %v10520_v23, %v12633_v7 }
 0x282   :  { %v10501_v5 = vpop.f32.mrf.mxu1  ;;  %v6285_v18 = vpop.f32.mrf.mxu0 }
 0x283   :  { %v12723_v13 = vadd.f32 %v10501_v5, %v5670_v11  ;;  %v6412_v62 = vadd.f32 %v6285_v18, %v12636_v17 }
 0x284   :  { %v6015_v10 = vpop.f32.mrf.mxu1  ;;  %v10521_v63 = vpop.f32.mrf.mxu0 }
 0x285   :  { %v12726_v34 = vadd.f32 %v6015_v10, %v5662_v33  ;;  %v6415_v48 = vadd.f32 %v10521_v63, %v12639_v52 }
 0x286   :  { %v10568_v21 = vpop.f32.mrf.mxu1  ;;  %v6288_v16 = vpop.f32.mrf.mxu0 }
 0x287   :  { %v12729_v54 = vadd.f32 %v10568_v21, %v6414_v9  ;;  %v6413_v19 = vadd.f32 %v6288_v16, %v12642_v58 }
 0x288   :  { %v6670_v44 = vpop.f32.mrf.mxu1  ;;  %v10524_v7 = vpop.f32.mrf.mxu0 }
 0x289   :  { %v12732_v25 = vadd.f32 %v6670_v44, %v6412_v62  ;;  %v6418_v60 = vadd.f32 %v10524_v7, %v12645_v29 }
 0x28a   :  { %v10569_v46 = vpop.f32.mrf.mxu1  ;;  %v6301_v17 = vpop.f32.mrf.mxu0 }
 0x28b   :  { %v12735_v38 = vadd.f32 %v10569_v46, %v6415_v48  ;;  %v6416_v50 = vadd.f32 %v6301_v17, %v12648_v30 }
 0x28c   :  { %v6673_v51 = vpop.f32.mrf.mxu1  ;;  %v10525_v52 = vpop.f32.mrf.mxu0 }
 0x28d   :  { %v12738_v49 = vadd.f32 %v6673_v51, %v6413_v19  ;;  %v6419_v55 = vadd.f32 %v10525_v52, %v12651_v53 }
 0x28e   :  { %v10572_v40 = vpop.f32.mrf.mxu1  ;;  %v6304_v58 = vpop.f32.mrf.mxu0 }
 0x28f   :  { %v12741_v57 = vadd.f32 %v10572_v40, %v6418_v60  ;;  %v6417_v24 = vadd.f32 %v6304_v58, %v12654_v27 }
 0x290   :  { %v6686_v28 = vpop.f32.mrf.mxu1  ;;  %v10528_v29 = vpop.f32.mrf.mxu0 }
 0x291   :  { %v12744_v36 = vadd.f32 %v6686_v28, %v6416_v50  ;;  %v6422_v12 = vadd.f32 %v10528_v29, %v12657_v15 }
 0x292   :  { %v10573_v11 = vpop.f32.mrf.mxu1  ;;  %v6317_v30 = vpop.f32.mrf.mxu0 }
 0x293   :  { %v12747_v2 = vadd.f32 %v10573_v11, %v6419_v55  ;;  %v6420_v37 = vadd.f32 %v6317_v30, %v12660_v3 }
 0x294   :  { %v6689_v33 = vpop.f32.mrf.mxu1  ;;  %v10529_v53 = vpop.f32.mrf.mxu0 }
 0x295   :  { %v12750_v35 = vadd.f32 %v6689_v33, %v6417_v24  ;;  %v6423_v23 = vadd.f32 %v10529_v53, %v12663_v59 }
 0x296   :  { %v10576_v9 = vpop.f32.mrf.mxu1  ;;  %v6320_v27 = vpop.f32.mrf.mxu0 }
 0x297   :  { %v12753_v5 = vadd.f32 %v10576_v9, %v6422_v12  ;;  %v6421_v18 = vadd.f32 %v6320_v27, %v12666_v43 }
 0x298   :  { %v6702_v62 = vpop.f32.mrf.mxu1  ;;  %v10532_v15 = vpop.f32.mrf.mxu0 }
 0x299   :  { %v12756_v10 = vadd.f32 %v6702_v62, %v6420_v37  ;;  %v6426_v63 = vadd.f32 %v10532_v15, %v12669_v47 }
 0x29a   :  { %v10577_v48 = vpop.f32.mrf.mxu1  ;;  %v6333_v3 = vpop.f32.mrf.mxu0 }
 0x29b   :  { %v12759_v21 = vadd.f32 %v10577_v48, %v6423_v23  ;;  %v6424_v16 = vadd.f32 %v6333_v3, %v12672_v32 }
 0x29c   :  { %v6705_v19 = vpop.f32.mrf.mxu1  ;;  %v10533_v59 = vpop.f32.mrf.mxu0 }
 0x29d   :  { %v12762_v44 = vadd.f32 %v6705_v19, %v6421_v18  ;;  %v6427_v7 = vadd.f32 %v10533_v59, %v12675_v20 }
 0x29e   :  { %v10580_v60 = vpop.f32.mrf.mxu1  ;;  %v6336_v43 = vpop.f32.mrf.mxu0 }
 0x29f   :  { %v12765_v46 = vadd.f32 %v10580_v60, %v6426_v63  ;;  %v6425_v17 = vadd.f32 %v6336_v43, %v12678_v22 }
 0x2a0   :  { %v6718_v50 = vpop.f32.mrf.mxu1  ;;  %v10536_v47 = vpop.f32.mrf.mxu0 }
 0x2a1   :  { %v12768_v51 = vadd.f32 %v6718_v50, %v6424_v16  ;;  %v6430_v52 = vadd.f32 %v10536_v47, %v12681_v39 }
 0x2a2   :  { %v10581_v55 = vpop.f32.mrf.mxu1  ;;  %v6349_v32 = vpop.f32.mrf.mxu0 }
 0x2a3   :  { %v12771_v40 = vadd.f32 %v10581_v55, %v6427_v7  ;;  %v6428_v58 = vadd.f32 %v6349_v32, %v12684_v8 }
 0x2a4   :  { %v6721_v24 = vpop.f32.mrf.mxu1  ;;  %v10537_v20 = vpop.f32.mrf.mxu0 }
 0x2a5   :  { %v12774_v28 = vadd.f32 %v6721_v24, %v6425_v17  ;;  %v6431_v29 = vadd.f32 %v10537_v20, %v12687_v61 }
 0x2a6   :  { %v10584_v12 = vpop.f32.mrf.mxu1  ;;  %v6352_v22 = vpop.f32.mrf.mxu0 }
 0x2a7   :  { %v12777_v11 = vadd.f32 %v10584_v12, %v6430_v52  ;;  %v6429_v30 = vadd.f32 %v6352_v22, %v12690_v45 }
 0x2a8   :  { %v6734_v37 = vpop.f32.mrf.mxu1  ;;  %v10540_v39 = vpop.f32.mrf.mxu0 }
 0x2a9   :  { %v12780_v33 = vadd.f32 %v6734_v37, %v6428_v58  ;;  %v6434_v53 = vadd.f32 %v10540_v39, %v12693_v42 }
 0x2aa   :  { %v10585_v23 = vpop.f32.mrf.mxu1  ;;  %v6365_v8 = vpop.f32.mrf.mxu0 }
 0x2ab   :  { %v12783_v9 = vadd.f32 %v10585_v23, %v6431_v29  ;;  %v6432_v27 = vadd.f32 %v6365_v8, %v12696_v14 }
 0x2ac   :  { %v6737_v18 = vpop.f32.mrf.mxu1  ;;  %v10541_v61 = vpop.f32.mrf.mxu0 }
 0x2ad   :  { %v12786_v62 = vadd.f32 %v6737_v18, %v6429_v30  ;;  %v6435_v15 = vadd.f32 %v10541_v61, %v12699_v41 }
 0x2ae   :  { %v10588_v63 = vpop.f32.mrf.mxu1  ;;  %v6368_v45 = vpop.f32.mrf.mxu0 }
 0x2af   :  { %v12789_v48 = vadd.f32 %v10588_v63, %v6434_v53  ;;  %v6433_v3 = vadd.f32 %v6368_v45, %v12702_v26 }
 0x2b0   :  { %v6750_v16 = vpop.f32.mrf.mxu1  ;;  %v10544_v42 = vpop.f32.mrf.mxu0 }
 0x2b1   :  { %v12792_v19 = vadd.f32 %v6750_v16, %v6432_v27  ;;  %v6438_v59 = vadd.f32 %v10544_v42, %v12705_v4 }
 0x2b2   :  { %v10589_v7 = vpop.f32.mrf.mxu1  ;;  %v6381_v14 = vpop.f32.mrf.mxu0 }
 0x2b3   :  { %v12795_v60 = vadd.f32 %v10589_v7, %v6435_v15  ;;  %v6436_v43 = vadd.f32 %v6381_v14, %v12708_v0 }
 0x2b4   :  { %v6753_v17 = vpop.f32.mrf.mxu1  ;;  %v10545_v41 = vpop.f32.mrf.mxu0 }
 0x2b5   :  { %v12798_v50 = vadd.f32 %v6753_v17, %v6433_v3  ;;  %v6439_v47 = vadd.f32 %v10545_v41, %v12711_v56 }
 0x2b6   :  { %v10592_v52 = vpop.f32.mrf.mxu1  ;;  %v6384_v26 = vpop.f32.mrf.mxu0 }
 0x2b7   :  { %v12801_v55 = vadd.f32 %v10592_v52, %v6438_v59  ;;  %v6437_v32 = vadd.f32 %v6384_v26, %v12714_v1 }
 0x2b8   :  { %v6766_v58 = vpop.f32.mrf.mxu1  ;;  %v10548_v4 = vpop.f32.mrf.mxu0 }
 0x2b9   :  { %v12804_v24 = vadd.f32 %v6766_v58, %v6436_v43  ;;  %v6442_v20 = vadd.f32 %v10548_v4, %v12717_v6 }
 0x2ba   :  { %v10593_v29 = vpop.f32.mrf.mxu1  ;;  %v6397_v0 = vpop.f32.mrf.mxu0 }
 0x2bb   :  { %v12807_v12 = vadd.f32 %v10593_v29, %v6439_v47  ;;  %v6440_v22 = vadd.f32 %v6397_v0, %v12720_v31 }
 0x2bc   :  { %v6769_v30 = vpop.f32.mrf.mxu1  ;;  %v10549_v56 = vpop.f32.mrf.mxu0 }
 0x2bd   :  { %13179 = vst [vmem:[#allocation19_spill] sm:$0xff] %v12807_v12  ;;  %v12810_v37 = vadd.f32 %v6769_v30, %v6437_v32  ;;  %v6443_v39 = vadd.f32 %v10549_v56, %v12723_v13 }
 0x2be   :  { %v10596_v53 = vpop.f32.mrf.mxu1  ;;  %v6400_v1 = vpop.f32.mrf.mxu0 }
 0x2bf   :  { %13180 = vst [vmem:[#allocation21_spill] sm:$0xff] %v12810_v37  ;;  %v12813_v23 = vadd.f32 %v10596_v53, %v6442_v20  ;;  %v6441_v8 = vadd.f32 %v6400_v1, %v12726_v34 }
 0x2c0   :  { %v6782_v27 = vpop.f32.mrf.mxu1  ;;  %v10616_v6 = vpop.f32.mrf.mxu0 }
 0x2c1   :  { %v12816_v18 = vadd.f32 %v6782_v27, %v6440_v22  ;;  %v7184_v61 = vadd.f32 %v10616_v6, %v12729_v54 }
 0x2c2   :  { %v10597_v15 = vpop.f32.mrf.mxu1  ;;  %v7055_v31 = vpop.f32.mrf.mxu0 }
 0x2c3   :  { %v12819_v63 = vadd.f32 %v10597_v15, %v6443_v39  ;;  %v7182_v45 = vadd.f32 %v7055_v31, %v12732_v25 }
 0x2c4   :  { %v6785_v3 = vpop.f32.mrf.mxu1  ;;  %v12822_v13 = vpop.f32.mrf.mxu0 }
 0x2c5   :  { %13181 = vst [vmem:[#allocation12_spill] sm:$0xff] %v12819_v63  ;;  %v12824_v16 = vadd.f32 %v6785_v3, %v6441_v8 }
 0x2c6   :  { %v10664_v42 = vpop.f32.mrf.mxu1  ;;  %v12826_v59 = vpop.f32.mrf.mxu0 }
 0x2c7   :  { %13182 = vst [vmem:[#allocation22_spill] sm:$0xff] %v12824_v16  ;;  %v12828_v34 = vadd.f32 %v10664_v42, %v7184_v61 }
 0x2c8   :  { %v7441_v7 = vpop.f32.mrf.mxu1  ;;  %v10620_v14 = vpop.f32.mrf.mxu0 }
 0x2c9   :  { %v12830_v43 = vadd.f32 %v7441_v7, %v7182_v45  ;;  %v7188_v54 = vadd.f32 %v10620_v14, %v12741_v57 }
 0x2ca   :  { %v12833_v17 = vpop.f32.mrf.mxu1  ;;  %v7071_v41 = vpop.f32.mrf.mxu0 }
 0x2cb   :  { %v7186_v25 = vadd.f32 %v7071_v41, %v12744_v36 }
 0x2cc   :  { %v12836_v47 = vpop.f32.mrf.mxu1  ;;  %v12838_v52 = vpop.f32.mrf.mxu0 }
 0x2ce   :  { %v10668_v26 = vpop.f32.mrf.mxu1  ;;  %v12840_v32 = vpop.f32.mrf.mxu0 }
 0x2cf   :  { %v12842_v58 = vadd.f32 %v10668_v26, %v7188_v54 }
 0x2d0   :  { %v7457_v4 = vpop.f32.mrf.mxu1  ;;  %v10624_v20 = vpop.f32.mrf.mxu0 }
 0x2d1   :  { %v12844_v29 = vadd.f32 %v7457_v4, %v7186_v25  ;;  %v7192_v57 = vadd.f32 %v10624_v20, %v12753_v5 }
 0x2d2   :  { %v12847_v0 = vpop.f32.mrf.mxu1  ;;  %v7087_v22 = vpop.f32.mrf.mxu0 }
 0x2d3   :  { %v7190_v36 = vadd.f32 %v7087_v22, %v12756_v10 }
 0x2d4   :  { %v12850_v30 = vpop.f32.mrf.mxu1  ;;  %v12852_v56 = vpop.f32.mrf.mxu0 }
 0x2d6   :  { %v10672_v39 = vpop.f32.mrf.mxu1  ;;  %v12854_v53 = vpop.f32.mrf.mxu0 }
 0x2d7   :  { %v12856_v1 = vadd.f32 %v10672_v39, %v7192_v57 }
 0x2d8   :  { %v7473_v8 = vpop.f32.mrf.mxu1  ;;  %v10628_v27 = vpop.f32.mrf.mxu0 }
 0x2d9   :  { %v12858_v6 = vadd.f32 %v7473_v8, %v7190_v36  ;;  %v7196_v5 = vadd.f32 %v10628_v27, %v12765_v46 }
 0x2da   :  { %v12861_v61 = vpop.f32.mrf.mxu1  ;;  %v7103_v15 = vpop.f32.mrf.mxu0 }
 0x2db   :  { %v7194_v10 = vadd.f32 %v7103_v15, %v12768_v51 }
 0x2dc   :  { %v12864_v31 = vpop.f32.mrf.mxu1  ;;  %v12866_v45 = vpop.f32.mrf.mxu0 }
 0x2de   :  { %v10676_v3 = vpop.f32.mrf.mxu1  ;;  %v12868_v42 = vpop.f32.mrf.mxu0 }
 0x2df   :  { %v12870_v7 = vadd.f32 %v10676_v3, %v7196_v5 }
 0x2e0   :  { %v7489_v14 = vpop.f32.mrf.mxu1  ;;  %v10632_v54 = vpop.f32.mrf.mxu0 }
 0x2e1   :  { %v12872_v41 = vadd.f32 %v7489_v14, %v7194_v10  ;;  %v7200_v46 = vadd.f32 %v10632_v54, %v12777_v11 }
 0x2e2   :  { %v12875_v25 = vpop.f32.mrf.mxu1  ;;  %v7119_v26 = vpop.f32.mrf.mxu0 }
 0x2e3   :  { %v7198_v51 = vadd.f32 %v7119_v26, %v12780_v33 }
 0x2e4   :  { %v12878_v4 = vpop.f32.mrf.mxu1  ;;  %v12880_v20 = vpop.f32.mrf.mxu0 }
 0x2e6   :  { %v10680_v57 = vpop.f32.mrf.mxu1  ;;  %v12882_v22 = vpop.f32.mrf.mxu0 }
 0x2e7   :  { %v12884_v36 = vadd.f32 %v10680_v57, %v7200_v46 }
 0x2e8   :  { %v7505_v39 = vpop.f32.mrf.mxu1  ;;  %v10636_v8 = vpop.f32.mrf.mxu0 }
 0x2e9   :  { %v12886_v27 = vadd.f32 %v7505_v39, %v7198_v51  ;;  %v7204_v11 = vadd.f32 %v10636_v8, %v12789_v48 }
 0x2ea   :  { %v12889_v5 = vpop.f32.mrf.mxu1  ;;  %v7135_v15 = vpop.f32.mrf.mxu0 }
 0x2eb   :  { %v7202_v33 = vadd.f32 %v7135_v15, %v12792_v19 }
 0x2ec   :  { %v12892_v10 = vpop.f32.mrf.mxu1  ;;  %v12894_v3 = vpop.f32.mrf.mxu0 }
 0x2ee   :  { %v10684_v14 = vpop.f32.mrf.mxu1  ;;  %v12896_v54 = vpop.f32.mrf.mxu0 }
 0x2ef   :  { %v12898_v46 = vadd.f32 %v10684_v14, %v7204_v11 }
 0x2f0   :  { %v7521_v26 = vpop.f32.mrf.mxu1  ;;  %v10640_v57 = vpop.f32.mrf.mxu0 }
 0x2f1   :  { %v12900_v51 = vadd.f32 %v7521_v26, %v7202_v33  ;;  %v7208_v48 = vadd.f32 %v10640_v57, %v12801_v55 }
 0x2f2   :  { %v12903_v39 = vpop.f32.mrf.mxu1  ;;  %v7151_v8 = vpop.f32.mrf.mxu0 }
 0x2f3   :  { %13183 = vst [vmem:[#allocation20_spill] sm:$0xff] %v12900_v51  ;;  %v7206_v19 = vadd.f32 %v7151_v8, %v12804_v24 }
 0x2f4   :  { %v12906_v15 = vpop.f32.mrf.mxu1  ;;  %v12908_v16 = vpop.f32.mrf.mxu0 }
 0x2f5   :  { %13184 = vst [vmem:[#allocation23_spill] sm:$0xff] %v12906_v15  ;;  %13185 = vst [vmem:[#allocation13_spill] sm:$0xff] %v12908_v16 }
 0x2f6   :  { %v10688_v63 = vpop.f32.mrf.mxu1  ;;  %v12910_v37 = vpop.f32.mrf.mxu0 }
 0x2f7   :  { %v12912_v11 = vadd.f32 %v10688_v63, %v7208_v48 }
 0x2f8   :  { %v7537_v14 = vpop.f32.mrf.mxu1  ;;  %v10644_v12 = vpop.f32.mrf.mxu0 }
 0x2f9   :  { %13186 = vst [vmem:[#allocation26_spill] sm:$0xff] %v12912_v11  ;;  %v12914_v33 = vadd.f32 %v7537_v14, %v7206_v19  ;;  %v7212_v55 = vadd.f32 %v10644_v12, %v12813_v23  ;;  %v7185_v19 = vadd.f32 %v12822_v13, %v12735_v38 }
 0x2fa   :  { %v12917_v26 = vpop.f32.mrf.mxu1  ;;  %v7167_v57 = vpop.f32.mrf.mxu0 }
 0x2fb   :  { %13187 = vst [vmem:[#allocation24_spill] sm:$0xff] %v12914_v33  ;;  %v7210_v24 = vadd.f32 %v7167_v57, %v12816_v18  ;;  %v7183_v18 = vadd.f32 %v12826_v59, %v12738_v49 }
 0x2fc   :  { %v12920_v8 = vpop.f32.mrf.mxu1  ;;  %v12922_v51 = vpop.f32.mrf.mxu0 }
 0x2fd   :  { %13188 = vst [vmem:[#allocation27_spill] sm:$0xff] %v12922_v51  ;;  %v7569_v38 = vadd.f32 %v12836_v47, %v7183_v18  ;;  %v12950_v47 = vld [vmem:[%s13043_s2] ss:$0 sm:$0xff]  ;;  %s11332_s2 = smov [#allocation8]  }
 0x2fe   :  { %v10692_v16 = vpop.f32.mrf.mxu1  ;;  %v12924_v15 = vpop.f32.mrf.mxu0  ;;  %s8570_s26 = sshll.u32 %s11332_s2, 4  ;;  %s8571_s26 = int_to_ptr.vmem [resolvable:$true] %s8570_s26 }
 0x2ff   :  { %13189 = vst [vmem:[#allocation14_spill] sm:$0xff] %v12924_v15  ;;  %v12926_v63 = vadd.f32 %v10692_v16, %v7212_v55  ;;  %v7571_v15 = vadd.f32 %v12833_v17, %v7185_v19  ;;  %s11301_s27 = scalar_lea.vmem %s8571_s26, 4096  ;;  %p11306_p11 = scmp.lt.s32.totalorder %s8571_s26, %s8571_s26 }
 0x300   :  { %v7553_v48 = vpop.f32.mrf.mxu1  ;;  %v10712_v11 = vpop.f32.mrf.mxu0  ;;  %p11302_p10 = scmp.ne.s32.totalorder %s8571_s26, %s11301_s27  ;;  %p11307_p12 = scmp.lt.s32.totalorder %s11301_s27, %s11301_s27 }
 0x301   :  { %13190 = vst [vmem:[#allocation28_spill] sm:$0xff] %v12926_v63  ;;  %v12930_v12 = vadd.f32 %v7553_v48, %v7210_v24  ;;  %v7956_v16 = vadd.f32 %v10712_v11, %v12828_v34  ;;  %v7189_v24 = vadd.f32 %v12838_v52, %v12747_v2 }
 0x302   :  { %v12932_v23 = vpop.f32.mrf.mxu1  ;;  %v7827_v14 = vpop.f32.mrf.mxu0  ;;  %p11308_p13 = por %p11307_p12, %p11306_p11 }
 0x303   :  { %13191 = vst [vmem:[#allocation25_spill] sm:$0xff] %v12930_v12  ;;  %13192 = vst [vmem:[#allocation29_spill] sm:$0xff] %v12932_v23  ;;  %v7954_v63 = vadd.f32 %v7827_v14, %v12830_v43  ;;  %v7575_v43 = vadd.f32 %v12847_v0, %v7189_v24 }
 0x304   :  { %v12936_v57 = vpop.f32.mrf.mxu1  ;;  %v10713_v51 = vpop.f32.mrf.mxu0  ;;  %p11309_p0 = pnand %p11308_p13, %p11302_p10 }
 0x305   :  { %13193 = vst [vmem:[#allocation15_spill] sm:$0xff] %v12936_v57  ;;  %v7957_v13 = vadd.f32 %v10713_v51, %v7571_v15  ;;  %v7187_v57 = vadd.f32 %v12840_v32, %v12750_v35 }
 0x306   :  { %v10760_v55 = vpop.f32.mrf.mxu1  ;;  %v7830_v33 = vpop.f32.mrf.mxu0 }
 0x307   :  { %v8342_v49 = vadd.f32 %v10760_v55, %v7956_v16  ;;  %v7955_v59 = vadd.f32 %v7830_v33, %v7569_v38  ;;  %v7573_v32 = vadd.f32 %v12850_v30, %v7187_v57  ;;  %v7193_v38 = vadd.f32 %v12852_v56, %v12759_v21 }
 0x308   :  { %v8213_v48 = vpop.f32.mrf.mxu1  ;;  %v10716_v12 = vpop.f32.mrf.mxu0  ;;  %v7191_v30 = vadd.f32 %v12854_v53, %v12762_v44 }
 0x309   :  { %v8340_v17 = vadd.f32 %v8213_v48, %v7954_v63  ;;  %v8374_v2 = vadd.f32 %v12950_v47, %v8342_v49  ;;  %v7960_v35 = vadd.f32 %v10716_v12, %v12842_v58 }
 0x30a   :  { %v10761_v19 = vpop.f32.mrf.mxu1  ;;  %v7843_v34 = vpop.f32.mrf.mxu0 }
 0x30b   :  { %v8343_v11 = vadd.f32 %v10761_v19, %v7957_v13  ;;  %v8372_v15 = vadd.f32 %v12950_v47, %v8340_v17  ;;  %v7958_v16 = vadd.f32 %v7843_v34, %v12844_v29  ;;  %v7579_v29 = vadd.f32 %v12861_v61, %v7193_v38 }
 0x30c   :  { %v8216_v14 = vpop.f32.mrf.mxu1  ;;  %v10717_v23 = vpop.f32.mrf.mxu0 }
 0x30d   :  { %v8375_v52 = vadd.f32 %v12950_v47, %v8343_v11  ;;  %v8341_v51 = vadd.f32 %v8216_v14, %v7955_v59  ;;  %v7961_v55 = vadd.f32 %v10717_v23, %v7575_v43  ;;  %v7577_v43 = vadd.f32 %v12864_v31, %v7191_v30 }
 0x30e   :  { %v10764_v33 = vpop.f32.mrf.mxu1  ;;  %v7846_v0 = vpop.f32.mrf.mxu0  ;;  %v7195_v31 = vadd.f32 %v12868_v42, %v12774_v28 }
 0x30f   :  { %v9392_v63 = vpack.c.bf16 %v8375_v52, %v8374_v2  ;;  %v8373_v18 = vadd.f32 %v12950_v47, %v8341_v51  ;;  %v8346_v58 = vadd.f32 %v10764_v33, %v7960_v35  ;;  %v7959_v12 = vadd.f32 %v7846_v0, %v7573_v32 }
 0x310   :  { %v8229_v13 = vpop.f32.mrf.mxu1  ;;  %v10720_v24 = vpop.f32.mrf.mxu0  ;;  %v7197_v35 = vadd.f32 %v12866_v45, %v12771_v40 }
 0x311   :  { %9479 = vst [vmem:[#allocation8 + $0x88] sm:$0xff] %v9392_v63   ;;  %v9387_v48 = vpack.c.bf16 %v8373_v18, %v8372_v15  ;;  %v8344_v59 = vadd.f32 %v8229_v13, %v7958_v16  ;;  %v8378_v21 = vadd.f32 %v12950_v47, %v8346_v58  ;;  %v7964_v11 = vadd.f32 %v10720_v24, %v12856_v1 }
 0x312   :  { %v10765_v57 = vpop.f32.mrf.mxu1  ;;  %v7859_v49 = vpop.f32.mrf.mxu0  ;;  %v7581_v58 = vadd.f32 %v12878_v4, %v7195_v31  ;;  %v7199_v4 = vadd.f32 %v12882_v22, %v12786_v62 }
 0x313   :  { %9388 = vst [vmem:[#allocation8 + $0x80] sm:$0xff] %v9387_v48   ;;  %v8347_v17 = vadd.f32 %v10765_v57, %v7961_v55  ;;  %v7962_v44 = vadd.f32 %v7859_v49, %v12858_v6  ;;  %v8376_v2 = vadd.f32 %v12950_v47, %v8344_v59  ;;  %v7583_v55 = vadd.f32 %v12875_v25, %v7197_v35 }
 0x314   :  { %v8232_v23 = vpop.f32.mrf.mxu1  ;;  %v10721_v19 = vpop.f32.mrf.mxu0  ;;  %v7201_v59 = vadd.f32 %v12880_v20, %v12783_v9 }
 0x315   :  { %v8379_v56 = vadd.f32 %v12950_v47, %v8347_v17  ;;  %v8345_v34 = vadd.f32 %v8232_v23, %v7959_v12  ;;  %v7965_v51 = vadd.f32 %v10721_v19, %v7579_v29 }
 0x316   :  { %v10768_v14 = vpop.f32.mrf.mxu1  ;;  %v7862_v53 = vpop.f32.mrf.mxu0 }
 0x317   :  { %v9402_v52 = vpack.c.bf16 %v8379_v56, %v8378_v21  ;;  %v8377_v61 = vadd.f32 %v12950_v47, %v8345_v34  ;;  %v8350_v1 = vadd.f32 %v10768_v14, %v7964_v11  ;;  %v7963_v0 = vadd.f32 %v7862_v53, %v7577_v43 }
 0x318   :  { %v8245_v32 = vpop.f32.mrf.mxu1  ;;  %v10724_v15 = vpop.f32.mrf.mxu0 }
 0x319   :  { %9481 = vst [vmem:[#allocation8 + $0x98] sm:$0xff] %v9402_v52   ;;  %v9397_v33 = vpack.c.bf16 %v8377_v61, %v8376_v2  ;;  %v8348_v6 = vadd.f32 %v8245_v32, %v7962_v44  ;;  %v8382_v40 = vadd.f32 %v12950_v47, %v8350_v1  ;;  %v7968_v48 = vadd.f32 %v10724_v15, %v12870_v7 }
 0x31a   :  { %v10769_v63 = vpop.f32.mrf.mxu1  ;;  %v7875_v18 = vpop.f32.mrf.mxu0  ;;  %v7585_v2 = vadd.f32 %v12892_v10, %v7199_v4  ;;  %v7205_v32 = vadd.f32 %v12894_v3, %v12795_v60  ;;  %v7203_v10 = vadd.f32 %v12896_v54, %v12798_v50 }
 0x31b   :  { %9480 = vst [vmem:[#allocation8 + $0x90] sm:$0xff] %v9397_v33   ;;  %v8351_v16 = vadd.f32 %v10769_v63, %v7965_v51  ;;  %v8380_v28 = vadd.f32 %v12950_v47, %v8348_v6  ;;  %v7966_v25 = vadd.f32 %v7875_v18, %v12872_v41  ;;  %v7587_v41 = vadd.f32 %v12889_v5, %v7201_v59 }
 0x31c   :  { %v8248_v38 = vpop.f32.mrf.mxu1  ;;  %v10725_v13 = vpop.f32.mrf.mxu0  ;;  %v7591_v18 = vadd.f32 %v12903_v39, %v7205_v32 }
 0x31d   :  { %v8383_v45 = vadd.f32 %v12950_v47, %v8351_v16  ;;  %v8349_v24 = vadd.f32 %v8248_v38, %v7963_v0  ;;  %v7969_v49 = vadd.f32 %v10725_v13, %v7583_v55 }
 0x31e   :  { %v10772_v42 = vpop.f32.mrf.mxu1  ;;  %v7878_v12 = vpop.f32.mrf.mxu0 }
 0x31f   :  { %v9412_v30 = vpack.c.bf16 %v8383_v45, %v8382_v40  ;;  %v8381_v57 = vadd.f32 %v12950_v47, %v8349_v24  ;;  %v8354_v7 = vadd.f32 %v10772_v42, %v7968_v48  ;;  %v7967_v19 = vadd.f32 %v7878_v12, %v7581_v58  ;;  %v13194_v40 = vld [vmem:[#allocation23_spill] sm:$0xff] }
 0x320   :  { %v8261_v17 = vpop.f32.mrf.mxu1  ;;  %v10728_v29 = vpop.f32.mrf.mxu0  ;;  %v7589_v45 = vadd.f32 %v13194_v40, %v7203_v10  ;;  %v13196_v12 = vld [vmem:[#allocation19_spill] sm:$0xff]  ;;  %v13206_v40 = vld [vmem:[#allocation28_spill] sm:$0xff] }
 0x321   :  { %9483 = vst [vmem:[#allocation8 + $0xa8] sm:$0xff] %v9412_v30   ;;  %v9407_v23 = vpack.c.bf16 %v8381_v57, %v8380_v28  ;;  %v8352_v34 = vadd.f32 %v8261_v17, %v7966_v25  ;;  %v8386_v9 = vadd.f32 %v12950_v47, %v8354_v7  ;;  %v7972_v53 = vadd.f32 %v10728_v29, %v12884_v36  ;;  %v13195_v28 = vld [vmem:[#allocation20_spill] sm:$0xff]  ;;  %v13197_v30 = vld [vmem:[#allocation13_spill] sm:$0xff] }
 0x322   :  { %v10773_v21 = vpop.f32.mrf.mxu1  ;;  %v7891_v56 = vpop.f32.mrf.mxu0  ;;  %v7209_v57 = vadd.f32 %v13197_v30, %v13196_v12  ;;  %v13198_v29 = vld [vmem:[#allocation21_spill] sm:$0xff] }
 0x323   :  { %9482 = vst [vmem:[#allocation8 + $0xa0] sm:$0xff] %v9407_v23   ;;  %v8355_v11 = vadd.f32 %v10773_v21, %v7969_v49  ;;  %v7970_v62 = vadd.f32 %v7891_v56, %v12886_v27  ;;  %v8384_v61 = vadd.f32 %v12950_v47, %v8352_v34  ;;  %v7207_v23 = vadd.f32 %v12910_v37, %v13198_v29  ;;  %v13200_v37 = vld [vmem:[#allocation24_spill] sm:$0xff] }
 0x324   :  { %v8264_v43 = vpop.f32.mrf.mxu1  ;;  %v10729_v14 = vpop.f32.mrf.mxu0  ;;  %v7595_v56 = vadd.f32 %v12917_v26, %v7209_v57 }
 0x325   :  { %v8387_v20 = vadd.f32 %v12950_v47, %v8355_v11  ;;  %v8353_v44 = vadd.f32 %v8264_v43, %v7967_v19  ;;  %v7973_v35 = vadd.f32 %v10729_v14, %v7587_v41 }
 0x326   :  { %v10776_v52 = vpop.f32.mrf.mxu1  ;;  %v7894_v22 = vpop.f32.mrf.mxu0 }
 0x327   :  { %v9422_v51 = vpack.c.bf16 %v8387_v20, %v8386_v9  ;;  %v8385_v5 = vadd.f32 %v12950_v47, %v8353_v44  ;;  %v8358_v36 = vadd.f32 %v10776_v52, %v7972_v53  ;;  %v7971_v0 = vadd.f32 %v7894_v22, %v7585_v2  ;;  %v13199_v9 = vld [vmem:[#allocation26_spill] sm:$0xff] }
 0x328   :  { %v8277_v15 = vpop.f32.mrf.mxu1  ;;  %v10732_v33 = vpop.f32.mrf.mxu0  ;;  %v7593_v44 = vadd.f32 %v12920_v8, %v7207_v23  ;;  %v13203_v8 = vld [vmem:[#allocation22_spill] sm:$0xff] }
 0x329   :  { %9485 = vst [vmem:[#allocation8 + $0xb8] sm:$0xff] %v9422_v51   ;;  %v9417_v1 = vpack.c.bf16 %v8385_v5, %v8384_v61  ;;  %v8356_v27 = vadd.f32 %v8277_v15, %v7970_v62  ;;  %v8390_v60 = vadd.f32 %v12950_v47, %v8358_v36  ;;  %v7976_v13 = vadd.f32 %v10732_v33, %v12898_v46  ;;  %v13201_v51 = vld [vmem:[#allocation12_spill] sm:$0xff]  ;;  %v13202_v5 = vld [vmem:[#allocation27_spill] sm:$0xff] }
 0x32a   :  { %v10777_v31 = vpop.f32.mrf.mxu1  ;;  %v7907_v6 = vpop.f32.mrf.mxu0 }
 0x32b   :  { %9484 = vst [vmem:[#allocation8 + $0xb0] sm:$0xff] %v9417_v1   ;;  %v8359_v63 = vadd.f32 %v10777_v31, %v7973_v35  ;;  %v8388_v50 = vadd.f32 %v12950_v47, %v8356_v27  ;;  %v7974_v39 = vadd.f32 %v7907_v6, %v13195_v28  ;;  %v7213_v35 = vadd.f32 %v13202_v5, %v13201_v51 }
 0x32c   :  { %v8280_v16 = vpop.f32.mrf.mxu1  ;;  %v10733_v55 = vpop.f32.mrf.mxu0 }
 0x32d   :  { %v8391_v3 = vadd.f32 %v12950_v47, %v8359_v63  ;;  %v8357_v38 = vadd.f32 %v8280_v16, %v7971_v0  ;;  %v7977_v42 = vadd.f32 %v10733_v55, %v7591_v18  ;;  %v13204_v0 = vld [vmem:[#allocation14_spill] sm:$0xff]  ;;  %v13205_v18 = vld [vmem:[#allocation29_spill] sm:$0xff] }
 0x32e   :  { %v10780_v54 = vpop.f32.mrf.mxu1  ;;  %v7910_v24 = vpop.f32.mrf.mxu0  ;;  %v7211_v10 = vadd.f32 %v13204_v0, %v13203_v8  ;;  %v7599_v16 = vadd.f32 %v13205_v18, %v7213_v35 }
 0x32f   :  { %v9432_v48 = vpack.c.bf16 %v8391_v3, %v8390_v60  ;;  %v8389_v58 = vadd.f32 %v12950_v47, %v8357_v38  ;;  %v8362_v46 = vadd.f32 %v10780_v54, %v7976_v13  ;;  %v7975_v17 = vadd.f32 %v7910_v24, %v7589_v45 }
 0x330   :  { %v8293_v25 = vpop.f32.mrf.mxu1  ;;  %v10736_v49 = vpop.f32.mrf.mxu0 }
 0x331   :  { %9487 = vst [vmem:[#allocation8 + $0xc8] sm:$0xff] %v9432_v48   ;;  %v9427_v59 = vpack.c.bf16 %v8389_v58, %v8388_v50  ;;  %v8360_v4 = vadd.f32 %v8293_v25, %v7974_v39  ;;  %v8394_v41 = vadd.f32 %v12950_v47, %v8362_v46  ;;  %v7980_v20 = vadd.f32 %v10736_v49, %v13199_v9  ;;  %v13207_v50 = vld [vmem:[#allocation15_spill] sm:$0xff] }
 0x332   :  { %v10781_v7 = vpop.f32.mrf.mxu1  ;;  %v7923_v19 = vpop.f32.mrf.mxu0  ;;  %v7597_v54 = vadd.f32 %v13207_v50, %v7211_v10 }
 0x333   :  { %9486 = vst [vmem:[#allocation8 + $0xc0] sm:$0xff] %v9427_v59   ;;  %v8363_v21 = vadd.f32 %v10781_v7, %v7977_v42  ;;  %v7978_v2 = vadd.f32 %v7923_v19, %v13200_v37  ;;  %v8392_v62 = vadd.f32 %v12950_v47, %v8360_v4  ;;  %v13208_v42 = vld [vmem:[#allocation25_spill] sm:$0xff] }
 0x334   :  { %v8296_v34 = vpop.f32.mrf.mxu1  ;;  %v10737_v11 = vpop.f32.mrf.mxu0 }
 0x335   :  { %v8395_v43 = vadd.f32 %v12950_v47, %v8363_v21  ;;  %v8361_v14 = vadd.f32 %v8296_v34, %v7975_v17  ;;  %v7981_v61 = vadd.f32 %v10737_v11, %v7595_v56 }
 0x336   :  { %v10784_v53 = vpop.f32.mrf.mxu1  ;;  %v7926_v52 = vpop.f32.mrf.mxu0 }
 0x337   :  { %v9442_v22 = vpack.c.bf16 %v8395_v43, %v8394_v41  ;;  %v8393_v26 = vadd.f32 %v12950_v47, %v8361_v14  ;;  %v8366_v1 = vadd.f32 %v10784_v53, %v7980_v20  ;;  %v7979_v36 = vadd.f32 %v7926_v52, %v7593_v44 }
 0x338   :  { %v8309_v32 = vpop.f32.mrf.mxu1  ;;  %v10740_v15 = vpop.f32.mrf.mxu0 }
 0x339   :  { %9489 = vst [vmem:[#allocation8 + $0xd8] sm:$0xff] %v9442_v22   ;;  %v9437_v33 = vpack.c.bf16 %v8393_v26, %v8392_v62  ;;  %v8364_v27 = vadd.f32 %v8309_v32, %v7978_v2  ;;  %v8398_v3 = vadd.f32 %v12950_v47, %v8366_v1  ;;  %v7984_v45 = vadd.f32 %v10740_v15, %v13206_v40 }
 0x33a   :  { %v10785_v31 = vpop.f32.mrf.mxu1  ;;  %v7939_v6 = vpop.f32.mrf.mxu0 }
 0x33b   :  { %9488 = vst [vmem:[#allocation8 + $0xd0] sm:$0xff] %v9437_v33   ;;  %v8367_v63 = vadd.f32 %v10785_v31, %v7981_v61  ;;  %v8396_v24 = vadd.f32 %v12950_v47, %v8364_v27  ;;  %v7982_v12 = vadd.f32 %v7939_v6, %v13208_v42 }
 0x33c   :  { %v8312_v55 = vpop.f32.mrf.mxu1  ;;  %v10741_v60 = vpop.f32.mrf.mxu0 }
 0x33d   :  { %v8399_v38 = vadd.f32 %v12950_v47, %v8367_v63  ;;  %v8365_v13 = vadd.f32 %v8312_v55, %v7979_v36  ;;  %v7985_v30 = vadd.f32 %v10741_v60, %v7599_v16 }
 0x33e   :  { %v10788_v48 = vpop.f32.mrf.mxu1  ;;  %v7942_v58 = vpop.f32.mrf.mxu0 }
 0x33f   :  { %v9452_v28 = vpack.c.bf16 %v8399_v38, %v8398_v3  ;;  %v8397_v39 = vadd.f32 %v12950_v47, %v8365_v13  ;;  %v8370_v49 = vadd.f32 %v10788_v48, %v7984_v45  ;;  %v7983_v59 = vadd.f32 %v7942_v58, %v7597_v54 }
 0x340   :  { %v8325_v57 = vpop.f32.mrf.mxu1 }
 0x341   :  { %9491 = vst [vmem:[#allocation8 + $0xe8] sm:$0xff] %v9452_v28   ;;  %v9447_v25 = vpack.c.bf16 %v8397_v39, %v8396_v24  ;;  %v8368_v17 = vadd.f32 %v8325_v57, %v7982_v12  ;;  %v8402_v7 = vadd.f32 %v12950_v47, %v8370_v49 }
 0x342   :  { %v10789_v46 = vpop.f32.mrf.mxu1 }
 0x343   :  { %9490 = vst [vmem:[#allocation8 + $0xe0] sm:$0xff] %v9447_v25   ;;  %v8371_v29 = vadd.f32 %v10789_v46, %v7985_v30  ;;  %v8400_v21 = vadd.f32 %v12950_v47, %v8368_v17 }
 0x344   :  { %v8328_v23 = vpop.f32.mrf.mxu1 }
 0x345   :  { %v8403_v19 = vadd.f32 %v12950_v47, %v8371_v29  ;;  %v8369_v4 = vadd.f32 %v8328_v23, %v7983_v59 }
 0x347   :  { %v9462_v56 = vpack.c.bf16 %v8403_v19, %v8402_v7  ;;  %v8401_v34 = vadd.f32 %v12950_v47, %v8369_v4 }
 0x349   :  { %9493 = vst [vmem:[#allocation8 + $0xf8] sm:$0xff] %v9462_v56   ;;  %v9457_v11 = vpack.c.bf16 %v8401_v34, %v8400_v21 }
 0x34b   :  { %9492 = vst [vmem:[#allocation8 + $0xf0] sm:$0xff] %v9457_v11  }
 0x34c   :  { %11312 = shalt.err (!%p11309_p0)
}
 0x34d   :  { %8576 = dma.vmem_to_hbm [thread:$0]  %s8571_s26, 4096, %s13044_s3, [#allocation5], %s11328_s15, %s11328_s15, %s11329_s16  }
 0x34e   :  { %11325 = dma.done.wait [#allocation5], 4096  }
 0x34f   :  { %11326 = vsyncadd [#allocation5], 4294963200 }
 0x350   :  { %8580 = vsyncpa [#allocation4], 1 }
 0x351   :  { %8581 = vsyncpa [#allocation7], 1 }
 0x352   :  { %8582 = vsyncpa [#allocation5], 1 }

</bundles_post_ra>
